<compile_context>
chip_gen: v6e
topology: v6e:2x2x1
jax: 0.10.0
libtpu: 0.0.40
codegen_flags: <defaults>
</compile_context>

<pallas_src>
import jax
import jax.numpy as jnp
from jax.experimental import pallas as pl
from jax.experimental.pallas import tpu as pltpu


def _round_up(x, m):
    return (x + m - 1) // m * m


def reviews_encoder_kernel(x_ref, w1_ref, b1_ref, w2_ref, b2_ref, o_ref):
    # x_ref: (BT, E); w1_ref: (E, Hp); b1_ref: (1, Hp); w2_ref: (Hp, Op);
    # b2_ref: (1, Op); o_ref: (BT, Op).
    x = x_ref[...]
    h = jnp.dot(x, w1_ref[...], preferred_element_type=jnp.float32)   # (BT, Hp) on MXU
    h = jnp.maximum(h + b1_ref[...], 0.0)                             # ReLU on VPU
    o = jnp.dot(h, w2_ref[...], preferred_element_type=jnp.float32)   # (BT, Op) on MXU
    o_ref[...] = o + b2_ref[...]


def reviews_encoder(sentence_emb, w1, b1, w2, b2, *, block_rows=128):
    """Linear(E->H) -> ReLU -> Linear(H->O) applied to the last dim."""
    orig_shape = sentence_emb.shape
    E = orig_shape[-1]
    H = w1.shape[1]
    O = w2.shape[1]

    x = sentence_emb.reshape(-1, E).astype(jnp.float32)
    B = x.shape[0]

    # Lane-dense padding for hidden / output feature axes.
    Hp = _round_up(H, 128)
    Op = _round_up(O, 128)

    # Row tile: multiple of 8 sublanes; amortizes per-grid-step overhead.
    bt = min(block_rows, _round_up(B, 8))
    Bp = _round_up(B, bt)

    x_p = jnp.zeros((Bp, E), jnp.float32).at[:B, :].set(x)
    w1_p = jnp.zeros((E, Hp), jnp.float32).at[:, :H].set(w1)
    b1_p = jnp.zeros((1, Hp), jnp.float32).at[0, :H].set(b1)
    w2_p = jnp.zeros((Hp, Op), jnp.float32).at[:H, :O].set(w2)
    b2_p = jnp.zeros((1, Op), jnp.float32).at[0, :O].set(b2)

    # Grid-invariant parameters: fully resident in VMEM, no double-buffering.
    resident = pl.BlockSpec(memory_space=pltpu.MemorySpace.VMEM)

    out = pl.pallas_call(
        reviews_encoder_kernel,
        out_shape=jax.ShapeDtypeStruct((Bp, Op), jnp.float32),
        grid_spec=pltpu.PrefetchScalarGridSpec(
            num_scalar_prefetch=0,
            grid=(Bp // bt,),
            in_specs=[
                pl.BlockSpec((bt, E), lambda i: (i, 0)),   # activation row tiles (pipelined)
                resident,                                  # W1 (E, Hp)
                resident,                                  # b1 (1, Hp)
                resident,                                  # W2 (Hp, Op)
                resident,                                  # b2 (1, Op)
            ],
            out_specs=pl.BlockSpec((bt, Op), lambda i: (i, 0)),
        ),
        compiler_params=pltpu.CompilerParams(
            dimension_semantics=("parallel",)),
    )(x_p, w1_p, b1_p, w2_p, b2_p)

    out = out[:B, :O]
    return out.reshape(orig_shape[:-1] + (O,))


def reviews_encoder_ref(sentence_emb, w1, b1, w2, b2):
    h = jnp.maximum(sentence_emb @ w1 + b1, 0.0)
    return h @ w2 + b2


if __name__ == "__main__":
    # Full f32 matmul precision so the pure-JAX reference matches the kernel's
    # f32 MXU path.
    jax.config.update("jax_default_matmul_precision", "highest")

    EMB_DIM, HIDDEN_DIM, TARGET_DIM = 768, 200, 100   # module defaults
    B = 16                                            # small batch of sentence embeddings

    key = jax.random.PRNGKey(0)
    k_x, k_w1, k_b1, k_w2, k_b2 = jax.random.split(key, 5)

    sentence_emb = jax.random.normal(k_x, (B, EMB_DIM), jnp.float32)

    # PyTorch-style U(-1/sqrt(fan_in), 1/sqrt(fan_in)) init, stored (in, out).
    lim1 = 1.0 / (EMB_DIM ** 0.5)
    lim2 = 1.0 / (HIDDEN_DIM ** 0.5)
    w1 = jax.random.uniform(k_w1, (EMB_DIM, HIDDEN_DIM), jnp.float32, -lim1, lim1)
    b1 = jax.random.uniform(k_b1, (HIDDEN_DIM,), jnp.float32, -lim1, lim1)
    w2 = jax.random.uniform(k_w2, (HIDDEN_DIM, TARGET_DIM), jnp.float32, -lim2, lim2)
    b2 = jax.random.uniform(k_b2, (TARGET_DIM,), jnp.float32, -lim2, lim2)

    # block_rows=8 keeps the demo grid multi-step (2 steps) at this tiny batch
    # (exercises both the batch tiling and the tail/padding path); production
    # batches should use the default of 128.
    out = reviews_encoder(sentence_emb, w1, b1, w2, b2, block_rows=8)
    out = jax.block_until_ready(out)

    ref = reviews_encoder_ref(sentence_emb, w1, b1, w2, b2)
    assert out.shape == (B, TARGET_DIM)
    assert jnp.allclose(out, ref, atol=1e-4, rtol=1e-4), "mismatch vs reference"

    print("KERNEL_OK")
</pallas_src>

<mosaic_0001>
module attributes {stable_mosaic.version = 11 : i64} {
  func.func @reviews_encoder_kernel(%arg0: i32, %arg1: memref<8x768xf32, #tpu.memory_space<vmem>>, %arg2: memref<768x256xf32, #tpu.memory_space<vmem>>, %arg3: memref<1x256xf32, #tpu.memory_space<vmem>>, %arg4: memref<256x128xf32, #tpu.memory_space<vmem>>, %arg5: memref<1x128xf32, #tpu.memory_space<vmem>>, %arg6: memref<8x128xf32, #tpu.memory_space<vmem>>) attributes {dimension_semantics = [#tpu.dimension_semantics<parallel>], iteration_bounds = array<i64: 2>, scalar_prefetch = 0 : i64, scratch_operands = 0 : i64, tpu.core_type = #tpu.core_type<tc>, window_params = [{transform_indices = @transform_0, window_bounds = array<i64: 8, 768>}, {pipeline_mode = #tpu.pipeline_mode<synchronous>, transform_indices = @transform_1, window_bounds = array<i64: 768, 256>}, {pipeline_mode = #tpu.pipeline_mode<synchronous>, transform_indices = @transform_2, window_bounds = array<i64: 1, 256>}, {pipeline_mode = #tpu.pipeline_mode<synchronous>, transform_indices = @transform_3, window_bounds = array<i64: 256, 128>}, {pipeline_mode = #tpu.pipeline_mode<synchronous>, transform_indices = @transform_4, window_bounds = array<i64: 1, 128>}, {transform_indices = @transform_5, window_bounds = array<i64: 8, 128>}]} {
    %c0 = arith.constant 0 : index
    %c0_0 = arith.constant 0 : index
    %0 = vector.load %arg1[%c0, %c0_0] : memref<8x768xf32, #tpu.memory_space<vmem>>, vector<8x768xf32>
    %c0_1 = arith.constant 0 : index
    %c0_2 = arith.constant 0 : index
    %1 = vector.load %arg2[%c0_1, %c0_2] : memref<768x256xf32, #tpu.memory_space<vmem>>, vector<768x256xf32>
    %cst = arith.constant dense<0.000000e+00> : vector<8x256xf32>
    %2 = tpu.matmul %0, %1, %cst {dimension_numbers = #tpu.dot_dimension_numbers<[1], [0], [0], [1], [0, 0, 1, 1], [], []>, precision = #tpu.contract_precision<fp32>} : vector<8x768xf32>, vector<768x256xf32>, vector<8x256xf32> -> vector<8x256xf32>
    %c0_3 = arith.constant 0 : index
    %c0_4 = arith.constant 0 : index
    %3 = vector.load %arg3[%c0_3, %c0_4] : memref<1x256xf32, #tpu.memory_space<vmem>>, vector<1x256xf32>
    %4 = vector.broadcast %3 : vector<1x256xf32> to vector<8x256xf32>
    %5 = arith.addf %2, %4 : vector<8x256xf32>
    %cst_5 = arith.constant 0.000000e+00 : f32
    %6 = vector.broadcast %cst_5 : f32 to vector<8x256xf32>
    %7 = arith.maximumf %5, %6 : vector<8x256xf32>
    %c0_6 = arith.constant 0 : index
    %c0_7 = arith.constant 0 : index
    %8 = vector.load %arg4[%c0_6, %c0_7] : memref<256x128xf32, #tpu.memory_space<vmem>>, vector<256x128xf32>
    %cst_8 = arith.constant dense<0.000000e+00> : vector<8x128xf32>
    %9 = tpu.matmul %7, %8, %cst_8 {dimension_numbers = #tpu.dot_dimension_numbers<[1], [0], [0], [1], [0, 0, 1, 1], [], []>, precision = #tpu.contract_precision<fp32>} : vector<8x256xf32>, vector<256x128xf32>, vector<8x128xf32> -> vector<8x128xf32>
    %c0_9 = arith.constant 0 : index
    %c0_10 = arith.constant 0 : index
    %10 = vector.load %arg5[%c0_9, %c0_10] : memref<1x128xf32, #tpu.memory_space<vmem>>, vector<1x128xf32>
    %11 = vector.broadcast %10 : vector<1x128xf32> to vector<8x128xf32>
    %12 = arith.addf %9, %11 : vector<8x128xf32>
    %c0_11 = arith.constant 0 : index
    %c0_12 = arith.constant 0 : index
    %13 = vector.load %arg6[%c0_11, %c0_12] : memref<8x128xf32, #tpu.memory_space<vmem>>, vector<8x128xf32>
    tpu.vector_store %arg6[%c0_11, %c0_12], %12 {strides = array<i32>} : memref<8x128xf32, #tpu.memory_space<vmem>>, vector<8x128xf32>,
    return
  }
  func.func @transform_0(%arg0: i32) -> (i32, i32) {
    %c0_i32 = arith.constant 0 : i32
    %c0_i32_0 = arith.constant 0 : i32
    return %arg0, %c0_i32 : i32, i32
  }
  func.func @transform_1(%arg0: i32) -> (i32, i32) {
    %c0_i32 = arith.constant 0 : i32
    %c0_i32_0 = arith.constant 0 : i32
    %c0_i32_1 = arith.constant 0 : i32
    return %c0_i32, %c0_i32_0 : i32, i32
  }
  func.func @transform_2(%arg0: i32) -> (i32, i32) {
    %c0_i32 = arith.constant 0 : i32
    %c0_i32_0 = arith.constant 0 : i32
    %c0_i32_1 = arith.constant 0 : i32
    return %c0_i32, %c0_i32_0 : i32, i32
  }
  func.func @transform_3(%arg0: i32) -> (i32, i32) {
    %c0_i32 = arith.constant 0 : i32
    %c0_i32_0 = arith.constant 0 : i32
    %c0_i32_1 = arith.constant 0 : i32
    return %c0_i32, %c0_i32_0 : i32, i32
  }
  func.func @transform_4(%arg0: i32) -> (i32, i32) {
    %c0_i32 = arith.constant 0 : i32
    %c0_i32_0 = arith.constant 0 : i32
    %c0_i32_1 = arith.constant 0 : i32
    return %c0_i32, %c0_i32_0 : i32, i32
  }
  func.func @transform_5(%arg0: i32) -> (i32, i32) {
    %c0_i32 = arith.constant 0 : i32
    %c0_i32_0 = arith.constant 0 : i32
    return %arg0, %c0_i32 : i32, i32
  }
}

</mosaic_0001>

<bundles_post_ra>
// kernel: tpu_custom_call.1
= control target key start
LH: loop header
LB: loop body
LE: loop exit
PB: predicated region body
PF: predicated region fallthrough
CT: control target
= control target key end

     0   :  { %10 = vsyncpa [#allocation3], 0  ;;  %s10160_s0 = inlined_call_operand.hbm [shape: f32[16,768], index: 0, kind: input, shape index: {}]   ;;  %s10161_s1 = inlined_call_operand.hbm [shape: f32[768,256], index: 1, kind: input, shape index: {}]   ;;  %s10162_s2 = inlined_call_operand.vmem [shape: f32[1,256], index: 2, kind: input, shape index: {}]   ;;  %s10163_s3 = inlined_call_operand.hbm [shape: f32[256,128], index: 3, kind: input, shape index: {}]   ;;  %s10164_s4 = inlined_call_operand.vmem [shape: f32[1,128], index: 4, kind: input, shape index: {}]   ;;  %s10165_s5 = inlined_call_operand.hbm [shape: f32[16,128], index: 5, kind: output, shape index: {}]  }
   0x1   :  { %12 = vsyncpa [#allocation3 + $0x1], 0 }
   0x2   :  { %13 = vsyncpa [#allocation6], 0 }
   0x3   :  { %14 = vsyncpa [#allocation4], 0 }
   0x4   :  { %16 = vsyncpa [#allocation4 + $0x1], 0  ;;  %s5826_s18 = smov 0   ;;  %s5828_s19 = smov 0  }
   0x5   :  { %s5830_s20 = smov 0   ;;  %s5832_s21 = smov 0  }
   0x6 LB: > { %s5847_s22 = sadd.s32 4294967295, %s5786_s21   ;;  %s5339_s23 = sadd.s32 4294967294, %s5786_s21   ;;  %s5786_s21 = sphi %s5832_s21, %s12228_s21   ;;  %s5782_s20 = sphi %s5830_s20, %s12227_s20   ;;  %s5778_s19 = sphi %s5828_s19, %s12226_s19   ;;  %s5774_s18 = sphi %s5826_s18, %s12225_s18  }
   0x7   : > { %p42_p0 = scmp.ne.s32.totalorder %s5778_s19, %s5774_s18  ;;  %p10166_p1 = scmp.eq.s32.totalorder %s5847_s22, 0 }
   0x8   : > { %p156_p3 = scmp.eq.s32.totalorder %s5339_s23, 1  ;;  %p5340_p5 = scmp.ge.s32.totalorder %s5786_s21, 1 }
   0x9   : > { %p5856_p4 = por %p10166_p1, %p42_p0  ;;  %p163_p7 = scmp.lt.s32.totalorder %s5786_s21, 3 }
   0xa   : > { %p5861_p6 = por %p156_p3, %p42_p0  ;;  %s5788_s27 = smov [#allocation5]  }
   0xb   : > { %s10903_s24 = scalar_select %p5856_p4, 1, 0 }
   0xc   : > { %s10904_s25 = scalar_select %p5861_p6, 1, 0 }
   0xd   : > { %p5866_p8 = pnand %p5340_p5, %p163_p7  ;;  %s175_s28 = sshll.u32 %s5788_s27, 4  ;;  %s176_s28 = int_to_ptr.vmem [resolvable:$true] %s175_s28 }
   0xe   : > { %s5789_s30 = smov [#allocation7]   ;;  %s5649_s7 = scalar_lea.vmem %s176_s28, 24576 }
   0xf   : > { %s10905_s26 = scalar_select %p5866_p8, 1, 0 }
  0x10   : > { %p5579_p9 = pneg %p5866_p8  ;;  %s191_s6 = sshll.u32 %s5789_s30, 4  ;;  %s192_s6 = int_to_ptr.vmem [resolvable:$true] %s191_s6 }
  0x11   : > { %p5650_p13 = scmp.ne.s32.totalorder %s176_s28, %s5649_s7  ;;  %p5657_p5 = scmp.lt.s32.totalorder %s176_s28, %s176_s28 }
  0x12   : > { %p5875_p11 = pnand %p5579_p9, %p10166_p1  ;;  %p5658_p7 = scmp.lt.s32.totalorder %s5649_s7, %s5649_s7 }
  0x14   : > { %p5640_p12 = pneg %p5875_p11  ;;  %p5659_p10 = por %p5658_p7, %p5657_p5 }
  0x16   : > { %p5652_p0 = pnand %p5650_p13, %p5640_p12 }
  0x18   : > { %p5653_p3 = pneg %p5652_p0 }
  0x1a   : > { %p5660_p9 = pnand %p5659_p10, %p5653_p3 }
  0x1c   : > { %5663 = shalt.err (!%p5660_p9)
}
  0x1d   : > { %s5790_s8 = smov 256   ;;  %s5791_s9 = smov 16  }
  0x1e   : > { %5582 = dma.hbm_to_vmem [thread:$0]  (!%p5875_p11), %s10161_s1, 24576, %s176_s28, [#allocation6], %s5790_s8, %s5790_s8, %s5791_s9  }
  0x1f   : > { %s5675_s12 = scalar_lea.vmem %s192_s6, 4096  ;;  %p5683_p2 = scmp.lt.s32.totalorder %s192_s6, %s192_s6 }
  0x20   : > { %p5676_p1 = scmp.ne.s32.totalorder %s192_s6, %s5675_s12  ;;  %p5684_p6 = scmp.lt.s32.totalorder %s5675_s12, %s5675_s12 }
  0x22   : > { %p5678_p13 = pnand %p5676_p1, %p5640_p12  ;;  %p5685_p5 = por %p5684_p6, %p5683_p2 }
  0x24   : > { %p5679_p0 = pneg %p5678_p13 }
  0x26   : > { %p5686_p10 = pnand %p5685_p5, %p5679_p0 }
  0x28   : > { %5689 = shalt.err (!%p5686_p10)
}
  0x29   : > { %s5792_s13 = smov 128   ;;  %s5793_s14 = smov 8  }
  0x2a   : > { %5585 = dma.hbm_to_vmem [thread:$0]  (!%p5875_p11), %s10163_s3, 4096, %s192_s6, [#allocation6], %s5792_s13, %s5792_s13, %s5793_s14  }
  0x2b   : > { %s5898_s17 = sadd.s32 1, %s5786_s21   ;;  %s29_s27 = sadd.s32 1, %s5782_s20 }
  0x2c   : > { %s26_s23 = ssub.s32 %s5786_s21, %s5898_s17  ;;  %p36_p2 = scmp.ne.s32.totalorder %s5782_s20, %s5778_s19 }
  0x2d   : > { %p27_p1 = scmp.eq.s32.totalorder %s26_s23, 0  ;;  %p37_p6 = scmp.eq.s32.totalorder %s5786_s21, 0 }
  0x2e   : > { %p10907_p3 = scmp.eq.s32.totalorder %s5847_s22, 1  ;;  %p5596_p9 = scmp.lt.s32.totalorder %s5786_s21, 2 }
  0x2f   : > { %s5907_s28 = scalar_select %p27_p1, %s5782_s20, %s29_s27  }
  0x30   : > { %p38_p12 = por %p37_p6, %p36_p2  ;;  %p5911_p7 = por %p10907_p3, %p36_p2 }
  0x31   : > { %s208_s29 = sand.u32 1, %s5782_s20   ;;  %s5565_s6 = smul.u32 768, %s5786_s21 }
  0x32   : > { %s10908_s30 = scalar_select %p5911_p7, 1, 0 }
  0x33   : > { %s5564_s7 = smul.u32 48, %s208_s29  ;;  %p5918_p11 = pnand %p5596_p9, %p38_p12 }
  0x34   : > { %s5925_s11 = scalar_lea.hbm %s10160_s0, %s5565_s6  ;;  %s209_s14 = scalar_lea.sflag [#allocation3], %s208_s29 }
  0x35   : > { %s212_s12 = scalar_lea.vmem [#allocation2], %s5564_s7  ;;  %s5690_s15 = scalar_lea.hbm %s5925_s11, 768 }
  0x36   : > { %s220_s13 = sshll.u32 %s212_s12, 4  ;;  %p5691_p13 = scmp.ne.s32.totalorder %s5925_s11, %s5690_s15  ;;  %s221_s13 = int_to_ptr.vmem [resolvable:$true] %s220_s13 }
  0x37   : > { %p5692_p0 = pneg %p5918_p11  ;;  %s5695_s27 = scalar_lea.hbm %s10160_s0, 1536 }
  0x38   : > { %p5696_p1 = scmp.lt.s32.totalorder %s5925_s11, %s10160_s0  ;;  %p5697_p2 = scmp.lt.s32.totalorder %s5695_s27, %s5690_s15 }
  0x39   : > { %p5693_p5 = pnand %p5692_p0, %p5691_p13 }
  0x3a   : > { %p5698_p6 = por %p5697_p2, %p5696_p1 }
  0x3b   : > { %p5694_p10 = pneg %p5693_p5 }
  0x3d   : > { %p5699_p12 = pnand %p5698_p6, %p5694_p10 }
  0x3f   : > { %5702 = shalt.err (!%p5699_p12)
}
  0x40   : > { %s5703_s7 = scalar_lea.vmem %s221_s13, 768  ;;  %s5794_s29 = smov [#allocation2]  }
  0x41   : > { %p5704_p3 = scmp.ne.s32.totalorder %s221_s13, %s5703_s7  ;;  %s5708_s10 = sshll.u32 %s5794_s29, 4  ;;  %s5709_s10 = int_to_ptr.vmem [resolvable:$false] %s5708_s10 }
  0x42   : > { %s5710_s12 = scalar_lea.vmem %s5709_s10, 1536  ;;  %p5711_p13 = scmp.lt.s32.totalorder %s221_s13, %s5709_s10 }
  0x43   : > { %p5706_p9 = pnand %p5704_p3, %p5692_p0  ;;  %p5712_p5 = scmp.lt.s32.totalorder %s5710_s12, %s5703_s7 }
  0x45   : > { %p5707_p7 = pneg %p5706_p9  ;;  %p5713_p4 = por %p5712_p5, %p5711_p13 }
  0x47   : > { %p5714_p8 = pnand %p5713_p4, %p5707_p7 }
  0x49   : > { %5717 = shalt.err (!%p5714_p8)
}
  0x4a   : > { %5589 = dma.hbm_to_vmem [thread:$0]  (!%p5918_p11), %s5925_s11, 768, %s221_s13, %s209_s14  }
  0x4b   : > { %p10910_p10 = scmp.ne.s32.totalorder %s10905_s26, 0 }
  0x4d   : > { %229 = sbr.rel (%p10910_p10) target bundleno = 1214 (0x4be), region = 40 }
  0x52   : > { %s5944_s15 = sand.u32 1, %s5778_s19   ;;  %p10911_p0 = scmp.ne.s32.totalorder %s10903_s24, 0 }
  0x53   : > { %s5566_s16 = smul.u32 48, %s5944_s15  ;;  %s232_s23 = scalar_lea.sflag [#allocation3], %s5944_s15 }
  0x55   : > { %s5948_s27 = scalar_lea.vmem [#allocation2], %s5566_s16 }
  0x56   : > { %5761 = dma.done.wait (%p10911_p0), %s232_s23, 768  }
  0x57   : > { %5763 = vsyncadd (%p10911_p0), %s232_s23, 4294966528  ;;  %p10912_p4 = scmp.eq.s32.totalorder %s5847_s22, 0 }
  0x59   : > { %5765 = dma.done.wait (%p10912_p4), [#allocation6], 28672   ;;  %p10913_p8 = pmov %p10912_p4 }
  0x5a   : > { %v307_v0 = vld [vmem:[#allocation5 + $0xf8] sm:$0xff]  ;;  %v306_v1 = vld [vmem:[#allocation5 + $0xf0] sm:$0xff]  ;;  %v305_v2 = vld [vmem:[#allocation5 + $0xe8] sm:$0xff]  ;;  %s5348_s13 = sshll.u32 %s5944_s15, 3  ;;  %s5351_s14 = sshll.u32 %s5847_s22, 7 }
  0x5b   : > { %5767 = vsyncadd (%p10913_p8), [#allocation6], 4294938624  ;;  %v5958_v3 = vand.u32 4294901760, %v307_v0  ;;  %v5960_v4 = vand.u32 4294901760, %v306_v1  ;;  %v5962_v5 = vand.u32 4294901760, %v305_v2  ;;  %v304_v6 = vld [vmem:[#allocation5 + $0xe0] sm:$0xff]  ;;  %s5248_s10 = scalar_lea.hbm %s10165_s5, %s5351_s14 }
  0x5c   : > { %v303_v7 = vld [vmem:[#allocation5 + $0xd8] sm:$0xff]  ;;  %v302_v8 = vld [vmem:[#allocation5 + $0xd0] sm:$0xff]  ;;  %v5964_v9 = vand.u32 4294901760, %v304_v6  ;;  %v301_v12 = vld [vmem:[#allocation5 + $0xc8] sm:$0xff]  ;;  %s269_s9 = scalar_lea.vmem [#allocation8], %s5348_s13  ;;  %s5237_s12 = scalar_lea.sflag [#allocation4], %s5944_s15 }
  0x5d   : > { %v5966_v10 = vand.u32 4294901760, %v303_v7  ;;  %v5968_v11 = vand.u32 4294901760, %v302_v8  ;;  %v300_v13 = vld [vmem:[#allocation5 + $0xc0] sm:$0xff]  ;;  %v299_v14 = vld [vmem:[#allocation5 + $0xb8] sm:$0xff]  ;;  %481 = vmatprep.subr.mxu0 %v5958_v3  ;;  %v5971_v15 = vand.u32 4294901760, %v301_v12  ;;  %v5978_v18 = vsub.f32 %v307_v0, %v5958_v3  ;;  %v5980_v19 = vld [vmem:[#allocation5 + $0xb0] sm:$0xff] }
  0x5e   : > { %v5973_v16 = vand.u32 4294901760, %v300_v13  ;;  %v5975_v17 = vand.u32 4294901760, %v299_v14  ;;  %v5982_v20 = vld [vmem:[#allocation5 + $0xa8] sm:$0xff]  ;;  %v5984_v21 = vld [vmem:[#allocation5 + $0xa0] sm:$0xff]  ;;  %483 = vmatpush1.msra.mxu0 %v5960_v4  ;;  %v5988_v22 = vand.u32 4294901760, %v5980_v19  ;;  %v5991_v23 = vsub.f32 %v306_v1, %v5960_v4  ;;  %v5999_v26 = vld [vmem:[#allocation5 + $0x98] sm:$0xff] }
  0x5f   : > { %v5994_v24 = vand.u32 4294901760, %v5982_v20  ;;  %v5997_v25 = vsub.f32 %v305_v2, %v5962_v5  ;;  %v6001_v27 = vld [vmem:[#allocation5 + $0x90] sm:$0xff]  ;;  %v6003_v28 = vld [vmem:[#allocation5 + $0x88] sm:$0xff]  ;;  %485 = vmatprep.subr.mxu0 %v5962_v5  ;;  %v10183_v29 = vand.u32 4294901760, %v5978_v18  ;;  %v6008_v30 = vand.u32 4294901760, %v5984_v21  ;;  %v6025_v37 = vld [vmem:[#allocation5 + $0x80] sm:$0xff] }
  0x60   : > { %v6011_v31 = vsub.f32 %v304_v6, %v5964_v9  ;;  %v6014_v32 = vand.u32 4294901760, %v5999_v26  ;;  %487 = vmatpush1.msra.mxu0 %v5964_v9  ;;  %v10181_v33 = vand.u32 4294901760, %v5991_v23  ;;  %v6020_v35 = vsub.f32 %v303_v7, %v5966_v10  ;;  %v6049_v46 = vld [vmem:[#allocation5 + $0x78] sm:$0xff]  ;;  %v6059_v51 = vld [vmem:[#allocation5 + $0x70] sm:$0xff]  ;;  %v6066_v56 = vld [vmem:[#allocation5 + $0x68] sm:$0xff]  ;;  %s5250_s6 = sshll.u32 %s269_s9, 4  ;;  %s5251_s6 = int_to_ptr.vmem [resolvable:$true] %s5250_s6 }
  0x61   : > { %10914 = vst [vmem:[#allocation12_spill] sm:$0xff] %v5994_v24  ;;  %10915 = vst [vmem:[#allocation13_spill] sm:$0xff] %v6008_v30  ;;  %v10180_v34 = vand.u32 4294901760, %v5997_v25  ;;  %v6023_v36 = vand.u32 4294901760, %v6001_v27  ;;  %489 = vmatprep.subr.mxu0 %v5966_v10  ;;  %v628_v38 = vsub.f32 %v5978_v18, %v10183_v29  ;;  %v6033_v40 = vsub.f32 %v302_v8, %v5968_v11  ;;  %v6078_v61 = vld [vmem:[#allocation5 + $0x60] sm:$0xff]  ;;  %v6090_v2 = vld [vmem:[#allocation5 + $0x58] sm:$0xff] }
  0x62   : > { %10916 = vst [vmem:[#allocation14_spill] sm:$0xff] %v6014_v32  ;;  %v10178_v39 = vand.u32 4294901760, %v6011_v31  ;;  %v6036_v41 = vand.u32 4294901760, %v6003_v28  ;;  %491 = vmatpush1.msra.mxu0 %v5968_v11  ;;  %v634_v42 = vsub.f32 %v5991_v23, %v10181_v33  ;;  %v10176_v44 = vand.u32 4294901760, %v6020_v35  ;;  %s5718_s16 = scalar_lea.vmem %s5251_s6, 128  ;;  %p12222_p11 = scmp.ne.s32.totalorder %s10908_s30, 0 }
  0x63   : > { %10917 = vst [vmem:[#allocation15_spill] sm:$0xff] %v6023_v36  ;;  %v640_v43 = vsub.f32 %v5997_v25, %v10180_v34  ;;  %v6047_v45 = vsub.f32 %v301_v12, %v5971_v15  ;;  %493 = vmatprep.subr.mxu0 %v5971_v15  ;;  %v629_v47 = vand.u32 4294901760, %v628_v38  ;;  %v10175_v49 = vand.u32 4294901760, %v6033_v40  ;;  %v6191_v34 = vld [vmem:[#allocation5 + $0x20] sm:$0xff]  ;;  %p5719_p7 = scmp.ne.s32.totalorder %s5251_s6, %s5718_s16  ;;  %s5795_s23 = smov [#allocation8]  }
  0x64   : > { %10918 = vst [vmem:[#allocation16_spill] sm:$0xff] %v6036_v41  ;;  %v646_v48 = vsub.f32 %v6011_v31, %v10178_v39  ;;  %v6057_v50 = vand.u32 4294901760, %v6025_v37  ;;  %495 = vmatpush1.msra.mxu0 %v5973_v16  ;;  %v635_v52 = vand.u32 4294901760, %v634_v42  ;;  %v652_v54 = vsub.f32 %v6020_v35, %v10176_v44  ;;  %v6181_v39 = vld [vmem:[#allocation5 + $0x28] sm:$0xff] }
  0x65   : > { %v641_v53 = vand.u32 4294901760, %v640_v43  ;;  %v10173_v55 = vand.u32 4294901760, %v6047_v45  ;;  %497 = vmatprep.subr.mxu0 %v5975_v17  ;;  %630 = vmatprep.subr.mxu1 %v629_v47  ;;  %v658_v58 = vsub.f32 %v6033_v40, %v10175_v49  ;;  %v6073_v59 = vsub.f32 %v300_v13, %v5973_v16  ;;  %v6101_v13 = vld [vmem:[#allocation5 + $0x50] sm:$0xff]  ;;  %p5720_p1 = pnand %p5719_p7, %p12222_p11 }
  0x66   : > { %10919 = vst [vmem:[#allocation17_spill] sm:$0xff] %v6057_v50  ;;  %v647_v57 = vand.u32 4294901760, %v646_v48  ;;  %v6076_v60 = vand.u32 4294901760, %v6049_v46  ;;  %499 = vmatpush1.msra.mxu0 %v5988_v22  ;;  %636 = vmatpush1.msra.mxu1 %v635_v52  ;;  %v653_v62 = vand.u32 4294901760, %v652_v54  ;;  %v6085_v0 = vsub.f32 %v299_v14, %v5975_v17  ;;  %v6168_v49 = vld [vmem:[#allocation5 + $0x30] sm:$0xff] }
  0x67   : > { %v664_v63 = vsub.f32 %v6047_v45, %v10173_v55  ;;  %v6088_v1 = vand.u32 4294901760, %v6059_v51  ;;  %501 = vmatprep.subr.mxu0 %v5994_v24  ;;  %642 = vmatprep.subr.mxu1 %v641_v53  ;;  %v659_v6 = vand.u32 4294901760, %v658_v58  ;;  %v10171_v7 = vand.u32 4294901760, %v6073_v59  ;;  %p5721_p2 = pneg %p5720_p1 }
  0x68   : > { %10920 = vst [vmem:[#allocation18_spill] sm:$0xff] %v6076_v60  ;;  %v6096_v8 = vsub.f32 %v5980_v19, %v5988_v22  ;;  %v6099_v12 = vand.u32 4294901760, %v6066_v56  ;;  %503 = vmatpush1.msra.mxu0 %v6008_v30  ;;  %648 = vmatpush1.msra.mxu1 %v647_v57  ;;  %v10170_v38 = vand.u32 4294901760, %v6085_v0  ;;  %v6107_v42 = vsub.f32 %v5982_v20, %v5994_v24  ;;  %v6124_v20 = vld [vmem:[#allocation5 + $0x48] sm:$0xff] }
  0x69   : > { %10921 = vst [vmem:[#allocation19_spill] sm:$0xff] %v6088_v1  ;;  %v665_v14 = vand.u32 4294901760, %v664_v63  ;;  %v6110_v43 = vand.u32 4294901760, %v6078_v61  ;;  %505 = vmatprep.subr.mxu0 %v6014_v32  ;;  %654 = vmatprep.subr.mxu1 %v653_v62  ;;  %v670_v19 = vsub.f32 %v6073_v59, %v10171_v7  ;;  %v6119_v48 = vsub.f32 %v5984_v21, %v6008_v30 }
  0x6a   : > { %10922 = vst [vmem:[#allocation20_spill] sm:$0xff] %v6099_v12  ;;  %v10172_v47 = vand.u32 4294901760, %v6096_v8  ;;  %v6122_v52 = vand.u32 4294901760, %v6090_v2  ;;  %507 = vmatpush1.msra.mxu0 %v6023_v36  ;;  %660 = vmatpush1.msra.mxu1 %v659_v6  ;;  %v676_v53 = vsub.f32 %v6085_v0, %v10170_v38  ;;  %v10174_v54 = vand.u32 4294901760, %v6107_v42  ;;  %v6147_v38 = vld [vmem:[#allocation5 + $0x40] sm:$0xff] }
  0x6b   : > { %10923 = vst [vmem:[#allocation21_spill] sm:$0xff] %v6110_v43  ;;  %v6133_v57 = vsub.f32 %v5999_v26, %v6014_v32  ;;  %v6136_v21 = vand.u32 4294901760, %v6101_v13  ;;  %509 = vmatprep.subr.mxu0 %v6036_v41  ;;  %666 = vmatprep.subr.mxu1 %v665_v14  ;;  %v671_v58 = vand.u32 4294901760, %v670_v19  ;;  %v10177_v63 = vand.u32 4294901760, %v6119_v48 }
  0x6c   : > { %10924 = vst [vmem:[#allocation22_spill] sm:$0xff] %v6122_v52  ;;  %v682_v62 = vsub.f32 %v6096_v8, %v10172_v47  ;;  %v6145_v6 = vsub.f32 %v6001_v27, %v6023_v36  ;;  %511 = vmatpush1.msra.mxu0 %v6057_v50  ;;  %v677_v26 = vand.u32 4294901760, %v676_v53  ;;  %v688_v14 = vsub.f32 %v6107_v42, %v10174_v54  ;;  %v6157_v47 = vld [vmem:[#allocation5 + $0x38] sm:$0xff] }
  0x6d   : > { %10925 = vst [vmem:[#allocation23_spill] sm:$0xff] %v6136_v21  ;;  %v10179_v19 = vand.u32 4294901760, %v6133_v57  ;;  %v6155_v7 = vand.u32 4294901760, %v6124_v20  ;;  %672 = vmatpush1.msra.mxu1 %v671_v58  ;;  %513 = vmatprep.subr.mxu0 %v6076_v60  ;;  %v694_v55 = vsub.f32 %v6119_v48, %v10177_v63  ;;  %v6166_v54 = vsub.f32 %v6003_v28, %v6036_v41  ;;  %v6271_v36 = vld [vmem:[#allocation5 + $0x1f8] sm:$0xff] }
  0x6e   : > { %v683_v27 = vand.u32 4294901760, %v682_v62  ;;  %v10182_v53 = vand.u32 4294901760, %v6145_v6  ;;  %678 = vmatprep.subr.mxu1 %v677_v26  ;;  %515 = vmatpush1.msra.mxu0 %v6088_v1  ;;  %v689_v44 = vand.u32 4294901760, %v688_v14  ;;  %v6175_v62 = vand.u32 4294901760, %v6147_v38 }
  0x6f   : > { %10926 = vst [vmem:[#allocation24_spill] sm:$0xff] %v6155_v7  ;;  %v700_v58 = vsub.f32 %v6133_v57, %v10179_v19  ;;  %v6179_v63 = vsub.f32 %v6025_v37, %v6057_v50  ;;  %517 = vmatprep.subr.mxu0 %v6099_v12  ;;  %v695_v28 = vand.u32 4294901760, %v694_v55  ;;  %v10186_v14 = vand.u32 4294901760, %v6166_v54 }
  0x70   : > { %10927 = vst [vmem:[#allocation25_spill] sm:$0xff] %v6175_v62  ;;  %684 = vmatpush1.msra.mxu1 %v683_v27  ;;  %v706_v26 = vsub.f32 %v6145_v6, %v10182_v53  ;;  %v6189_v19 = vand.u32 4294901760, %v6157_v47  ;;  %519 = vmatpush1.msra.mxu0 %v6110_v43  ;;  %v6197_v55 = vsub.f32 %v6049_v46, %v6076_v60  ;;  %v6200_v33 = vand.u32 4294901760, %v6168_v49  ;;  %v6202_v53 = vld [vmem:[#allocation5 + $0x18] sm:$0xff] }
  0x71   : > { %690 = vmatprep.subr.mxu1 %v689_v44  ;;  %v701_v37 = vand.u32 4294901760, %v700_v58  ;;  %v10189_v27 = vand.u32 4294901760, %v6179_v63  ;;  %521 = vmatprep.subr.mxu0 %v6122_v52  ;;  %v712_v44 = vsub.f32 %v6166_v54, %v10186_v14  ;;  %v6210_v58 = vsub.f32 %v6059_v51, %v6088_v1  ;;  %v6227_v51 = vld [vmem:[#allocation5 + $0x10] sm:$0xff] }
  0x72   : > { %10928 = vst [vmem:[#allocation26_spill] sm:$0xff] %v6189_v19  ;;  %10929 = vst [vmem:[#allocation27_spill] sm:$0xff] %v6200_v33  ;;  %696 = vmatpush1.msra.mxu1 %v695_v28  ;;  %v707_v29 = vand.u32 4294901760, %v706_v26  ;;  %v6213_v46 = vand.u32 4294901760, %v6181_v39  ;;  %523 = vmatpush1.msra.mxu0 %v6136_v21  ;;  %v6222_v60 = vsub.f32 %v6066_v56, %v6099_v12  ;;  %v6225_v14 = vand.u32 4294901760, %v6191_v34  ;;  %v6238_v56 = vld [vmem:[#allocation5 + $0x8] sm:$0xff] }
  0x73   : > { %702 = vmatprep.subr.mxu1 %v701_v37  ;;  %v718_v28 = vsub.f32 %v6179_v63, %v10189_v27  ;;  %525 = vmatprep.subr.mxu0 %v6155_v7  ;;  %v713_v37 = vand.u32 4294901760, %v712_v44  ;;  %v6233_v27 = vsub.f32 %v6078_v61, %v6110_v43  ;;  %v6236_v26 = vand.u32 4294901760, %v6202_v53  ;;  %v6261_v44 = vld [vmem:[#allocation5] sm:$0xff] }
  0x74   : > { %10930 = vst [vmem:[#allocation28_spill] sm:$0xff] %v6213_v46  ;;  %10931 = vst [vmem:[#allocation29_spill] sm:$0xff] %v6225_v14  ;;  %708 = vmatpush1.msra.mxu1 %v707_v29  ;;  %527 = vmatpush1.msra.mxu0 %v6175_v62  ;;  %v10934_v50 = vand.u32 4294901760, %v6197_v55  ;;  %v6247_v1 = vsub.f32 %v6090_v2, %v6122_v52  ;;  %v10936_v61 = vand.u32 4294901760, %v6210_v58  ;;  %v6269_v41 = vand.u32 4294901760, %v6238_v56 }
  0x75   : > { %10932 = vst [vmem:[#allocation30_spill] sm:$0xff] %v6233_v27  ;;  %10933 = vst [vmem:[#allocation31_spill] sm:$0xff] %v6236_v26  ;;  %v719_v12 = vand.u32 4294901760, %v718_v28  ;;  %714 = vmatprep.subr.mxu1 %v713_v37  ;;  %529 = vmatprep.subr.mxu0 %v6189_v19  ;;  %v6255_v28 = vand.u32 4294901760, %v6227_v51  ;;  %v10939_v37 = vand.u32 4294901760, %v6222_v60  ;;  %v6289_v24 = vand.u32 4294901760, %v6261_v44 }
  0x76   : > { %v724_v29 = vsub.f32 %v6197_v55, %v10934_v50  ;;  %10935 = vst [vmem:[#allocation32_spill] sm:$0xff] %v6247_v1  ;;  %v730_v43 = vsub.f32 %v6210_v58, %v10936_v61  ;;  %v6259_v50 = vsub.f32 %v6101_v13, %v6136_v21  ;;  %531 = vmatpush1.msra.mxu0 %v6200_v33  ;;  %10940 = vst [vmem:[#allocation35_spill] sm:$0xff] %v6269_v41 }
  0x77   : > { %10937 = vst [vmem:[#allocation33_spill] sm:$0xff] %v6255_v28  ;;  %720 = vmatpush1.msra.mxu1 %v719_v12  ;;  %v736_v52 = vsub.f32 %v6222_v60, %v10939_v37  ;;  %533 = vmatprep.subr.mxu0 %v6213_v46  ;;  %v10941_v13 = vand.u32 4294901760, %v6233_v27  ;;  %v6280_v21 = vsub.f32 %v6124_v20, %v6155_v7  ;;  %v6282_v37 = vld [vmem:[#allocation5 + $0x1f0] sm:$0xff]  ;;  %10944 = vst [vmem:[#allocation37_spill] sm:$0xff] %v6289_v24 }
  0x78   : > { %10938 = vst [vmem:[#allocation34_spill] sm:$0xff] %v6259_v50  ;;  %v725_v2 = vand.u32 4294901760, %v724_v29  ;;  %v731_v32 = vand.u32 4294901760, %v730_v43  ;;  %535 = vmatpush1.msra.mxu0 %v6225_v14  ;;  %v10943_v43 = vand.u32 4294901760, %v6247_v1  ;;  %v6295_v29 = vld [vmem:[#allocation5 + $0x1e8] sm:$0xff] }
  0x79   : > { %v742_v12 = vsub.f32 %v6233_v27, %v10941_v13  ;;  %10942 = vst [vmem:[#allocation36_spill] sm:$0xff] %v6280_v21  ;;  %v737_v61 = vand.u32 4294901760, %v736_v52  ;;  %v6293_v13 = vsub.f32 %v6147_v38, %v6175_v62  ;;  %537 = vmatprep.subr.mxu0 %v6236_v26  ;;  %v10946_v52 = vand.u32 4294901760, %v6259_v50 }
  0x7a   : > { %726 = vmatprep.subr.mxu1 %v725_v2  ;;  %v748_v30 = vsub.f32 %v6247_v1, %v10943_v43  ;;  %v6303_v43 = vand.u32 4294901760, %v6271_v36  ;;  %v6305_v1 = vld [vmem:[#allocation5 + $0x1e0] sm:$0xff]  ;;  %539 = vmatpush1.msra.mxu0 %v6255_v28  ;;  %v6314_v62 = vand.u32 4294901760, %v6282_v37 }
  0x7b   : > { %10945 = vst [vmem:[#allocation38_spill] sm:$0xff] %v6293_v13  ;;  %732 = vmatpush1.msra.mxu1 %v731_v32  ;;  %v743_v20 = vand.u32 4294901760, %v742_v12  ;;  %v754_v2 = vsub.f32 %v6259_v50, %v10946_v52  ;;  %v6311_v12 = vsub.f32 %v6157_v47, %v6189_v19  ;;  %v6316_v52 = vld [vmem:[#allocation5 + $0x1d8] sm:$0xff]  ;;  %541 = vmatprep.subr.mxu0 %v6269_v41  ;;  %v6327_v47 = vand.u32 4294901760, %v6295_v29 }
  0x7c   : > { %10947 = vst [vmem:[#allocation39_spill] sm:$0xff] %v6303_v43  ;;  %738 = vmatprep.subr.mxu1 %v737_v61  ;;  %v749_v38 = vand.u32 4294901760, %v748_v30  ;;  %10949 = vst [vmem:[#allocation41_spill] sm:$0xff] %v6314_v62  ;;  %v10950_v61 = vand.u32 4294901760, %v6280_v21  ;;  %v6324_v32 = vsub.f32 %v6168_v49, %v6200_v33  ;;  %543 = vmatpush1.msra.mxu0 %v6289_v24  ;;  %v10953_v19 = vand.u32 4294901760, %v6293_v13  ;;  %v6341_v49 = vld [vmem:[#allocation5 + $0x1d0] sm:$0xff] }
  0x7d   : > { %10948 = vst [vmem:[#allocation40_spill] sm:$0xff] %v6311_v12  ;;  %744 = vmatpush1.msra.mxu1 %v743_v20  ;;  %v755_v7 = vand.u32 4294901760, %v754_v2  ;;  %10952 = vst [vmem:[#allocation43_spill] sm:$0xff] %v6327_v47  ;;  %v6336_v50 = vsub.f32 %v6181_v39, %v6213_v46  ;;  %545 = vmatprep.subr.mxu0 %v6303_v43  ;;  %v6350_v2 = vand.u32 4294901760, %v6316_v52  ;;  %v6352_v39 = vld [vmem:[#allocation5 + $0x1c8] sm:$0xff] }
  0x7e   : > { %v760_v30 = vsub.f32 %v6280_v21, %v10950_v61  ;;  %10951 = vst [vmem:[#allocation42_spill] sm:$0xff] %v6324_v32  ;;  %750 = vmatprep.subr.mxu1 %v749_v38  ;;  %v766_v20 = vsub.f32 %v6293_v13, %v10953_v19  ;;  %v6339_v61 = vand.u32 4294901760, %v6305_v1  ;;  %v10232_v38 = vand.u32 4294901760, %v6324_v32  ;;  %547 = vmatpush2.msra.mxu0 %v6314_v62 }
  0x7f   : > { %10954 = vst [vmem:[#allocation44_spill] sm:$0xff] %v6336_v50  ;;  %756 = vmatpush1.msra.mxu1 %v755_v7  ;;  %v6347_v19 = vsub.f32 %v6191_v34, %v6225_v14  ;;  %10957 = vst [vmem:[#allocation47_spill] sm:$0xff] %v6350_v2  ;;  %v10958_v13 = vand.u32 4294901760, %v6311_v12  ;;  %549 = vmatprep.subr.mxu0 %v6327_v47  ;;  %v6369_v14 = vand.u32 4294901760, %v6341_v49  ;;  %v6375_v7 = vld [vmem:[#allocation5 + $0x1c0] sm:$0xff] }
  0x80   : > { %10955 = vst [vmem:[#allocation45_spill] sm:$0xff] %v6339_v61  ;;  %v761_v33 = vand.u32 4294901760, %v760_v30  ;;  %v767_v46 = vand.u32 4294901760, %v766_v20  ;;  %v6361_v30 = vsub.f32 %v6202_v53, %v6236_v26  ;;  %v778_v34 = vsub.f32 %v6324_v32, %v10232_v38  ;;  %551 = vmatpush2.msra.mxu0 %v6339_v61  ;;  %v6385_v32 = vld [vmem:[#allocation5 + $0x1b8] sm:$0xff] }
  0x81   : > { %10956 = vst [vmem:[#allocation46_spill] sm:$0xff] %v6347_v19  ;;  %v772_v21 = vsub.f32 %v6311_v12, %v10958_v13  ;;  %10960 = vst [vmem:[#allocation49_spill] sm:$0xff] %v6369_v14  ;;  %v6373_v13 = vsub.f32 %v6227_v51, %v6255_v28  ;;  %v6383_v20 = vand.u32 4294901760, %v6352_v39  ;;  %v10964_v51 = vand.u32 4294901760, %v6347_v19  ;;  %553 = vmatprep.subr.mxu0 %v6350_v2 }
  0x82   : > { %10959 = vst [vmem:[#allocation48_spill] sm:$0xff] %v6361_v30  ;;  %762 = vmatprep.subr.mxu1 %v761_v33  ;;  %v10962_v33 = vand.u32 4294901760, %v6336_v50  ;;  %v779_v12 = vand.u32 4294901760, %v778_v34  ;;  %555 = vmatpush2.msra.mxu0 %v6369_v14 }
  0x83   : > { %10961 = vst [vmem:[#allocation50_spill] sm:$0xff] %v6373_v13  ;;  %768 = vmatpush1.msra.mxu1 %v767_v46  ;;  %v773_v53 = vand.u32 4294901760, %v772_v21  ;;  %10963 = vst [vmem:[#allocation51_spill] sm:$0xff] %v6383_v20  ;;  %v790_v28 = vsub.f32 %v6347_v19, %v10964_v51  ;;  %v6394_v46 = vsub.f32 %v6238_v56, %v6269_v41  ;;  %v6403_v51 = vand.u32 4294901760, %v6375_v7  ;;  %v6409_v19 = vld [vmem:[#allocation5 + $0x1a8] sm:$0xff] }
  0x84   : > { %v784_v26 = vsub.f32 %v6336_v50, %v10962_v33  ;;  %v6396_v33 = vld [vmem:[#allocation5 + $0x1b0] sm:$0xff]  ;;  %v10966_v50 = vand.u32 4294901760, %v6361_v30  ;;  %v6407_v21 = vsub.f32 %v6261_v44, %v6289_v24  ;;  %557 = vmatprep.subr.mxu0 %v6383_v20  ;;  %v6417_v41 = vand.u32 4294901760, %v6385_v32  ;;  %v6430_v24 = vld [vmem:[#allocation5 + $0x198] sm:$0xff] }
  0x85   : > { %10965 = vst [vmem:[#allocation52_spill] sm:$0xff] %v6394_v46  ;;  %774 = vmatprep.subr.mxu1 %v773_v53  ;;  %10967 = vst [vmem:[#allocation53_spill] sm:$0xff] %v6403_v51  ;;  %v791_v56 = vand.u32 4294901760, %v790_v28  ;;  %v10969_v53 = vand.u32 4294901760, %v6373_v13  ;;  %559 = vmatpush2.msra.mxu0 %v6403_v51  ;;  %v6425_v28 = vsub.f32 %v6271_v36, %v6303_v43  ;;  %v6441_v36 = vand.u32 4294901760, %v6409_v19 }
  0x86   : > { %v785_v38 = vand.u32 4294901760, %v784_v26  ;;  %v796_v34 = vsub.f32 %v6361_v30, %v10966_v50  ;;  %10968 = vst [vmem:[#allocation54_spill] sm:$0xff] %v6407_v21  ;;  %780 = vmatpush1.msra.mxu1 %v779_v12  ;;  %10970 = vst [vmem:[#allocation55_spill] sm:$0xff] %v6417_v41  ;;  %v6419_v30 = vld [vmem:[#allocation5 + $0x1a0] sm:$0xff]  ;;  %v10255_v12 = vand.u32 4294901760, %v6407_v21  ;;  %561 = vmatprep.subr.mxu0 %v6417_v41 }
  0x87   : > { %v802_v26 = vsub.f32 %v6373_v13, %v10969_v53  ;;  %10971 = vst [vmem:[#allocation56_spill] sm:$0xff] %v6425_v28  ;;  %v6428_v53 = vand.u32 4294901760, %v6396_v33  ;;  %v10973_v13 = vand.u32 4294901760, %v6394_v46  ;;  %10975 = vst [vmem:[#allocation59_spill] sm:$0xff] %v6441_v36 }
  0x88   : > { %786 = vmatprep.subr.mxu1 %v785_v38  ;;  %v797_v44 = vand.u32 4294901760, %v796_v34  ;;  %v6438_v34 = vsub.f32 %v6282_v37, %v6314_v62  ;;  %v814_v43 = vsub.f32 %v6407_v21, %v10255_v12  ;;  %v6455_v37 = vld [vmem:[#allocation5 + $0x190] sm:$0xff]  ;;  %v6461_v12 = vsub.f32 %v6305_v1, %v6339_v61 }
  0x89   : > { %10972 = vst [vmem:[#allocation57_spill] sm:$0xff] %v6428_v53  ;;  %792 = vmatpush1.msra.mxu1 %v791_v56  ;;  %v803_v50 = vand.u32 4294901760, %v802_v26  ;;  %v808_v38 = vsub.f32 %v6394_v46, %v10973_v13  ;;  %563 = vmatpush2.msra.mxu0 %v6428_v53  ;;  %v6450_v13 = vsub.f32 %v6295_v29, %v6327_v47  ;;  %v6453_v26 = vand.u32 4294901760, %v6419_v30  ;;  %v6466_v29 = vld [vmem:[#allocation5 + $0x188] sm:$0xff] }
  0x8a   : > { %10974 = vst [vmem:[#allocation58_spill] sm:$0xff] %v6438_v34  ;;  %798 = vmatprep.subr.mxu1 %v797_v44  ;;  %v10266_v44 = vand.u32 4294901760, %v6438_v34  ;;  %565 = vmatprep.subr.mxu0 %v6441_v36  ;;  %10978 = vst [vmem:[#allocation62_spill] sm:$0xff] %v6461_v12  ;;  %v6464_v56 = vand.u32 4294901760, %v6430_v24  ;;  %v815_v47 = vand.u32 4294901760, %v814_v43  ;;  %v10980_v21 = vand.u32 4294901760, %v6425_v28 }
  0x8b   : > { %10976 = vst [vmem:[#allocation60_spill] sm:$0xff] %v6450_v13  ;;  %10977 = vst [vmem:[#allocation61_spill] sm:$0xff] %v6453_v26  ;;  %804 = vmatpush1.msra.mxu1 %v803_v50  ;;  %v809_v62 = vand.u32 4294901760, %v808_v38  ;;  %567 = vmatpush2.msra.mxu0 %v6453_v26  ;;  %v6475_v38 = vsub.f32 %v6316_v52, %v6350_v2  ;;  %v6483_v43 = vand.u32 4294901760, %v6455_v37  ;;  %v6489_v50 = vld [vmem:[#allocation5 + $0x180] sm:$0xff]  ;;  %v6496_v61 = vand.u32 4294901760, %v6466_v29 }
  0x8c   : > { %10979 = vst [vmem:[#allocation63_spill] sm:$0xff] %v6464_v56  ;;  %v820_v46 = vsub.f32 %v6425_v28, %v10980_v21  ;;  %v826_v1 = vsub.f32 %v6438_v34, %v10266_v44  ;;  %569 = vmatprep.subr.mxu0 %v6464_v56  ;;  %v6487_v21 = vsub.f32 %v6341_v49, %v6369_v14  ;;  %v6498_v34 = vld [vmem:[#allocation5 + $0x178] sm:$0xff]  ;;  %v10986_v27 = vand.u32 4294901760, %v6461_v12 }
  0x8d   : > { %10981 = vst [vmem:[#allocation64_spill] sm:$0xff] %v6475_v38  ;;  %810 = vmatprep.subr.mxu1 %v809_v62  ;;  %10982 = vst [vmem:[#allocation65_spill] sm:$0xff] %v6483_v43  ;;  %v10984_v62 = vand.u32 4294901760, %v6450_v13  ;;  %571 = vmatpush2.msra.mxu0 %v6483_v43  ;;  %v10988_v14 = vand.u32 4294901760, %v6475_v38 }
  0x8e   : > { %10983 = vst [vmem:[#allocation66_spill] sm:$0xff] %v6487_v21  ;;  %816 = vmatpush1.msra.mxu1 %v815_v47  ;;  %v821_v52 = vand.u32 4294901760, %v820_v46  ;;  %10985 = vst [vmem:[#allocation67_spill] sm:$0xff] %v6496_v61  ;;  %v827_v28 = vand.u32 4294901760, %v826_v1  ;;  %v838_v49 = vsub.f32 %v6461_v12, %v10986_v27  ;;  %v6507_v46 = vsub.f32 %v6352_v39, %v6383_v20  ;;  %v6522_v12 = vld [vmem:[#allocation5 + $0x168] sm:$0xff] }
  0x8f   : > { %v832_v2 = vsub.f32 %v6450_v13, %v10984_v62  ;;  %v6509_v62 = vld [vmem:[#allocation5 + $0x170] sm:$0xff]  ;;  %v844_v1 = vsub.f32 %v6475_v38, %v10988_v14  ;;  %573 = vmatprep.subr.mxu0 %v6496_v61  ;;  %v6516_v27 = vand.u32 4294901760, %v6489_v50  ;;  %v6520_v47 = vsub.f32 %v6375_v7, %v6403_v51  ;;  %v6531_v38 = vld [vmem:[#allocation5 + $0x160] sm:$0xff] }
  0x90   : > { %10987 = vst [vmem:[#allocation68_spill] sm:$0xff] %v6507_v46  ;;  %822 = vmatprep.subr.mxu1 %v821_v52  ;;  %v839_v39 = vand.u32 4294901760, %v838_v49  ;;  %v10991_v52 = vand.u32 4294901760, %v6487_v21  ;;  %v6529_v14 = vand.u32 4294901760, %v6498_v34  ;;  %v6540_v49 = vand.u32 4294901760, %v6509_v62 }
  0x91   : > { %v833_v44 = vand.u32 4294901760, %v832_v2  ;;  %10989 = vst [vmem:[#allocation69_spill] sm:$0xff] %v6516_v27  ;;  %10990 = vst [vmem:[#allocation70_spill] sm:$0xff] %v6520_v47  ;;  %828 = vmatpush2.msra.mxu1 %v827_v28  ;;  %v845_v13 = vand.u32 4294901760, %v844_v1  ;;  %575 = vmatpush2.msra.mxu0 %v6516_v27  ;;  %v10289_v7 = vand.u32 4294901760, %v6520_v47  ;;  %v6537_v28 = vsub.f32 %v6385_v32, %v6417_v41 }
  0x92   : > { %v850_v2 = vsub.f32 %v6487_v21, %v10991_v52  ;;  %10992 = vst [vmem:[#allocation71_spill] sm:$0xff] %v6529_v14  ;;  %10994 = vst [vmem:[#allocation73_spill] sm:$0xff] %v6540_v49  ;;  %v6542_v52 = vld [vmem:[#allocation5 + $0x158] sm:$0xff]  ;;  %v10995_v51 = vand.u32 4294901760, %v6507_v46  ;;  %577 = vmatprep.subr.mxu0 %v6529_v14  ;;  %v6550_v1 = vsub.f32 %v6396_v33, %v6428_v53  ;;  %v6553_v32 = vand.u32 4294901760, %v6522_v12  ;;  %v6567_v33 = vld [vmem:[#allocation5 + $0x150] sm:$0xff] }
  0x93   : > { %834 = vmatprep.subr.mxu1 %v833_v44  ;;  %10993 = vst [vmem:[#allocation72_spill] sm:$0xff] %v6537_v28  ;;  %v862_v41 = vsub.f32 %v6520_v47, %v10289_v7  ;;  %579 = vmatpush2.msra.mxu0 %v6540_v49  ;;  %v6573_v7 = vsub.f32 %v6419_v30, %v6453_v26  ;;  %v11002_v47 = vand.u32 4294901760, %v6537_v28 }
  0x94   : > { %840 = vmatpush2.msra.mxu1 %v839_v39  ;;  %v851_v20 = vand.u32 4294901760, %v850_v2  ;;  %v856_v44 = vsub.f32 %v6507_v46, %v10995_v51  ;;  %10996 = vst [vmem:[#allocation74_spill] sm:$0xff] %v6550_v1  ;;  %10997 = vst [vmem:[#allocation75_spill] sm:$0xff] %v6553_v32  ;;  %v6562_v51 = vsub.f32 %v6409_v19, %v6441_v36  ;;  %v6565_v2 = vand.u32 4294901760, %v6531_v38  ;;  %v6578_v19 = vld [vmem:[#allocation5 + $0x148] sm:$0xff] }
  0x95   : > { %846 = vmatprep.subr.mxu1 %v845_v13  ;;  %v10300_v13 = vand.u32 4294901760, %v6550_v1  ;;  %581 = vmatprep.subr.mxu0 %v6553_v32  ;;  %11000 = vst [vmem:[#allocation78_spill] sm:$0xff] %v6573_v7  ;;  %v6576_v39 = vand.u32 4294901760, %v6542_v52  ;;  %v863_v36 = vand.u32 4294901760, %v862_v41  ;;  %v868_v46 = vsub.f32 %v6537_v28, %v11002_v47 }
  0x96   : > { %10998 = vst [vmem:[#allocation76_spill] sm:$0xff] %v6562_v51  ;;  %10999 = vst [vmem:[#allocation77_spill] sm:$0xff] %v6565_v2  ;;  %852 = vmatpush2.msra.mxu1 %v851_v20  ;;  %v857_v53 = vand.u32 4294901760, %v856_v44  ;;  %583 = vmatpush2.msra.mxu0 %v6565_v2  ;;  %v6587_v44 = vsub.f32 %v6430_v24, %v6464_v56  ;;  %v6595_v41 = vand.u32 4294901760, %v6567_v33  ;;  %v6601_v20 = vld [vmem:[#allocation5 + $0x140] sm:$0xff]  ;;  %v6608_v26 = vand.u32 4294901760, %v6578_v19 }
  0x97   : > { %11001 = vst [vmem:[#allocation79_spill] sm:$0xff] %v6576_v39  ;;  %v874_v30 = vsub.f32 %v6550_v1, %v10300_v13  ;;  %585 = vmatprep.subr.mxu0 %v6576_v39  ;;  %v6599_v47 = vsub.f32 %v6455_v37, %v6483_v43  ;;  %v869_v24 = vand.u32 4294901760, %v868_v46  ;;  %v6610_v1 = vld [vmem:[#allocation5 + $0x138] sm:$0xff]  ;;  %v11008_v21 = vand.u32 4294901760, %v6573_v7 }
  0x98   : > { %11003 = vst [vmem:[#allocation80_spill] sm:$0xff] %v6587_v44  ;;  %858 = vmatprep.subr.mxu1 %v857_v53  ;;  %11004 = vst [vmem:[#allocation81_spill] sm:$0xff] %v6595_v41  ;;  %v11006_v53 = vand.u32 4294901760, %v6562_v51  ;;  %587 = vmatpush2.msra.mxu0 %v6595_v41  ;;  %v6619_v46 = vsub.f32 %v6466_v29, %v6496_v61  ;;  %v11010_v43 = vand.u32 4294901760, %v6587_v44 }
  0x99   : > { %11005 = vst [vmem:[#allocation82_spill] sm:$0xff] %v6599_v47  ;;  %864 = vmatpush2.msra.mxu1 %v863_v36  ;;  %11007 = vst [vmem:[#allocation83_spill] sm:$0xff] %v6608_v26  ;;  %v875_v28 = vand.u32 4294901760, %v874_v30  ;;  %v886_v37 = vsub.f32 %v6573_v7, %v11008_v21  ;;  %589 = vmatprep.subr.mxu0 %v6608_v26  ;;  %v6628_v21 = vand.u32 4294901760, %v6601_v20  ;;  %v6634_v7 = vld [vmem:[#allocation5 + $0x128] sm:$0xff] }
  0x9a   : > { %v880_v56 = vsub.f32 %v6562_v51, %v11006_v53  ;;  %11009 = vst [vmem:[#allocation84_spill] sm:$0xff] %v6619_v46  ;;  %v6621_v53 = vld [vmem:[#allocation5 + $0x130] sm:$0xff]  ;;  %870 = vmatprep.subr.mxu1 %v869_v24  ;;  %v892_v30 = vsub.f32 %v6587_v44, %v11010_v43  ;;  %v6632_v36 = vsub.f32 %v6489_v50, %v6516_v27  ;;  %v11013_v24 = vand.u32 4294901760, %v6599_v47  ;;  %v6643_v44 = vld [vmem:[#allocation5 + $0x120] sm:$0xff] }
  0x9b   : > { %11011 = vst [vmem:[#allocation85_spill] sm:$0xff] %v6628_v21  ;;  %876 = vmatpush2.msra.mxu1 %v875_v28  ;;  %v887_v29 = vand.u32 4294901760, %v886_v37  ;;  %v6641_v43 = vand.u32 4294901760, %v6610_v1  ;;  %591 = vmatpush2.msra.mxu0 %v6628_v21  ;;  %v6649_v28 = vsub.f32 %v6498_v34, %v6529_v14  ;;  %v6652_v37 = vand.u32 4294901760, %v6621_v53 }
  0x9c   : > { %v881_v13 = vand.u32 4294901760, %v880_v56  ;;  %11012 = vst [vmem:[#allocation86_spill] sm:$0xff] %v6632_v36  ;;  %v898_v56 = vsub.f32 %v6599_v47, %v11013_v24  ;;  %v893_v51 = vand.u32 4294901760, %v892_v30  ;;  %v10323_v50 = vand.u32 4294901760, %v6632_v36  ;;  %v6654_v24 = vld [vmem:[#allocation5 + $0x118] sm:$0xff] }
  0x9d   : > { %11014 = vst [vmem:[#allocation87_spill] sm:$0xff] %v6649_v28  ;;  %v11015_v27 = vand.u32 4294901760, %v6619_v46  ;;  %593 = vmatprep.subr.mxu0 %v6641_v43  ;;  %v6662_v30 = vsub.f32 %v6509_v62, %v6540_v49  ;;  %v6665_v34 = vand.u32 4294901760, %v6634_v7  ;;  %v6679_v62 = vld [vmem:[#allocation5 + $0x110] sm:$0xff] }
  0x9e   : > { %882 = vmatprep.subr.mxu1 %v881_v13  ;;  %v899_v61 = vand.u32 4294901760, %v898_v56  ;;  %v910_v14 = vsub.f32 %v6632_v36, %v10323_v50  ;;  %595 = vmatpush2.msra.mxu0 %v6652_v37  ;;  %v6677_v56 = vand.u32 4294901760, %v6643_v44  ;;  %v6685_v50 = vsub.f32 %v6531_v38, %v6565_v2  ;;  %v6713_v2 = vld [vmem:[#allocation5 + $0x100] sm:$0xff] }
  0x9f   : > { %888 = vmatpush2.msra.mxu1 %v887_v29  ;;  %v904_v13 = vsub.f32 %v6619_v46, %v11015_v27  ;;  %11016 = vst [vmem:[#allocation88_spill] sm:$0xff] %v6662_v30  ;;  %11017 = vst [vmem:[#allocation89_spill] sm:$0xff] %v6665_v34  ;;  %v6674_v27 = vsub.f32 %v6522_v12, %v6553_v32  ;;  %597 = vmatprep.subr.mxu0 %v6665_v34  ;;  %v6688_v29 = vand.u32 4294901760, %v6654_v24  ;;  %v6690_v12 = vld [vmem:[#allocation5 + $0x108] sm:$0xff] }
  0xa0   : > { %894 = vmatprep.subr.mxu1 %v893_v51  ;;  %11019 = vst [vmem:[#allocation91_spill] sm:$0xff] %v6677_v56  ;;  %v10332_v51 = vand.u32 4294901760, %v6662_v30  ;;  %11020 = vst [vmem:[#allocation92_spill] sm:$0xff] %v6685_v50  ;;  %v911_v32 = vand.u32 4294901760, %v910_v14  ;;  %v11022_v36 = vand.u32 4294901760, %v6649_v28  ;;  %599 = vmatpush2.msra.mxu0 %v6677_v56  ;;  %v11026_v47 = vand.u32 4294901760, %v6685_v50 }
  0xa1   : > { %11018 = vst [vmem:[#allocation90_spill] sm:$0xff] %v6674_v27  ;;  %900 = vmatpush2.msra.mxu1 %v899_v61  ;;  %v905_v49 = vand.u32 4294901760, %v904_v13  ;;  %11021 = vst [vmem:[#allocation93_spill] sm:$0xff] %v6688_v29  ;;  %v6699_v13 = vsub.f32 %v6542_v52, %v6576_v39  ;;  %601 = vmatprep.subr.mxu0 %v6688_v29  ;;  %v6711_v61 = vsub.f32 %v6567_v33, %v6595_v41 }
  0xa2   : > { %v916_v46 = vsub.f32 %v6649_v28, %v11022_v36  ;;  %v922_v38 = vsub.f32 %v6662_v30, %v10332_v51  ;;  %v6707_v36 = vand.u32 4294901760, %v6679_v62  ;;  %v11025_v52 = vand.u32 4294901760, %v6674_v27  ;;  %v271_v30 = vld [vmem:[%s5948_s27 + $0x8] sm:$0xff] }
  0xa3   : > { %11023 = vst [vmem:[#allocation94_spill] sm:$0xff] %v6699_v13  ;;  %906 = vmatprep.subr.mxu1 %v905_v49  ;;  %11024 = vst [vmem:[#allocation95_spill] sm:$0xff] %v6711_v61  ;;  %v6720_v39 = vand.u32 4294901760, %v6690_v12  ;;  %v934_v33 = vsub.f32 %v6685_v50, %v11026_v47  ;;  %v11028_v41 = vand.u32 4294901760, %v6699_v13  ;;  %v6742_v47 = vsub.f32 %v6601_v20, %v6628_v21 }
  0xa4   : > { %912 = vmatpush2.msra.mxu1 %v911_v32  ;;  %v917_v49 = vand.u32 4294901760, %v916_v46  ;;  %v928_v51 = vsub.f32 %v6674_v27, %v11025_v52  ;;  %v923_v28 = vand.u32 4294901760, %v922_v38  ;;  %603 = vmatpush2.msra.mxu0 %v6707_v36  ;;  %v6730_v46 = vsub.f32 %v6578_v19, %v6608_v26  ;;  %v270_v52 = vld [vmem:[%s5948_s27] sm:$0xff] }
  0xa5   : > { %v940_v27 = vsub.f32 %v6699_v13, %v11028_v41  ;;  %605 = vmatprep.subr.mxu0 %v6720_v39  ;;  %v6738_v38 = vand.u32 4294901760, %v6713_v2  ;;  %11029 = vst [vmem:[#allocation97_spill] sm:$0xff] %v6742_v47  ;;  %v935_v32 = vand.u32 4294901760, %v934_v33  ;;  %v11030_v19 = vand.u32 4294901760, %v6711_v61 }
  0xa6   : > { %11027 = vst [vmem:[#allocation96_spill] sm:$0xff] %v6730_v46  ;;  %918 = vmatprep.subr.mxu1 %v917_v49  ;;  %v929_v14 = vand.u32 4294901760, %v928_v51  ;;  %v10352_v51 = vand.u32 4294901760, %v6730_v46  ;;  %v6748_v26 = vand.u32 4294901760, %v271_v30  ;;  %v10351_v13 = vand.u32 4294901760, %v6742_v47 }
  0xa7   : > { %924 = vmatpush2.msra.mxu1 %v923_v28  ;;  %v946_v49 = vsub.f32 %v6711_v61, %v11030_v19  ;;  %v941_v41 = vand.u32 4294901760, %v940_v27  ;;  %607 = vmatpush2.msra.mxu0 %v6738_v38  ;;  %v6754_v20 = vsub.f32 %v6610_v1, %v6641_v43  ;;  %v6756_v28 = vand.u32 4294901760, %v270_v52 }
  0xa8   : > { %11031 = vst [vmem:[#allocation98_spill] sm:$0xff] %v6748_v26  ;;  %930 = vmatprep.subr.mxu1 %v929_v14  ;;  %v952_v19 = vsub.f32 %v6730_v46, %v10352_v51  ;;  %v6762_v21 = vsub.f32 %v271_v30, %v6748_v26  ;;  %1020 = vmatprep.subr.mxu0 %v5978_v18 }
  0xa9   : > { %11032 = vst [vmem:[#allocation99_spill] sm:$0xff] %v6754_v20  ;;  %11033 = vst [vmem:[#allocation100_spill] sm:$0xff] %v6756_v28  ;;  %936 = vmatpush2.msra.mxu1 %v935_v32  ;;  %v947_v33 = vand.u32 4294901760, %v946_v49  ;;  %v6767_v27 = vsub.f32 %v6621_v53, %v6652_v37  ;;  %v958_v1 = vsub.f32 %v6742_v47, %v10351_v13  ;;  %v10355_v14 = vand.u32 4294901760, %v6754_v20 }
  0xaa   : > { %942 = vmatprep.subr.mxu1 %v941_v41  ;;  %v6774_v32 = vsub.f32 %v270_v52, %v6756_v28  ;;  %v6778_v30 = vsub.f32 %v6634_v7, %v6665_v34  ;;  %1010 = vmatprep.mubr.f32.mxu1 %v6748_v26  ;;  %v953_v49 = vand.u32 4294901760, %v952_v19  ;;  %v10356_v53 = vand.u32 4294901760, %v6762_v21 }
  0xab   : > { %11034 = vst [vmem:[#allocation101_spill] sm:$0xff] %v6767_v27  ;;  %948 = vmatpush2.msra.mxu1 %v947_v33  ;;  %v10359_v41 = vand.u32 4294901760, %v6767_v27  ;;  %v6785_v13 = vsub.f32 %v6643_v44, %v6677_v56  ;;  %v959_v51 = vand.u32 4294901760, %v958_v1  ;;  %v964_v52 = vsub.f32 %v6754_v20, %v10355_v14 }
  0xac   : > { %11035 = vst [vmem:[#allocation102_spill] sm:$0xff] %v6778_v30  ;;  %v10364_v7 = vand.u32 4294901760, %v6774_v32  ;;  %v10365_v34 = vand.u32 4294901760, %v6778_v30  ;;  %954 = vmatprep.subr.mxu1 %v953_v49  ;;  %v611_v33 = vsub.f32 %v6762_v21, %v10356_v53  ;;  %v6801_v1 = vsub.f32 %v6654_v24, %v6688_v29 }
  0xad   : > { %v970_v19 = vsub.f32 %v6767_v27, %v10359_v41  ;;  %960 = vmatpush2.msra.mxu1 %v959_v51  ;;  %v965_v14 = vand.u32 4294901760, %v964_v52  ;;  %v6811_v26 = vsub.f32 %v6679_v62, %v6707_v36  ;;  %v11038_v56 = vand.u32 4294901760, %v6785_v13 }
  0xae   : > { %11036 = vst [vmem:[#allocation103_spill] sm:$0xff] %v6801_v1  ;;  %v617_v49 = vsub.f32 %v6774_v32, %v10364_v7  ;;  %v976_v53 = vsub.f32 %v6778_v30, %v10365_v34  ;;  %v612_v41 = vand.u32 4294901760, %v611_v33  ;;  %v10369_v51 = vand.u32 4294901760, %v6801_v1 }
  0xaf   : > { %11037 = vst [vmem:[#allocation104_spill] sm:$0xff] %v6811_v26  ;;  %v971_v44 = vand.u32 4294901760, %v970_v19  ;;  %v982_v24 = vsub.f32 %v6785_v13, %v11038_v56  ;;  %966 = vmatprep.subr.mxu1 %v965_v14  ;;  %v10368_v7 = vand.u32 4294901760, %v6811_v26  ;;  %v6820_v34 = vsub.f32 %v6690_v12, %v6720_v39 }
  0xb0   : > { %v618_v52 = vand.u32 4294901760, %v617_v49  ;;  %v977_v29 = vand.u32 4294901760, %v976_v53  ;;  %613 = vmatprep.mubr.f32.mxu0 %v612_v41  ;;  %v988_v33 = vsub.f32 %v6801_v1, %v10369_v51  ;;  %v6827_v56 = vsub.f32 %v6713_v2, %v6738_v38  ;;  %v11055_v51 = vld [vmem:[#allocation19_spill] sm:$0xff] }
  0xb1   : > { %11039 = vst [vmem:[#allocation105_spill] sm:$0xff] %v6820_v34  ;;  %972 = vmatpush2.msra.mxu1 %v971_v44  ;;  %v983_v62 = vand.u32 4294901760, %v982_v24  ;;  %v994_v14 = vsub.f32 %v6811_v26, %v10368_v7  ;;  %v10367_v12 = vand.u32 4294901760, %v6820_v34  ;;  %v11041_v24 = vld [vmem:[#allocation12_spill] sm:$0xff]  ;;  %v11054_v7 = vld [vmem:[#allocation42_spill] sm:$0xff] }
  0xb2   : > { %11040 = vst [vmem:[#allocation106_spill] sm:$0xff] %v6827_v56  ;;  %619 = vmatmul.mubr.f32.vlgmr.msra.gmra.mxu0 %v618_v52  ;;  %978 = vmatprep.subr.mxu1 %v977_v29  ;;  %v989_v53 = vand.u32 4294901760, %v988_v33  ;;  %v10366_v41 = vand.u32 4294901760, %v6827_v56  ;;  %v11042_v52 = vld [vmem:[#allocation30_spill] sm:$0xff]  ;;  %v11044_v33 = vld [vmem:[#allocation32_spill] sm:$0xff] }
  0xb3   : > { %1023 = vmatpush1.msra.mxu0 %v5991_v23  ;;  %984 = vmatpush2.msra.mxu1 %v983_v62  ;;  %v995_v19 = vand.u32 4294901760, %v994_v14  ;;  %v1000_v2 = vsub.f32 %v6820_v34, %v10367_v12  ;;  %v11043_v62 = vld [vmem:[#allocation13_spill] sm:$0xff]  ;;  %v11045_v14 = vld [vmem:[#allocation14_spill] sm:$0xff] }
  0xb4   : > { %1026 = vmatprep.subr.mxu0 %v5997_v25  ;;  %1212 = vmatprep.mubr.f32.mxu0 %v6762_v21  ;;  %v1006_v29 = vsub.f32 %v6827_v56, %v10366_v41  ;;  %v11052_v41 = vld [vmem:[#allocation40_spill] sm:$0xff]  ;;  %v11053_v12 = vld [vmem:[#allocation18_spill] sm:$0xff] }
  0xb5   : > { %1029 = vmatpush1.msra.mxu0 %v6011_v31  ;;  %990 = vmatprep.subr.mxu1 %v989_v53  ;;  %v1001_v44 = vand.u32 4294901760, %v1000_v2  ;;  %v11046_v53 = vld [vmem:[#allocation34_spill] sm:$0xff]  ;;  %v11048_v2 = vld [vmem:[#allocation36_spill] sm:$0xff] }
  0xb6   : > { %1032 = vmatprep.subr.mxu0 %v6020_v35  ;;  %996 = vmatpush2.msra.mxu1 %v995_v19  ;;  %v1007_v49 = vand.u32 4294901760, %v1006_v29  ;;  %v11047_v19 = vld [vmem:[#allocation15_spill] sm:$0xff]  ;;  %v11049_v29 = vld [vmem:[#allocation16_spill] sm:$0xff] }
  0xb7   : > { %1035 = vmatpush1.msra.mxu0 %v6033_v40  ;;  %1002 = vmatprep.subr.mxu1 %v1001_v44  ;;  %v11050_v44 = vld [vmem:[#allocation38_spill] sm:$0xff] }
  0xb8   : > { %1038 = vmatprep.subr.mxu0 %v6047_v45  ;;  %1008 = vmatpush2.msra.mxu1 %v1007_v49  ;;  %v11051_v49 = vld [vmem:[#allocation17_spill] sm:$0xff] }
  0xb9   : > { %1041 = vmatpush1.msra.mxu0 %v6073_v59  ;;  %1012 = vmatmul.mubr.f32.vlgmr.msra.gmra.mxu1 %v6756_v28  ;;  %v11056_v28 = vld [vmem:[#allocation44_spill] sm:$0xff] }
  0xba   : > { %1044 = vmatprep.subr.mxu0 %v6085_v0  ;;  %1222 = vmatprep.subr.mxu1 %v5958_v3 }
  0xbb   : > { %1047 = vmatpush1.msra.mxu0 %v6096_v8  ;;  %1224 = vmatpush1.msra.mxu1 %v5960_v4 }
  0xbc   : > { %1050 = vmatprep.subr.mxu0 %v6107_v42  ;;  %1226 = vmatprep.subr.mxu1 %v5962_v5 }
  0xbd   : > { %1053 = vmatpush1.msra.mxu0 %v6119_v48  ;;  %1228 = vmatpush1.msra.mxu1 %v5964_v9 }
  0xbe   : > { %1056 = vmatprep.subr.mxu0 %v6133_v57  ;;  %1230 = vmatprep.subr.mxu1 %v5966_v10 }
  0xbf   : > { %1059 = vmatpush1.msra.mxu0 %v6145_v6  ;;  %1232 = vmatpush1.msra.mxu1 %v5968_v11 }
  0xc0   : > { %1062 = vmatprep.subr.mxu0 %v6166_v54  ;;  %1234 = vmatprep.subr.mxu1 %v5971_v15 }
  0xc1   : > { %1065 = vmatpush1.msra.mxu0 %v6179_v63  ;;  %1236 = vmatpush1.msra.mxu1 %v5973_v16 }
  0xc2   : > { %1068 = vmatprep.subr.mxu0 %v6197_v55  ;;  %1238 = vmatprep.subr.mxu1 %v5975_v17 }
  0xc3   : > { %1071 = vmatpush1.msra.mxu0 %v6210_v58  ;;  %1240 = vmatpush1.msra.mxu1 %v5988_v22 }
  0xc4   : > { %1074 = vmatprep.subr.mxu0 %v6222_v60  ;;  %1242 = vmatprep.subr.mxu1 %v11041_v24 }
  0xc5   : > { %1077 = vmatpush1.msra.mxu0 %v11042_v52  ;;  %1244 = vmatpush1.msra.mxu1 %v11043_v62 }
  0xc6   : > { %1080 = vmatprep.subr.mxu0 %v11044_v33  ;;  %1246 = vmatprep.subr.mxu1 %v11045_v14 }
  0xc7   : > { %1083 = vmatpush1.msra.mxu0 %v11046_v53  ;;  %1248 = vmatpush1.msra.mxu1 %v11047_v19  ;;  %v11057_v53 = vld [vmem:[#allocation20_spill] sm:$0xff]  ;;  %v11058_v19 = vld [vmem:[#allocation46_spill] sm:$0xff] }
  0xc8   : > { %1086 = vmatprep.subr.mxu0 %v11048_v2  ;;  %1250 = vmatprep.subr.mxu1 %v11049_v29  ;;  %v11059_v2 = vld [vmem:[#allocation21_spill] sm:$0xff]  ;;  %v11060_v29 = vld [vmem:[#allocation48_spill] sm:$0xff] }
  0xc9   : > { %1089 = vmatpush1.msra.mxu0 %v11050_v44  ;;  %1252 = vmatpush1.msra.mxu1 %v11051_v49  ;;  %v11061_v44 = vld [vmem:[#allocation22_spill] sm:$0xff] }
  0xca   : > { %1092 = vmatprep.subr.mxu0 %v11052_v41  ;;  %1254 = vmatprep.subr.mxu1 %v11053_v12  ;;  %v11062_v49 = vld [vmem:[#allocation50_spill] sm:$0xff]  ;;  %v11063_v41 = vld [vmem:[#allocation23_spill] sm:$0xff]  ;;  %v11064_v12 = vld [vmem:[#allocation52_spill] sm:$0xff] }
  0xcb   : > { %1095 = vmatpush1.msra.mxu0 %v11054_v7  ;;  %1256 = vmatpush1.msra.mxu1 %v11055_v51  ;;  %v11065_v7 = vld [vmem:[#allocation24_spill] sm:$0xff]  ;;  %v11066_v51 = vld [vmem:[#allocation54_spill] sm:$0xff] }
  0xcc   : > { %1098 = vmatprep.subr.mxu0 %v11056_v28  ;;  %1258 = vmatprep.subr.mxu1 %v11057_v53  ;;  %v11067_v28 = vld [vmem:[#allocation25_spill] sm:$0xff]  ;;  %v11068_v53 = vld [vmem:[#allocation56_spill] sm:$0xff] }
  0xcd   : > { %1101 = vmatpush1.msra.mxu0 %v11058_v19  ;;  %1260 = vmatpush1.msra.mxu1 %v11059_v2  ;;  %v11069_v19 = vld [vmem:[#allocation26_spill] sm:$0xff] }
  0xce   : > { %1104 = vmatprep.subr.mxu0 %v11060_v29  ;;  %1262 = vmatprep.subr.mxu1 %v11061_v44  ;;  %v11070_v2 = vld [vmem:[#allocation58_spill] sm:$0xff]  ;;  %v11071_v29 = vld [vmem:[#allocation27_spill] sm:$0xff]  ;;  %v11072_v44 = vld [vmem:[#allocation60_spill] sm:$0xff] }
  0xcf   : > { %1107 = vmatpush1.msra.mxu0 %v11062_v49  ;;  %1264 = vmatpush1.msra.mxu1 %v11063_v41  ;;  %v11073_v49 = vld [vmem:[#allocation28_spill] sm:$0xff]  ;;  %v11074_v41 = vld [vmem:[#allocation62_spill] sm:$0xff] }
  0xd0   : > { %1110 = vmatprep.subr.mxu0 %v11064_v12  ;;  %1266 = vmatprep.subr.mxu1 %v11065_v7  ;;  %v11075_v12 = vld [vmem:[#allocation29_spill] sm:$0xff]  ;;  %v11076_v7 = vld [vmem:[#allocation64_spill] sm:$0xff] }
  0xd1   : > { %1113 = vmatpush1.msra.mxu0 %v11066_v51  ;;  %1268 = vmatpush1.msra.mxu1 %v11067_v28  ;;  %v11077_v51 = vld [vmem:[#allocation31_spill] sm:$0xff]  ;;  %v11078_v28 = vld [vmem:[#allocation66_spill] sm:$0xff] }
  0xd2   : > { %1116 = vmatprep.subr.mxu0 %v11068_v53  ;;  %1270 = vmatprep.subr.mxu1 %v11069_v19  ;;  %v11079_v53 = vld [vmem:[#allocation33_spill] sm:$0xff]  ;;  %v11080_v19 = vld [vmem:[#allocation68_spill] sm:$0xff] }
  0xd3   : > { %1119 = vmatpush2.msra.mxu0 %v11070_v2  ;;  %1272 = vmatpush1.msra.mxu1 %v11071_v29  ;;  %v11081_v2 = vld [vmem:[#allocation35_spill] sm:$0xff]  ;;  %v11082_v29 = vld [vmem:[#allocation70_spill] sm:$0xff] }
  0xd4   : > { %1122 = vmatprep.subr.mxu0 %v11072_v44  ;;  %1274 = vmatprep.subr.mxu1 %v11073_v49  ;;  %v11083_v44 = vld [vmem:[#allocation37_spill] sm:$0xff]  ;;  %v11084_v49 = vld [vmem:[#allocation72_spill] sm:$0xff] }
  0xd5   : > { %1125 = vmatpush2.msra.mxu0 %v11074_v41  ;;  %1276 = vmatpush1.msra.mxu1 %v11075_v12  ;;  %v11085_v41 = vld [vmem:[#allocation39_spill] sm:$0xff]  ;;  %v11086_v12 = vld [vmem:[#allocation74_spill] sm:$0xff] }
  0xd6   : > { %1128 = vmatprep.subr.mxu0 %v11076_v7  ;;  %1278 = vmatprep.subr.mxu1 %v11077_v51  ;;  %v11087_v7 = vld [vmem:[#allocation41_spill] sm:$0xff]  ;;  %v11088_v51 = vld [vmem:[#allocation76_spill] sm:$0xff] }
  0xd7   : > { %1131 = vmatpush2.msra.mxu0 %v11078_v28  ;;  %1280 = vmatpush1.msra.mxu1 %v11079_v53  ;;  %v11089_v28 = vld [vmem:[#allocation43_spill] sm:$0xff]  ;;  %v11090_v53 = vld [vmem:[#allocation78_spill] sm:$0xff] }
  0xd8   : > { %1134 = vmatprep.subr.mxu0 %v11080_v19  ;;  %1282 = vmatprep.subr.mxu1 %v11081_v2  ;;  %v11091_v19 = vld [vmem:[#allocation45_spill] sm:$0xff]  ;;  %v11092_v2 = vld [vmem:[#allocation80_spill] sm:$0xff] }
  0xd9   : > { %1137 = vmatpush2.msra.mxu0 %v11082_v29  ;;  %1284 = vmatpush1.msra.mxu1 %v11083_v44  ;;  %v11093_v29 = vld [vmem:[#allocation47_spill] sm:$0xff]  ;;  %v11094_v44 = vld [vmem:[#allocation82_spill] sm:$0xff] }
  0xda   : > { %1140 = vmatprep.subr.mxu0 %v11084_v49  ;;  %1286 = vmatprep.subr.mxu1 %v11085_v41  ;;  %v11095_v49 = vld [vmem:[#allocation49_spill] sm:$0xff]  ;;  %v11096_v41 = vld [vmem:[#allocation84_spill] sm:$0xff] }
  0xdb   : > { %1143 = vmatpush2.msra.mxu0 %v11086_v12  ;;  %1288 = vmatpush2.msra.mxu1 %v11087_v7  ;;  %v11097_v12 = vld [vmem:[#allocation51_spill] sm:$0xff]  ;;  %v11098_v7 = vld [vmem:[#allocation86_spill] sm:$0xff] }
  0xdc   : > { %1146 = vmatprep.subr.mxu0 %v11088_v51  ;;  %1290 = vmatprep.subr.mxu1 %v11089_v28  ;;  %v11099_v51 = vld [vmem:[#allocation53_spill] sm:$0xff]  ;;  %v11100_v28 = vld [vmem:[#allocation87_spill] sm:$0xff] }
  0xdd   : > { %1149 = vmatpush2.msra.mxu0 %v11090_v53  ;;  %1292 = vmatpush2.msra.mxu1 %v11091_v19  ;;  %v11101_v53 = vld [vmem:[#allocation55_spill] sm:$0xff]  ;;  %v11102_v19 = vld [vmem:[#allocation88_spill] sm:$0xff] }
  0xde   : > { %1152 = vmatprep.subr.mxu0 %v11092_v2  ;;  %1294 = vmatprep.subr.mxu1 %v11093_v29  ;;  %v11103_v2 = vld [vmem:[#allocation57_spill] sm:$0xff]  ;;  %v11104_v29 = vld [vmem:[#allocation90_spill] sm:$0xff] }
  0xdf   : > { %1155 = vmatpush2.msra.mxu0 %v11094_v44  ;;  %1296 = vmatpush2.msra.mxu1 %v11095_v49  ;;  %v11105_v44 = vld [vmem:[#allocation59_spill] sm:$0xff] }
  0xe0   : > { %1158 = vmatprep.subr.mxu0 %v11096_v41  ;;  %1298 = vmatprep.subr.mxu1 %v11097_v12  ;;  %v11106_v41 = vld [vmem:[#allocation61_spill] sm:$0xff]  ;;  %v11107_v12 = vld [vmem:[#allocation94_spill] sm:$0xff] }
  0xe1   : > { %1161 = vmatpush2.msra.mxu0 %v11098_v7  ;;  %1300 = vmatpush2.msra.mxu1 %v11099_v51  ;;  %v11108_v7 = vld [vmem:[#allocation63_spill] sm:$0xff] }
  0xe2   : > { %1164 = vmatprep.subr.mxu0 %v11100_v28  ;;  %1302 = vmatprep.subr.mxu1 %v11101_v53  ;;  %v11109_v28 = vld [vmem:[#allocation65_spill] sm:$0xff] }
  0xe3   : > { %1167 = vmatpush2.msra.mxu0 %v11102_v19  ;;  %1304 = vmatpush2.msra.mxu1 %v11103_v2  ;;  %v11110_v19 = vld [vmem:[#allocation67_spill] sm:$0xff] }
  0xe4   : > { %1170 = vmatprep.subr.mxu0 %v11104_v29  ;;  %1306 = vmatprep.subr.mxu1 %v11105_v44  ;;  %v11111_v29 = vld [vmem:[#allocation69_spill] sm:$0xff] }
  0xe5   : > { %1173 = vmatpush2.msra.mxu0 %v6685_v50  ;;  %1308 = vmatpush2.msra.mxu1 %v11106_v41  ;;  %v11112_v50 = vld [vmem:[#allocation71_spill] sm:$0xff] }
  0xe6   : > { %1176 = vmatprep.subr.mxu0 %v11107_v12  ;;  %1310 = vmatprep.subr.mxu1 %v11108_v7  ;;  %v11113_v12 = vld [vmem:[#allocation73_spill] sm:$0xff] }
  0xe7   : > { %1179 = vmatpush2.msra.mxu0 %v6711_v61  ;;  %1312 = vmatpush2.msra.mxu1 %v11109_v28  ;;  %v11114_v61 = vld [vmem:[#allocation75_spill] sm:$0xff] }
  0xe8   : > { %1182 = vmatprep.subr.mxu0 %v6730_v46  ;;  %1314 = vmatprep.subr.mxu1 %v11110_v19  ;;  %v11115_v46 = vld [vmem:[#allocation77_spill] sm:$0xff] }
  0xe9   : > { %1185 = vmatpush2.msra.mxu0 %v6742_v47  ;;  %1316 = vmatpush2.msra.mxu1 %v11111_v29  ;;  %v11116_v47 = vld [vmem:[#allocation79_spill] sm:$0xff] }
  0xea   : > { %1188 = vmatprep.subr.mxu0 %v6754_v20  ;;  %1318 = vmatprep.subr.mxu1 %v11112_v50  ;;  %v11117_v20 = vld [vmem:[#allocation81_spill] sm:$0xff] }
  0xeb   : > { %1191 = vmatpush2.msra.mxu0 %v6767_v27  ;;  %1320 = vmatpush2.msra.mxu1 %v11113_v12  ;;  %v11118_v27 = vld [vmem:[#allocation83_spill] sm:$0xff] }
  0xec   : > { %1194 = vmatprep.subr.mxu0 %v6778_v30  ;;  %1322 = vmatprep.subr.mxu1 %v11114_v61  ;;  %v11119_v30 = vld [vmem:[#allocation85_spill] sm:$0xff] }
  0xed   : > { %1197 = vmatpush2.msra.mxu0 %v6785_v13  ;;  %1324 = vmatpush2.msra.mxu1 %v11115_v46 }
  0xee   : > { %1200 = vmatprep.subr.mxu0 %v6801_v1  ;;  %1326 = vmatprep.subr.mxu1 %v11116_v47  ;;  %v11120_v1 = vand.u32 4294901760, %v5978_v18  ;;  %v11127_v18 = vand.u32 4294901760, %v6020_v35  ;;  %v11132_v35 = vand.u32 4294901760, %v6774_v32 }
  0xef   : > { %1203 = vmatpush2.msra.mxu0 %v6811_v26  ;;  %1328 = vmatpush2.msra.mxu1 %v11117_v20  ;;  %v11121_v26 = vand.u32 4294901760, %v5991_v23  ;;  %v11122_v20 = vld [vmem:[#allocation89_spill] sm:$0xff]  ;;  %v11128_v23 = vand.u32 4294901760, %v6033_v40  ;;  %v11134_v40 = vand.u32 4294901760, %v6096_v8 }
  0xf0   : > { %1206 = vmatprep.subr.mxu0 %v6820_v34  ;;  %1330 = vmatprep.subr.mxu1 %v11118_v27  ;;  %v11123_v27 = vand.u32 4294901760, %v5997_v25  ;;  %v11126_v34 = vld [vmem:[#allocation93_spill] sm:$0xff]  ;;  %v11129_v25 = vand.u32 4294901760, %v6047_v45  ;;  %v11135_v45 = vand.u32 4294901760, %v6107_v42  ;;  %v11148_v42 = vld [vmem:[#allocation15_spill] sm:$0xff] }
  0xf1   : > { %1209 = vmatpush2.msra.mxu0 %v6827_v56  ;;  %1332 = vmatpush2.msra.mxu1 %v11119_v30  ;;  %v11124_v56 = vld [vmem:[#allocation91_spill] sm:$0xff]  ;;  %v11125_v30 = vand.u32 4294901760, %v6011_v31  ;;  %v11130_v31 = vand.u32 4294901760, %v6762_v21  ;;  %v11158_v21 = vld [vmem:[#allocation42_spill] sm:$0xff] }
  0xf2   : > { %1215 = vmatmul.mubr.f32.vlgmr.msra.gmra.mxu0 %v6774_v32  ;;  %1334 = vmatprep.subr.mxu1 %v6641_v43  ;;  %v11159_v32 = vand.u32 4294901760, %v11158_v21  ;;  %v370_v21 = vld [vmem:[#allocation5 + $0x2f0] sm:$0xff] }
  0xf3   : > { %1365 = vmatprep.subr.mxu0 %v11120_v1  ;;  %1336 = vmatpush2.msra.mxu1 %v6652_v37  ;;  %v11161_v1 = vld [vmem:[#allocation44_spill] sm:$0xff] }
  0xf4   : > { %1369 = vmatpush1.msra.mxu0 %v11121_v26  ;;  %1338 = vmatprep.subr.mxu1 %v11122_v20  ;;  %v11131_v26 = vand.u32 4294901760, %v6073_v59  ;;  %v11136_v59 = vand.u32 4294901760, %v6119_v48  ;;  %v11151_v48 = vld [vmem:[#allocation16_spill] sm:$0xff] }
  0xf5   : > { %1373 = vmatprep.subr.mxu0 %v11123_v27  ;;  %1340 = vmatpush2.msra.mxu1 %v11124_v56  ;;  %v11133_v27 = vand.u32 4294901760, %v6085_v0  ;;  %v11137_v0 = vand.u32 4294901760, %v6133_v57 }
  0xf6   : > { %1377 = vmatpush1.msra.mxu0 %v11125_v30  ;;  %1342 = vmatprep.subr.mxu1 %v11126_v34  ;;  %v11160_v30 = vld [vmem:[#allocation19_spill] sm:$0xff] }
  0xf7   : > { %1381 = vmatprep.subr.mxu0 %v11127_v18  ;;  %1344 = vmatpush2.msra.mxu1 %v6707_v36  ;;  %v11167_v18 = vld [vmem:[#allocation48_spill] sm:$0xff] }
  0xf8   : > { %1385 = vmatpush1.msra.mxu0 %v11128_v23  ;;  %1346 = vmatprep.subr.mxu1 %v6720_v39  ;;  %v11168_v23 = vand.u32 4294901760, %v11167_v18  ;;  %v11204_v18 = vld [vmem:[#allocation72_spill] sm:$0xff] }
  0xf9   : > { %1389 = vmatprep.subr.mxu0 %v11129_v25  ;;  %1348 = vmatpush2.msra.mxu1 %v6738_v38  ;;  %v11169_v25 = vld [vmem:[#allocation22_spill] sm:$0xff] }
  0xfa   : > { %1352 = vmatprep.mubr.f32.mxu1 %v11130_v31  ;;  %1393 = vmatpush1.msra.mxu0 %v11131_v26  ;;  %v11170_v31 = vld [vmem:[#allocation50_spill] sm:$0xff] }
  0xfb   : > { %1356 = vmatmul.mubr.f32.vlgmr.msra.gmra.mxu1 %v11132_v35  ;;  %1397 = vmatprep.subr.mxu0 %v11133_v27  ;;  %v11171_v26 = vand.u32 4294901760, %v11170_v31  ;;  %v11172_v35 = vld [vmem:[#allocation23_spill] sm:$0xff]  ;;  %v11173_v27 = vld [vmem:[#allocation52_spill] sm:$0xff]  ;;  %v7091_v31 = vand.u32 4294901760, %v370_v21 }
  0xfc   : > { %1628 = vmatprep.subr.mxu1 %v5958_v3  ;;  %1401 = vmatpush1.msra.mxu0 %v11134_v40  ;;  %v11138_v3 = vand.u32 4294901760, %v6145_v6  ;;  %v11155_v6 = vld [vmem:[#allocation40_spill] sm:$0xff]  ;;  %v11174_v40 = vand.u32 4294901760, %v11173_v27 }
  0xfd   : > { %1630 = vmatpush1.msra.mxu1 %v5960_v4  ;;  %1405 = vmatprep.subr.mxu0 %v11135_v45  ;;  %v11139_v4 = vand.u32 4294901760, %v6166_v54  ;;  %v11152_v54 = vld [vmem:[#allocation38_spill] sm:$0xff]  ;;  %v11175_v45 = vld [vmem:[#allocation24_spill] sm:$0xff] }
  0xfe   : > { %1632 = vmatprep.subr.mxu1 %v5962_v5  ;;  %1409 = vmatpush1.msra.mxu0 %v11136_v59  ;;  %v11140_v5 = vand.u32 4294901760, %v6179_v63  ;;  %v11153_v57 = vand.u32 4294901760, %v11152_v54  ;;  %v11154_v63 = vld [vmem:[#allocation17_spill] sm:$0xff]  ;;  %v11176_v59 = vld [vmem:[#allocation54_spill] sm:$0xff] }
  0xff   : > { %1634 = vmatpush1.msra.mxu1 %v5964_v9  ;;  %1413 = vmatprep.subr.mxu0 %v11137_v0  ;;  %v11141_v9 = vand.u32 4294901760, %v6197_v55  ;;  %v11156_v55 = vand.u32 4294901760, %v11155_v6  ;;  %v11177_v0 = vand.u32 4294901760, %v11176_v59  ;;  %v11194_v6 = vld [vmem:[#allocation66_spill] sm:$0xff]  ;;  %v11210_v59 = vld [vmem:[#allocation76_spill] sm:$0xff] }
 0x100   : > { %1636 = vmatprep.subr.mxu1 %v5966_v10  ;;  %1417 = vmatpush1.msra.mxu0 %v11138_v3  ;;  %v11142_v10 = vand.u32 4294901760, %v6210_v58  ;;  %v11157_v58 = vld [vmem:[#allocation18_spill] sm:$0xff]  ;;  %v11178_v3 = vld [vmem:[#allocation25_spill] sm:$0xff] }
 0x101   : > { %1638 = vmatpush1.msra.mxu1 %v5968_v11  ;;  %1421 = vmatprep.subr.mxu0 %v11139_v4  ;;  %v11143_v11 = vand.u32 4294901760, %v6222_v60  ;;  %v11179_v4 = vld [vmem:[#allocation56_spill] sm:$0xff] }
 0x102   : > { %1640 = vmatprep.subr.mxu1 %v5971_v15  ;;  %1425 = vmatpush1.msra.mxu0 %v11140_v5  ;;  %v11144_v15 = vand.u32 4294901760, %v11042_v52  ;;  %v11163_v52 = vld [vmem:[#allocation20_spill] sm:$0xff]  ;;  %v11180_v5 = vand.u32 4294901760, %v11179_v4 }
 0x103   : > { %1642 = vmatpush1.msra.mxu1 %v5973_v16  ;;  %1429 = vmatprep.subr.mxu0 %v11141_v9  ;;  %v11145_v16 = vand.u32 4294901760, %v11044_v33  ;;  %v11181_v9 = vld [vmem:[#allocation26_spill] sm:$0xff] }
 0x104   : > { %1644 = vmatprep.subr.mxu1 %v5975_v17  ;;  %1433 = vmatpush1.msra.mxu0 %v11142_v10  ;;  %v11146_v17 = vld [vmem:[#allocation34_spill] sm:$0xff] }
 0x105   : > { %1646 = vmatpush1.msra.mxu1 %v5988_v22  ;;  %1437 = vmatprep.subr.mxu0 %v11143_v11  ;;  %v11147_v8 = vand.u32 4294901760, %v11146_v17  ;;  %v11149_v22 = vld [vmem:[#allocation36_spill] sm:$0xff]  ;;  %v11182_v10 = vld [vmem:[#allocation58_spill] sm:$0xff] }
 0x106   : > { %1648 = vmatprep.subr.mxu1 %v11041_v24  ;;  %1441 = vmatpush1.msra.mxu0 %v11144_v15  ;;  %v11150_v60 = vand.u32 4294901760, %v11149_v22  ;;  %v11162_v24 = vand.u32 4294901760, %v11161_v1  ;;  %v11183_v11 = vand.u32 4294901760, %v11182_v10  ;;  %v11184_v15 = vld [vmem:[#allocation27_spill] sm:$0xff] }
 0x107   : > { %1650 = vmatpush1.msra.mxu1 %v11043_v62  ;;  %1445 = vmatprep.subr.mxu0 %v11145_v16  ;;  %v11164_v62 = vld [vmem:[#allocation46_spill] sm:$0xff]  ;;  %v11185_v16 = vld [vmem:[#allocation60_spill] sm:$0xff]  ;;  %v11199_v1 = vld [vmem:[#allocation35_spill] sm:$0xff] }
 0x108   : > { %1652 = vmatprep.subr.mxu1 %v11045_v14  ;;  %1449 = vmatpush1.msra.mxu0 %v11147_v8  ;;  %v11165_v33 = vand.u32 4294901760, %v11164_v62  ;;  %v11166_v14 = vld [vmem:[#allocation21_spill] sm:$0xff]  ;;  %v11186_v17 = vand.u32 4294901760, %v11185_v16  ;;  %v11187_v8 = vld [vmem:[#allocation28_spill] sm:$0xff] }
 0x109   : > { %1654 = vmatpush1.msra.mxu1 %v11148_v42  ;;  %1453 = vmatprep.subr.mxu0 %v11150_v60  ;;  %v11188_v42 = vld [vmem:[#allocation62_spill] sm:$0xff]  ;;  %v11190_v60 = vld [vmem:[#allocation29_spill] sm:$0xff] }
 0x10a   : > { %1656 = vmatprep.subr.mxu1 %v11151_v48  ;;  %1457 = vmatpush1.msra.mxu0 %v11153_v57  ;;  %v11189_v22 = vand.u32 4294901760, %v11188_v42  ;;  %v11191_v48 = vld [vmem:[#allocation64_spill] sm:$0xff]  ;;  %v11193_v57 = vld [vmem:[#allocation31_spill] sm:$0xff]  ;;  %v11202_v62 = vld [vmem:[#allocation37_spill] sm:$0xff] }
 0x10b   : > { %1658 = vmatpush1.msra.mxu1 %v11154_v63  ;;  %1461 = vmatprep.subr.mxu0 %v11156_v55  ;;  %v11192_v54 = vand.u32 4294901760, %v11191_v48  ;;  %v371_v63 = vld [vmem:[#allocation5 + $0x2f8] sm:$0xff]  ;;  %v11195_v55 = vand.u32 4294901760, %v11194_v6  ;;  %v11219_v42 = vld [vmem:[#allocation47_spill] sm:$0xff] }
 0x10c   : > { %1660 = vmatprep.subr.mxu1 %v11157_v58  ;;  %1465 = vmatpush1.msra.mxu0 %v11159_v32  ;;  %v11196_v58 = vld [vmem:[#allocation33_spill] sm:$0xff]  ;;  %v11197_v32 = vld [vmem:[#allocation68_spill] sm:$0xff]  ;;  %v365_v48 = vld [vmem:[#allocation5 + $0x2c8] sm:$0xff] }
 0x10d   : > { %1662 = vmatpush1.msra.mxu1 %v11160_v30  ;;  %1469 = vmatprep.subr.mxu0 %v11162_v24  ;;  %v11198_v30 = vand.u32 4294901760, %v11197_v32  ;;  %v11200_v24 = vld [vmem:[#allocation70_spill] sm:$0xff]  ;;  %v11226_v32 = vld [vmem:[#allocation51_spill] sm:$0xff] }
 0x10e   : > { %1664 = vmatprep.subr.mxu1 %v11163_v52  ;;  %1473 = vmatpush1.msra.mxu0 %v11165_v33  ;;  %v11201_v52 = vand.u32 4294901760, %v11200_v24  ;;  %v7086_v33 = vand.u32 4294901760, %v371_v63  ;;  %v11228_v24 = vld [vmem:[#allocation86_spill] sm:$0xff] }
 0x10f   : > { %1666 = vmatpush1.msra.mxu1 %v11166_v14  ;;  %1477 = vmatprep.subr.mxu0 %v11168_v23  ;;  %v369_v14 = vld [vmem:[#allocation5 + $0x2e8] sm:$0xff]  ;;  %v11205_v23 = vand.u32 4294901760, %v11204_v18 }
 0x110   : > { %1668 = vmatprep.subr.mxu1 %v11169_v25  ;;  %1481 = vmatpush1.msra.mxu0 %v11171_v26  ;;  %11203 = vst [vmem:[#allocation12_spill] sm:$0xff] %v7086_v33  ;;  %v11206_v25 = vld [vmem:[#allocation39_spill] sm:$0xff]  ;;  %v368_v26 = vld [vmem:[#allocation5 + $0x2e0] sm:$0xff]  ;;  %v7099_v4 = vand.u32 4294901760, %v369_v14  ;;  %v7107_v16 = vsub.f32 %v371_v63, %v7086_v33 }
 0x111   : > { %1670 = vmatpush1.msra.mxu1 %v11172_v35  ;;  %1485 = vmatprep.subr.mxu0 %v11174_v40  ;;  %v11207_v35 = vld [vmem:[#allocation74_spill] sm:$0xff]  ;;  %v11209_v40 = vld [vmem:[#allocation41_spill] sm:$0xff] }
 0x112   : > { %1672 = vmatprep.subr.mxu1 %v11175_v45  ;;  %1489 = vmatpush1.msra.mxu0 %v11177_v0  ;;  %v11208_v27 = vand.u32 4294901760, %v11207_v35  ;;  %v367_v45 = vld [vmem:[#allocation5 + $0x2d8] sm:$0xff]  ;;  %v11211_v0 = vand.u32 4294901760, %v11210_v59  ;;  %v364_v63 = vld [vmem:[#allocation5 + $0x2c0] sm:$0xff]  ;;  %v10388_v18 = vand.u32 4294901760, %v7107_v16 }
 0x113   : > { %1674 = vmatpush1.msra.mxu1 %v11178_v3  ;;  %1493 = vmatprep.subr.mxu0 %v11180_v5  ;;  %v11212_v3 = vld [vmem:[#allocation43_spill] sm:$0xff]  ;;  %v366_v5 = vld [vmem:[#allocation5 + $0x2d0] sm:$0xff]  ;;  %v7140_v35 = vand.u32 4294901760, %v364_v63 }
 0x114   : > { %1676 = vmatprep.subr.mxu1 %v11181_v9  ;;  %1497 = vmatpush2.msra.mxu0 %v11183_v11  ;;  %v11213_v9 = vld [vmem:[#allocation78_spill] sm:$0xff]  ;;  %v11215_v11 = vld [vmem:[#allocation45_spill] sm:$0xff]  ;;  %v7120_v6 = vand.u32 4294901760, %v366_v5 }
 0x115   : > { %1678 = vmatpush1.msra.mxu1 %v11184_v15  ;;  %1501 = vmatprep.subr.mxu0 %v11186_v17  ;;  %v11214_v10 = vand.u32 4294901760, %v11213_v9  ;;  %v7104_v15 = vand.u32 4294901760, %v368_v26  ;;  %v11217_v17 = vld [vmem:[#allocation80_spill] sm:$0xff]  ;;  %11234 = vst [vmem:[#allocation55_spill] sm:$0xff] %v7140_v35  ;;  %v11241_v9 = vld [vmem:[#allocation90_spill] sm:$0xff] }
 0x116   : > { %1680 = vmatprep.subr.mxu1 %v11187_v8  ;;  %1505 = vmatpush2.msra.mxu0 %v11189_v22  ;;  %v11218_v8 = vand.u32 4294901760, %v11217_v17  ;;  %v7113_v22 = vsub.f32 %v370_v21, %v7091_v31  ;;  %11223 = vst [vmem:[#allocation32_spill] sm:$0xff] %v7120_v6  ;;  %v7126_v21 = vsub.f32 %v369_v14, %v7099_v4 }
 0x117   : > { %1682 = vmatpush1.msra.mxu1 %v11190_v60  ;;  %1509 = vmatprep.subr.mxu0 %v11192_v54  ;;  %11216 = vst [vmem:[#allocation30_spill] sm:$0xff] %v7104_v15  ;;  %v7115_v60 = vand.u32 4294901760, %v367_v45  ;;  %v11221_v54 = vld [vmem:[#allocation82_spill] sm:$0xff]  ;;  %v7150_v59 = vsub.f32 %v366_v5, %v7120_v6 }
 0x118   : > { %1684 = vmatprep.subr.mxu1 %v11193_v57  ;;  %1513 = vmatpush2.msra.mxu0 %v11195_v55  ;;  %v11222_v57 = vand.u32 4294901760, %v11221_v54  ;;  %v11224_v55 = vld [vmem:[#allocation84_spill] sm:$0xff]  ;;  %11227 = vst [vmem:[#allocation14_spill] sm:$0xff] %v7126_v21  ;;  %v10386_v14 = vand.u32 4294901760, %v7113_v22 }
 0x119   : > { %1686 = vmatpush1.msra.mxu1 %v11196_v58  ;;  %1517 = vmatprep.subr.mxu0 %v11198_v30  ;;  %11220 = vst [vmem:[#allocation13_spill] sm:$0xff] %v7115_v60  ;;  %v11225_v58 = vand.u32 4294901760, %v11224_v55  ;;  %v363_v30 = vld [vmem:[#allocation5 + $0x2b8] sm:$0xff]  ;;  %11238 = vst [vmem:[#allocation59_spill] sm:$0xff] %v7150_v59  ;;  %v358_v54 = vld [vmem:[#allocation5 + $0x290] sm:$0xff] }
 0x11a   : > { %1688 = vmatprep.subr.mxu1 %v11199_v1  ;;  %1521 = vmatpush2.msra.mxu0 %v11201_v52  ;;  %v362_v1 = vld [vmem:[#allocation5 + $0x2b0] sm:$0xff]  ;;  %v11229_v52 = vand.u32 4294901760, %v11228_v24 }
 0x11b   : > { %1690 = vmatpush1.msra.mxu1 %v11202_v62  ;;  %1525 = vmatprep.subr.mxu0 %v11205_v23  ;;  %v7134_v62 = vand.u32 4294901760, %v365_v48  ;;  %v11232_v23 = vld [vmem:[#allocation87_spill] sm:$0xff] }
 0x11c   : > { %1692 = vmatprep.subr.mxu1 %v11206_v25  ;;  %1529 = vmatpush2.msra.mxu0 %v11208_v27  ;;  %v11233_v25 = vand.u32 4294901760, %v11232_v23  ;;  %v360_v27 = vld [vmem:[#allocation5 + $0x2a0] sm:$0xff] }
 0x11d   : > { %1694 = vmatpush2.msra.mxu1 %v11209_v40  ;;  %1533 = vmatprep.subr.mxu0 %v11211_v0  ;;  %11231 = vst [vmem:[#allocation53_spill] sm:$0xff] %v7134_v62  ;;  %v7144_v40 = vsub.f32 %v367_v45, %v7115_v60  ;;  %v7152_v0 = vand.u32 4294901760, %v363_v30  ;;  %v10385_v45 = vand.u32 4294901760, %v7126_v21  ;;  %v7168_v5 = vand.u32 4294901760, %v360_v27 }
 0x11e   : > { %1696 = vmatprep.subr.mxu1 %v11212_v3  ;;  %1537 = vmatpush2.msra.mxu0 %v11214_v10  ;;  %v7154_v3 = vand.u32 4294901760, %v362_v1  ;;  %v11242_v10 = vand.u32 4294901760, %v11241_v9 }
 0x11f   : > { %1698 = vmatpush2.msra.mxu1 %v11215_v11  ;;  %1541 = vmatprep.subr.mxu0 %v11218_v8  ;;  %11235 = vst [vmem:[#allocation57_spill] sm:$0xff] %v7144_v40  ;;  %11239 = vst [vmem:[#allocation61_spill] sm:$0xff] %v7152_v0  ;;  %v11243_v11 = vld [vmem:[#allocation92_spill] sm:$0xff]  ;;  %v10384_v24 = vand.u32 4294901760, %v7144_v40 }
 0x120   : > { %1700 = vmatprep.subr.mxu1 %v11219_v42  ;;  %1545 = vmatpush2.msra.mxu0 %v11222_v57  ;;  %11240 = vst [vmem:[#allocation63_spill] sm:$0xff] %v7154_v3  ;;  %v11244_v17 = vand.u32 4294901760, %v11243_v11  ;;  %11245 = vst [vmem:[#allocation65_spill] sm:$0xff] %v7168_v5  ;;  %v359_v42 = vld [vmem:[#allocation5 + $0x298] sm:$0xff]  ;;  %v11247_v57 = vld [vmem:[#allocation94_spill] sm:$0xff]  ;;  %v7192_v23 = vsub.f32 %v362_v1, %v7154_v3 }
 0x121   : > { %1702 = vmatpush2.msra.mxu1 %v11095_v49  ;;  %1549 = vmatprep.subr.mxu0 %v11225_v58  ;;  %v7132_v49 = vsub.f32 %v368_v26, %v7104_v15  ;;  %v11248_v55 = vand.u32 4294901760, %v11247_v57  ;;  %v7183_v58 = vsub.f32 %v7113_v22, %v10386_v14  ;;  %v7206_v9 = vand.u32 4294901760, %v359_v42  ;;  %v356_v1 = vld [vmem:[#allocation5 + $0x280] sm:$0xff]  ;;  %v357_v57 = vld [vmem:[#allocation5 + $0x288] sm:$0xff] }
 0x122   : > { %1704 = vmatprep.subr.mxu1 %v11226_v32  ;;  %1553 = vmatpush2.msra.mxu0 %v11229_v52  ;;  %v11251_v52 = vld [vmem:[#allocation95_spill] sm:$0xff]  ;;  %11253 = vst [vmem:[#allocation73_spill] sm:$0xff] %v7192_v23  ;;  %v11267_v14 = vld [vmem:[#allocation102_spill] sm:$0xff] }
 0x123   : > { %1706 = vmatpush2.msra.mxu1 %v11099_v51  ;;  %11230 = vst [vmem:[#allocation49_spill] sm:$0xff] %v7132_v49  ;;  %1557 = vmatprep.subr.mxu0 %v11233_v25  ;;  %v11236_v51 = vld [vmem:[#allocation88_spill] sm:$0xff]  ;;  %v10383_v8 = vand.u32 4294901760, %v7132_v49 }
 0x124   : > { %1708 = vmatprep.subr.mxu1 %v11101_v53  ;;  %v11237_v26 = vand.u32 4294901760, %v11236_v51  ;;  %v361_v53 = vld [vmem:[#allocation5 + $0x2a8] sm:$0xff]  ;;  %v11255_v25 = vld [vmem:[#allocation96_spill] sm:$0xff] }
 0x125   : > { %1710 = vmatpush2.msra.mxu1 %v11103_v2  ;;  %v7166_v2 = vsub.f32 %v7107_v16, %v10388_v18  ;;  %v7185_v32 = vand.u32 4294901760, %v361_v53  ;;  %v11256_v51 = vand.u32 4294901760, %v11255_v25  ;;  %v11272_v18 = vand.u32 4294901760, %v6785_v13 }
 0x126   : > { %1561 = vmatpush2.msra.mxu0 %v11237_v26  ;;  %1712 = vmatprep.subr.mxu1 %v11105_v44  ;;  %v7172_v44 = vsub.f32 %v365_v48, %v7134_v62  ;;  %v11252_v48 = vand.u32 4294901760, %v11251_v52  ;;  %v7204_v26 = vsub.f32 %v7126_v21, %v10385_v45  ;;  %v11261_v52 = vld [vmem:[#allocation99_spill] sm:$0xff]  ;;  %v346_v21 = vld [vmem:[#allocation5 + $0x230] sm:$0xff] }
 0x127   : > { %1565 = vmatprep.subr.mxu0 %v11242_v10  ;;  %1714 = vmatpush2.msra.mxu1 %v11106_v41  ;;  %v7178_v41 = vsub.f32 %v364_v63, %v7140_v35  ;;  %11250 = vst [vmem:[#allocation71_spill] sm:$0xff] %v7185_v32  ;;  %v7196_v63 = vsub.f32 %v363_v30, %v7152_v0  ;;  %v11258_v10 = vld [vmem:[#allocation97_spill] sm:$0xff]  ;;  %v11277_v30 = vld [vmem:[#allocation104_spill] sm:$0xff] }
 0x128   : > { %1569 = vmatpush2.msra.mxu0 %v11244_v17  ;;  %11246 = vst [vmem:[#allocation67_spill] sm:$0xff] %v7172_v44  ;;  %1716 = vmatprep.subr.mxu1 %v11108_v7  ;;  %v10387_v7 = vand.u32 4294901760, %v7150_v59  ;;  %v11259_v11 = vand.u32 4294901760, %v11258_v10  ;;  %v7215_v17 = vsub.f32 %v360_v27, %v7168_v5  ;;  %v7230_v27 = vsub.f32 %v7144_v40, %v10384_v24  ;;  %v354_v24 = vld [vmem:[#allocation5 + $0x270] sm:$0xff] }
 0x129   : > { %1573 = vmatprep.subr.mxu0 %v11248_v55  ;;  %11249 = vst [vmem:[#allocation69_spill] sm:$0xff] %v7178_v41  ;;  %1718 = vmatpush2.msra.mxu1 %v11109_v28  ;;  %11254 = vst [vmem:[#allocation75_spill] sm:$0xff] %v7196_v63  ;;  %v7208_v28 = vand.u32 4294901760, %v358_v54  ;;  %v10389_v55 = vand.u32 4294901760, %v7172_v44  ;;  %v10390_v25 = vand.u32 4294901760, %v7178_v41  ;;  %v7234_v10 = vsub.f32 %v361_v53, %v7185_v32 }
 0x12a   : > { %1577 = vmatpush2.msra.mxu0 %v11252_v48  ;;  %1720 = vmatprep.subr.mxu1 %v11110_v19  ;;  %11260 = vst [vmem:[#allocation79_spill] sm:$0xff] %v7215_v17  ;;  %v7220_v19 = vsub.f32 %v7132_v49, %v10383_v8  ;;  %v11262_v48 = vand.u32 4294901760, %v11261_v52  ;;  %v7244_v52 = vand.u32 4294901760, %v356_v1  ;;  %v11268_v53 = vand.u32 4294901760, %v11267_v14  ;;  %v351_v14 = vld [vmem:[#allocation5 + $0x258] sm:$0xff] }
 0x12b   : > { %1581 = vmatprep.subr.mxu0 %v11256_v51  ;;  %11257 = vst [vmem:[#allocation77_spill] sm:$0xff] %v7208_v28  ;;  %1722 = vmatpush2.msra.mxu1 %v11111_v29  ;;  %v355_v51 = vld [vmem:[#allocation5 + $0x278] sm:$0xff]  ;;  %11263 = vst [vmem:[#allocation89_spill] sm:$0xff] %v7234_v10  ;;  %v11274_v29 = vld [vmem:[#allocation103_spill] sm:$0xff]  ;;  %v11278_v45 = vand.u32 4294901760, %v11277_v30  ;;  %v7336_v49 = vand.u32 4294901760, %v351_v14 }
 0x12c   : > { %1585 = vmatpush2.msra.mxu0 %v11259_v11  ;;  %1724 = vmatprep.subr.mxu1 %v11112_v50  ;;  %v11264_v11 = vld [vmem:[#allocation101_spill] sm:$0xff]  ;;  %v7242_v50 = vsub.f32 %v7150_v59, %v10387_v7  ;;  %11266 = vst [vmem:[#allocation91_spill] sm:$0xff] %v7244_v52  ;;  %v7258_v7 = vsub.f32 %v359_v42, %v7206_v9  ;;  %v11275_v42 = vand.u32 4294901760, %v11274_v29 }
 0x12d   : > { %1589 = vmatprep.subr.mxu0 %v11262_v48  ;;  %v11265_v8 = vand.u32 4294901760, %v11264_v11  ;;  %1726 = vmatpush2.msra.mxu1 %v11113_v12  ;;  %v10395_v48 = vand.u32 4294901760, %v7196_v63  ;;  %v7253_v12 = vsub.f32 %v358_v54, %v7208_v28  ;;  %v7255_v11 = vand.u32 4294901760, %v357_v57  ;;  %v352_v54 = vld [vmem:[#allocation5 + $0x260] sm:$0xff]  ;;  %v11282_v30 = vld [vmem:[#allocation105_spill] sm:$0xff]  ;;  %11297 = vst [vmem:[#allocation44_spill] sm:$0xff] %v7336_v49 }
 0x12e   : > { %1728 = vmatprep.subr.mxu1 %v11114_v61  ;;  %11271 = vst [vmem:[#allocation15_spill] sm:$0xff] %v7258_v7  ;;  %v7267_v61 = vsub.f32 %v7172_v44, %v10389_v55  ;;  %v353_v55 = vld [vmem:[#allocation5 + $0x268] sm:$0xff]  ;;  %v7304_v29 = vand.u32 4294901760, %v352_v54  ;;  %v11293_v44 = vld [vmem:[#allocation85_spill] sm:$0xff] }
 0x12f   : > { %1593 = vmatpush2.msra.mxu0 %v11265_v8  ;;  %11269 = vst [vmem:[#allocation93_spill] sm:$0xff] %v7253_v12  ;;  %11270 = vst [vmem:[#allocation34_spill] sm:$0xff] %v7255_v11  ;;  %1730 = vmatpush2.msra.mxu1 %v11115_v46  ;;  %v7279_v46 = vsub.f32 %v7178_v41, %v10390_v25  ;;  %v11279_v8 = vld [vmem:[#allocation81_spill] sm:$0xff]  ;;  %v11281_v25 = vand.u32 4294901760, %v7192_v23  ;;  %v350_v41 = vld [vmem:[#allocation5 + $0x250] sm:$0xff] }
 0x130   : > { %1597 = vmatprep.subr.mxu0 %v11268_v53  ;;  %v7269_v53 = vand.u32 4294901760, %v355_v51  ;;  %1732 = vmatprep.subr.mxu1 %v11116_v47  ;;  %v7289_v47 = vsub.f32 %v356_v1, %v7244_v52  ;;  %11285 = vst [vmem:[#allocation17_spill] sm:$0xff] %v7304_v29 }
 0x131   : > { %1601 = vmatpush2.msra.mxu0 %v11272_v18  ;;  %v7281_v18 = vand.u32 4294901760, %v354_v24  ;;  %1734 = vmatpush2.msra.mxu1 %v11279_v8  ;;  %v7299_v13 = vsub.f32 %v7192_v23, %v11281_v25  ;;  %v11284_v8 = vld [vmem:[#allocation83_spill] sm:$0xff]  ;;  %v11289_v25 = vld [vmem:[#allocation98_spill] sm:$0xff] }
 0x132   : > { %11273 = vst [vmem:[#allocation36_spill] sm:$0xff] %v7269_v53  ;;  %1605 = vmatprep.subr.mxu0 %v11275_v42  ;;  %11280 = vst [vmem:[#allocation38_spill] sm:$0xff] %v7289_v47  ;;  %v7294_v42 = vsub.f32 %v7196_v63, %v10395_v48  ;;  %1736 = vmatprep.subr.mxu1 %v11284_v8  ;;  %v7309_v48 = vsub.f32 %v357_v57, %v7255_v11  ;;  %v11287_v63 = vld [vmem:[#allocation106_spill] sm:$0xff]  ;;  %v11291_v8 = vand.u32 4294901760, %v7215_v17  ;;  %v11294_v57 = vld [vmem:[#allocation100_spill] sm:$0xff] }
 0x133   : > { %11276 = vst [vmem:[#allocation16_spill] sm:$0xff] %v7281_v18  ;;  %1609 = vmatpush2.msra.mxu0 %v11278_v45  ;;  %v11283_v45 = vand.u32 4294901760, %v11282_v30  ;;  %v11288_v59 = vand.u32 4294901760, %v11287_v63  ;;  %1619 = vmatprep.mubr.f32.mxu0 %v11289_v25  ;;  %v7323_v1 = vsub.f32 %v355_v51, %v7269_v53  ;;  %v7329_v63 = vsub.f32 %v354_v24, %v7281_v18  ;;  %v349_v24 = vld [vmem:[#allocation5 + $0x248] sm:$0xff] }
 0x134   : > { %11286 = vst [vmem:[#allocation40_spill] sm:$0xff] %v7309_v48  ;;  %v7320_v23 = vsub.f32 %v7215_v17, %v11291_v8  ;;  %1738 = vmatpush2.msra.mxu1 %v11293_v44  ;;  %v11296_v30 = vand.u32 4294901760, %v7234_v10  ;;  %v348_v8 = vld [vmem:[#allocation5 + $0x240] sm:$0xff]  ;;  %v11301_v44 = vand.u32 4294901760, %v7253_v12  ;;  %v347_v17 = vld [vmem:[#allocation5 + $0x238] sm:$0xff]  ;;  %1756 = vmatprep.mubr.f32.mxu1 %v11289_v25 }
 0x135   : > { %1613 = vmatprep.subr.mxu0 %v11283_v45  ;;  %v7315_v45 = vand.u32 4294901760, %v353_v55  ;;  %11292 = vst [vmem:[#allocation42_spill] sm:$0xff] %v7323_v1  ;;  %11295 = vst [vmem:[#allocation19_spill] sm:$0xff] %v7329_v63  ;;  %1740 = vmatprep.subr.mxu1 %v6641_v43  ;;  %v11300_v43 = vand.u32 4294901760, %v7258_v7 }
 0x136   : > { %1617 = vmatpush2.msra.mxu0 %v11288_v59  ;;  %v7334_v40 = vsub.f32 %v7234_v10, %v11296_v30  ;;  %v7342_v59 = vand.u32 4294901760, %v350_v41  ;;  %1742 = vmatpush2.msra.mxu1 %v6652_v37  ;;  %v7348_v30 = vsub.f32 %v352_v54, %v7304_v29  ;;  %v7358_v51 = vsub.f32 %v7253_v12, %v11301_v44  ;;  %v344_v12 = vld [vmem:[#allocation5 + $0x220] sm:$0xff] }
 0x137   : > { %11290 = vst [vmem:[#allocation18_spill] sm:$0xff] %v7315_v45  ;;  %1621 = vmatmul.mubr.f32.vlgmr.msra.gmra.mxu0 %v11294_v57  ;;  %1765 = vmatprep.subr.mxu0 %v7086_v33  ;;  %v7353_v10 = vsub.f32 %v7258_v7, %v11300_v43  ;;  %v7364_v54 = vand.u32 4294901760, %v348_v8  ;;  %v7368_v7 = vsub.f32 %v353_v55, %v7315_v45  ;;  %v7373_v33 = vand.u32 4294901760, %v349_v24 }
 0x138   : > { %11298 = vst [vmem:[#allocation20_spill] sm:$0xff] %v7342_v59  ;;  %1767 = vmatpush1.msra.mxu0 %v7091_v31  ;;  %11299 = vst [vmem:[#allocation46_spill] sm:$0xff] %v7348_v30  ;;  %1744 = vmatprep.subr.mxu1 %v11122_v20  ;;  %v7377_v37 = vsub.f32 %v351_v14, %v7336_v49  ;;  %v7382_v55 = vsub.f32 %v350_v41, %v7342_v59  ;;  %v7389_v44 = vand.u32 4294901760, %v347_v17  ;;  %v345_v20 = vld [vmem:[#allocation5 + $0x228] sm:$0xff] }
 0x139   : > { %1769 = vmatprep.subr.mxu0 %v7099_v4  ;;  %11302 = vst [vmem:[#allocation21_spill] sm:$0xff] %v7364_v54  ;;  %11303 = vst [vmem:[#allocation48_spill] sm:$0xff] %v7368_v7  ;;  %1746 = vmatpush2.msra.mxu1 %v11124_v56  ;;  %v11307_v56 = vand.u32 4294901760, %v7289_v47  ;;  %v11310_v41 = vand.u32 4294901760, %v7309_v48  ;;  %v341_v14 = vld [vmem:[#allocation5 + $0x208] sm:$0xff] }
 0x13a   : > { %1771 = vmatpush1.msra.mxu0 %v7104_v15  ;;  %11304 = vst [vmem:[#allocation22_spill] sm:$0xff] %v7373_v33  ;;  %11305 = vst [vmem:[#allocation50_spill] sm:$0xff] %v7377_v37  ;;  %1748 = vmatprep.subr.mxu1 %v11126_v34  ;;  %v7391_v15 = vand.u32 4294901760, %v346_v21 }
 0x13b   : > { %1773 = vmatprep.subr.mxu0 %v7115_v60  ;;  %11306 = vst [vmem:[#allocation23_spill] sm:$0xff] %v7382_v55  ;;  %v7387_v43 = vsub.f32 %v7289_v47, %v11307_v56  ;;  %11308 = vst [vmem:[#allocation52_spill] sm:$0xff] %v7389_v44  ;;  %1750 = vmatpush2.msra.mxu1 %v6707_v36  ;;  %v7400_v60 = vsub.f32 %v7309_v48, %v11310_v41  ;;  %v11312_v36 = vand.u32 4294901760, %v7323_v1  ;;  %v343_v41 = vld [vmem:[#allocation5 + $0x218] sm:$0xff]  ;;  %v342_v48 = vld [vmem:[#allocation5 + $0x210] sm:$0xff] }
 0x13c   : > { %11309 = vst [vmem:[#allocation24_spill] sm:$0xff] %v7391_v15  ;;  %1775 = vmatpush1.msra.mxu0 %v7120_v6  ;;  %1752 = vmatprep.subr.mxu1 %v6720_v39  ;;  %v7406_v47 = vsub.f32 %v348_v8, %v7364_v54  ;;  %v7414_v6 = vand.u32 4294901760, %v344_v12  ;;  %v11314_v39 = vand.u32 4294901760, %v7329_v63  ;;  %v7423_v56 = vand.u32 4294901760, %v345_v20 }
 0x13d   : > { %1777 = vmatprep.subr.mxu0 %v7134_v62  ;;  %v7411_v34 = vsub.f32 %v7323_v1, %v11312_v36  ;;  %1754 = vmatpush2.msra.mxu1 %v6738_v38  ;;  %v7427_v1 = vsub.f32 %v349_v24, %v7373_v33  ;;  %v7433_v25 = vsub.f32 %v346_v21, %v7391_v15  ;;  %v11319_v24 = vand.u32 4294901760, %v7166_v2 }
 0x13e   : > { %11311 = vst [vmem:[#allocation54_spill] sm:$0xff] %v7406_v47  ;;  %11313 = vst [vmem:[#allocation25_spill] sm:$0xff] %v7414_v6  ;;  %v7421_v8 = vsub.f32 %v7329_v63, %v11314_v39  ;;  %1779 = vmatpush1.msra.mxu0 %v7140_v35  ;;  %1758 = vmatmul.mubr.f32.vlgmr.msra.gmra.mxu1 %v11294_v57  ;;  %v340_v39 = vld [vmem:[#allocation5 + $0x200] sm:$0xff]  ;;  %v7437_v63 = vsub.f32 %v347_v17, %v7389_v44  ;;  %v11320_v57 = vand.u32 4294901760, %v7348_v30 }
 0x13f   : > { %11315 = vst [vmem:[#allocation56_spill] sm:$0xff] %v7423_v56  ;;  %11316 = vst [vmem:[#allocation26_spill] sm:$0xff] %v7427_v1  ;;  %1781 = vmatprep.subr.mxu0 %v7152_v0  ;;  %1914 = vmatprep.subr.mxu1 %v11319_v24  ;;  %v7448_v21 = vand.u32 4294901760, %v343_v41  ;;  %v7450_v35 = vand.u32 4294901760, %v342_v48  ;;  %v11323_v17 = vand.u32 4294901760, %v7183_v58  ;;  %v11324_v24 = vand.u32 4294901760, %v7368_v7 }
 0x140   : > { %11317 = vst [vmem:[#allocation58_spill] sm:$0xff] %v7433_v25  ;;  %11318 = vst [vmem:[#allocation27_spill] sm:$0xff] %v7437_v63  ;;  %v7446_v38 = vsub.f32 %v7348_v30, %v11320_v57  ;;  %1783 = vmatpush1.msra.mxu0 %v7154_v3  ;;  %v7462_v57 = vsub.f32 %v344_v12, %v7414_v6  ;;  %v11326_v0 = vand.u32 4294901760, %v7204_v26  ;;  %v402_v12 = vld [vmem:[#allocation5 + $0x3f0] sm:$0xff]  ;;  %v11329_v30 = vand.u32 4294901760, %v7220_v19  ;;  %v401_v19 = vld [vmem:[#allocation5 + $0x3e8] sm:$0xff] }
 0x141   : > { %11321 = vst [vmem:[#allocation60_spill] sm:$0xff] %v7448_v21  ;;  %11322 = vst [vmem:[#allocation28_spill] sm:$0xff] %v7450_v35  ;;  %1920 = vmatpush1.msra.mxu1 %v11323_v17  ;;  %v7459_v36 = vsub.f32 %v7368_v7, %v11324_v24  ;;  %1785 = vmatprep.subr.mxu0 %v7185_v32  ;;  %v11327_v17 = vand.u32 4294901760, %v7377_v37  ;;  %v7475_v7 = vand.u32 4294901760, %v340_v39  ;;  %v11330_v26 = vand.u32 4294901760, %v7382_v55  ;;  %v403_v32 = vld [vmem:[#allocation5 + $0x3f8] sm:$0xff] }
 0x142   : > { %11325 = vst [vmem:[#allocation62_spill] sm:$0xff] %v7462_v57  ;;  %1926 = vmatprep.subr.mxu1 %v11326_v0  ;;  %1787 = vmatpush1.msra.mxu0 %v7168_v5  ;;  %v7485_v58 = vand.u32 4294901760, %v341_v14  ;;  %v7489_v24 = vsub.f32 %v345_v20, %v7423_v56  ;;  %v7500_v5 = vsub.f32 %v343_v41, %v7448_v21  ;;  %v11336_v20 = vand.u32 4294901760, %v7242_v50 }
 0x143   : > { %v7472_v2 = vsub.f32 %v7377_v37, %v11327_v17  ;;  %11328 = vst [vmem:[#allocation29_spill] sm:$0xff] %v7475_v7  ;;  %1932 = vmatpush1.msra.mxu1 %v11329_v30  ;;  %v7483_v0 = vsub.f32 %v7382_v55, %v11330_v26  ;;  %1789 = vmatprep.subr.mxu0 %v7206_v9  ;;  %v11333_v37 = vand.u32 4294901760, %v7230_v27  ;;  %v400_v55 = vld [vmem:[#allocation5 + $0x3e0] sm:$0xff]  ;;  %v11337_v27 = vand.u32 4294901760, %v7406_v47 }
 0x144   : > { %11331 = vst [vmem:[#allocation64_spill] sm:$0xff] %v7485_v58  ;;  %11332 = vst [vmem:[#allocation31_spill] sm:$0xff] %v7489_v24  ;;  %v7496_v30 = vsub.f32 %v342_v48, %v7450_v35  ;;  %1791 = vmatpush1.msra.mxu0 %v7208_v28  ;;  %v7511_v48 = vand.u32 4294901760, %v402_v12  ;;  %v11339_v41 = vand.u32 4294901760, %v7267_v61  ;;  %v11343_v26 = vand.u32 4294901760, %v7279_v46 }
 0x145   : > { %1938 = vmatprep.subr.mxu1 %v11333_v37  ;;  %11335 = vst [vmem:[#allocation33_spill] sm:$0xff] %v7500_v5  ;;  %v7509_v37 = vsub.f32 %v7406_v47, %v11337_v27  ;;  %1793 = vmatprep.subr.mxu0 %v7255_v11  ;;  %v7524_v27 = vsub.f32 %v340_v39, %v7475_v7  ;;  %v7526_v47 = vand.u32 4294901760, %v403_v32  ;;  %v7538_v11 = vand.u32 4294901760, %v400_v55  ;;  %v399_v39 = vld [vmem:[#allocation5 + $0x3d8] sm:$0xff] }
 0x146   : > { %11334 = vst [vmem:[#allocation66_spill] sm:$0xff] %v7496_v30  ;;  %1944 = vmatpush1.msra.mxu1 %v11336_v20  ;;  %11338 = vst [vmem:[#allocation68_spill] sm:$0xff] %v7511_v48  ;;  %v11340_v20 = vand.u32 4294901760, %v7427_v1  ;;  %1795 = vmatpush1.msra.mxu0 %v7244_v52  ;;  %v11347_v46 = vand.u32 4294901760, %v7433_v25  ;;  %v7548_v61 = vand.u32 4294901760, %v401_v19  ;;  %v396_v52 = vld [vmem:[#allocation5 + $0x3c0] sm:$0xff] }
 0x147   : > { %1950 = vmatprep.subr.mxu1 %v11339_v41  ;;  %11341 = vst [vmem:[#allocation35_spill] sm:$0xff] %v7524_v27  ;;  %11342 = vst [vmem:[#allocation70_spill] sm:$0xff] %v7526_v47  ;;  %v11344_v41 = vand.u32 4294901760, %v7437_v63  ;;  %1797 = vmatprep.subr.mxu0 %v7269_v53  ;;  %v11350_v53 = vand.u32 4294901760, %v7299_v13  ;;  %v7571_v13 = vand.u32 4294901760, %v399_v39 }
 0x148   : > { %v7521_v17 = vsub.f32 %v7427_v1, %v11340_v20  ;;  %1956 = vmatpush1.msra.mxu1 %v11343_v26  ;;  %11345 = vst [vmem:[#allocation37_spill] sm:$0xff] %v7538_v11  ;;  %v11346_v1 = vand.u32 4294901760, %v7294_v42  ;;  %v7546_v26 = vsub.f32 %v7433_v25, %v11347_v46  ;;  %11348 = vst [vmem:[#allocation72_spill] sm:$0xff] %v7548_v61  ;;  %1799 = vmatpush1.msra.mxu0 %v7281_v18  ;;  %v7573_v42 = vld [vmem:[#allocation5 + $0x3c8] sm:$0xff] }
 0x149   : > { %v7535_v50 = vsub.f32 %v7437_v63, %v11344_v41  ;;  %v398_v63 = vld [vmem:[#allocation5 + $0x3d0] sm:$0xff]  ;;  %v7552_v20 = vsub.f32 %v341_v14, %v7485_v58  ;;  %v11352_v46 = vand.u32 4294901760, %v7462_v57  ;;  %1801 = vmatprep.subr.mxu0 %v7315_v45  ;;  %v11353_v14 = vand.u32 4294901760, %v7334_v40  ;;  %11354 = vst [vmem:[#allocation41_spill] sm:$0xff] %v7571_v13 }
 0x14a   : > { %1962 = vmatprep.subr.mxu1 %v11346_v1  ;;  %v7559_v1 = vsub.f32 %v402_v12, %v7511_v48  ;;  %v7577_v18 = vsub.f32 %v403_v32, %v7526_v47  ;;  %1803 = vmatpush1.msra.mxu0 %v7304_v29  ;;  %v11357_v40 = vand.u32 4294901760, %v7489_v24  ;;  %v11360_v32 = vand.u32 4294901760, %v7353_v10 }
 0x14b   : > { %11349 = vst [vmem:[#allocation39_spill] sm:$0xff] %v7552_v20  ;;  %1968 = vmatpush1.msra.mxu1 %v11350_v53  ;;  %v7564_v25 = vsub.f32 %v7462_v57, %v11352_v46  ;;  %v11356_v46 = vand.u32 4294901760, %v7320_v23  ;;  %v7589_v53 = vsub.f32 %v400_v55, %v7538_v11  ;;  %v7591_v57 = vand.u32 4294901760, %v398_v63  ;;  %1805 = vmatprep.subr.mxu0 %v7336_v49  ;;  %v394_v55 = vld [vmem:[#allocation5 + $0x3b0] sm:$0xff]  ;;  %v395_v49 = vld [vmem:[#allocation5 + $0x3b8] sm:$0xff] }
 0x14c   : > { %11351 = vst [vmem:[#allocation74_spill] sm:$0xff] %v7559_v1  ;;  %1974 = vmatprep.subr.mxu1 %v11353_v14  ;;  %11355 = vst [vmem:[#allocation76_spill] sm:$0xff] %v7577_v18  ;;  %v7586_v14 = vsub.f32 %v7489_v24, %v11357_v40  ;;  %v7603_v12 = vand.u32 4294901760, %v396_v52  ;;  %1807 = vmatpush1.msra.mxu0 %v7342_v59  ;;  %v11363_v29 = vand.u32 4294901760, %v7358_v51  ;;  %v11367_v59 = vand.u32 4294901760, %v7400_v60 }
 0x14d   : > { %1980 = vmatpush1.msra.mxu1 %v11356_v46  ;;  %11358 = vst [vmem:[#allocation43_spill] sm:$0xff] %v7589_v53  ;;  %11359 = vst [vmem:[#allocation78_spill] sm:$0xff] %v7591_v57  ;;  %v11361_v46 = vand.u32 4294901760, %v7500_v5  ;;  %v7618_v40 = vsub.f32 %v401_v19, %v7548_v61  ;;  %1809 = vmatprep.subr.mxu0 %v7373_v33  ;;  %v7631_v45 = vsub.f32 %v399_v39, %v7571_v13  ;;  %v391_v39 = vld [vmem:[#allocation5 + $0x398] sm:$0xff]  ;;  %v388_v33 = vld [vmem:[#allocation5 + $0x380] sm:$0xff] }
 0x14e   : > { %1986 = vmatprep.subr.mxu1 %v11360_v32  ;;  %11362 = vst [vmem:[#allocation45_spill] sm:$0xff] %v7603_v12  ;;  %v11364_v32 = vand.u32 4294901760, %v7496_v30  ;;  %1811 = vmatpush1.msra.mxu0 %v7364_v54  ;;  %v11370_v19 = vand.u32 4294901760, %v7387_v43  ;;  %v11373_v10 = vand.u32 4294901760, %v7411_v34  ;;  %v11374_v54 = vand.u32 4294901760, %v7552_v20 }
 0x14f   : > { %v7600_v41 = vsub.f32 %v7500_v5, %v11361_v46  ;;  %1992 = vmatpush1.msra.mxu1 %v11363_v29  ;;  %v7615_v46 = vand.u32 4294901760, %v7573_v42  ;;  %11366 = vst [vmem:[#allocation47_spill] sm:$0xff] %v7618_v40  ;;  %v11368_v29 = vand.u32 4294901760, %v7524_v27  ;;  %v392_v5 = vld [vmem:[#allocation5 + $0x3a0] sm:$0xff]  ;;  %11369 = vst [vmem:[#allocation82_spill] sm:$0xff] %v7631_v45  ;;  %1813 = vmatprep.subr.mxu0 %v7389_v44  ;;  %v11377_v60 = vand.u32 4294901760, %v7421_v8 }
 0x150   : > { %v7612_v23 = vsub.f32 %v7496_v30, %v11364_v32  ;;  %1998 = vmatprep.subr.mxu1 %v11367_v59  ;;  %v393_v30 = vld [vmem:[#allocation5 + $0x3a8] sm:$0xff]  ;;  %v7638_v59 = vsub.f32 %v398_v63, %v7591_v57  ;;  %v7650_v43 = vsub.f32 %v7552_v20, %v11374_v54  ;;  %v7655_v63 = vand.u32 4294901760, %v395_v49  ;;  %1815 = vmatpush1.msra.mxu0 %v7391_v15  ;;  %v390_v54 = vld [vmem:[#allocation5 + $0x390] sm:$0xff] }
 0x151   : > { %11365 = vst [vmem:[#allocation80_spill] sm:$0xff] %v7615_v46  ;;  %v7626_v51 = vsub.f32 %v7524_v27, %v11368_v29  ;;  %2004 = vmatpush1.msra.mxu1 %v11370_v19  ;;  %v7640_v29 = vand.u32 4294901760, %v394_v55  ;;  %v7653_v19 = vsub.f32 %v396_v52, %v7603_v12  ;;  %v7664_v32 = vand.u32 4294901760, %v392_v5  ;;  %1817 = vmatprep.subr.mxu0 %v7423_v56 }
 0x152   : > { %11371 = vst [vmem:[#allocation84_spill] sm:$0xff] %v7638_v59  ;;  %2010 = vmatprep.subr.mxu1 %v11373_v10  ;;  %11376 = vst [vmem:[#allocation87_spill] sm:$0xff] %v7655_v63  ;;  %v7661_v10 = vand.u32 4294901760, %v393_v30  ;;  %v11380_v52 = vand.u32 4294901760, %v7459_v36  ;;  %v11381_v15 = vand.u32 4294901760, %v7577_v18  ;;  %1819 = vmatpush1.msra.mxu0 %v7414_v6  ;;  %v11383_v36 = vand.u32 4294901760, %v7446_v38 }
 0x153   : > { %11372 = vst [vmem:[#allocation51_spill] sm:$0xff] %v7640_v29  ;;  %11375 = vst [vmem:[#allocation86_spill] sm:$0xff] %v7653_v19  ;;  %2016 = vmatpush1.msra.mxu1 %v11377_v60  ;;  %v11382_v60 = vand.u32 4294901760, %v7559_v1  ;;  %v7695_v56 = vsub.f32 %v7573_v42, %v7615_v46  ;;  %1821 = vmatprep.subr.mxu0 %v7448_v21  ;;  %v11387_v27 = vand.u32 4294901760, %v7472_v2  ;;  %v11390_v42 = vand.u32 4294901760, %v7483_v0 }
 0x154   : > { %11378 = vst [vmem:[#allocation88_spill] sm:$0xff] %v7661_v10  ;;  %11379 = vst [vmem:[#allocation90_spill] sm:$0xff] %v7664_v32  ;;  %2022 = vmatprep.subr.mxu1 %v11380_v52  ;;  %v7673_v8 = vsub.f32 %v7577_v18, %v11381_v15  ;;  %v7685_v52 = vsub.f32 %v394_v55, %v7640_v29  ;;  %v11385_v15 = vand.u32 4294901760, %v7589_v53  ;;  %v7701_v55 = vand.u32 4294901760, %v390_v54 }
 0x155   : > { %v7678_v34 = vsub.f32 %v7559_v1, %v11382_v60  ;;  %2028 = vmatpush1.msra.mxu1 %v11383_v36  ;;  %11386 = vst [vmem:[#allocation94_spill] sm:$0xff] %v7695_v56  ;;  %v389_v36 = vld [vmem:[#allocation5 + $0x388] sm:$0xff]  ;;  %1823 = vmatpush1.msra.mxu0 %v7450_v35  ;;  %v11391_v60 = vand.u32 4294901760, %v7618_v40  ;;  %v7718_v38 = vand.u32 4294901760, %v391_v39  ;;  %v7720_v21 = vand.u32 4294901760, %v388_v33 }
 0x156   : > { %11384 = vst [vmem:[#allocation92_spill] sm:$0xff] %v7685_v52  ;;  %v7690_v44 = vsub.f32 %v7589_v53, %v11385_v15  ;;  %2034 = vmatprep.subr.mxu1 %v11387_v27  ;;  %11388 = vst [vmem:[#allocation95_spill] sm:$0xff] %v7701_v55  ;;  %v7705_v15 = vsub.f32 %v395_v49, %v7655_v63  ;;  %v7716_v27 = vsub.f32 %v392_v5, %v7664_v32 }
 0x157   : > { %2040 = vmatpush1.msra.mxu1 %v11390_v42  ;;  %v7713_v2 = vsub.f32 %v7618_v40, %v11391_v60  ;;  %11393 = vst [vmem:[#allocation99_spill] sm:$0xff] %v7718_v38  ;;  %11394 = vst [vmem:[#allocation101_spill] sm:$0xff] %v7720_v21  ;;  %1825 = vmatprep.subr.mxu0 %v7485_v58  ;;  %v11395_v49 = vand.u32 4294901760, %v7521_v17  ;;  %v11396_v6 = vand.u32 4294901760, %v7631_v45  ;;  %v11398_v35 = vand.u32 4294901760, %v7509_v37  ;;  %v387_v58 = vld [vmem:[#allocation5 + $0x378] sm:$0xff] }
 0x158   : > { %11389 = vst [vmem:[#allocation96_spill] sm:$0xff] %v7705_v15  ;;  %11392 = vst [vmem:[#allocation97_spill] sm:$0xff] %v7716_v27  ;;  %v7733_v5 = vsub.f32 %v393_v30, %v7661_v10  ;;  %1827 = vmatpush1.msra.mxu0 %v7475_v7  ;;  %v7744_v42 = vand.u32 4294901760, %v389_v36  ;;  %v11401_v30 = vand.u32 4294901760, %v7535_v50  ;;  %v11403_v37 = vand.u32 4294901760, %v7653_v19 }
 0x159   : > { %2046 = vmatprep.subr.mxu1 %v11395_v49  ;;  %v7730_v60 = vsub.f32 %v7631_v45, %v11396_v6  ;;  %v11399_v49 = vand.u32 4294901760, %v7638_v59  ;;  %v386_v45 = vld [vmem:[#allocation5 + $0x370] sm:$0xff]  ;;  %1829 = vmatprep.subr.mxu0 %v7526_v47  ;;  %v384_v6 = vld [vmem:[#allocation5 + $0x360] sm:$0xff]  ;;  %v11404_v47 = vand.u32 4294901760, %v7546_v26  ;;  %v2117_v50 = vand.u32 4294901760, %v7713_v2 }
 0x15a   : > { %11397 = vst [vmem:[#allocation102_spill] sm:$0xff] %v7733_v5  ;;  %2052 = vmatpush1.msra.mxu1 %v11398_v35  ;;  %11400 = vst [vmem:[#allocation103_spill] sm:$0xff] %v7744_v42  ;;  %v7751_v35 = vsub.f32 %v390_v54, %v7701_v55  ;;  %v7756_v17 = vsub.f32 %v7653_v19, %v11403_v37  ;;  %1831 = vmatpush2.msra.mxu0 %v7511_v48  ;;  %v11407_v7 = vand.u32 4294901760, %v7586_v14  ;;  %v380_v48 = vld [vmem:[#allocation5 + $0x340] sm:$0xff] }
 0x15b   : > { %v7742_v0 = vsub.f32 %v7638_v59, %v11399_v49  ;;  %2058 = vmatprep.subr.mxu1 %v11401_v30  ;;  %v7765_v54 = vsub.f32 %v388_v33, %v7720_v21  ;;  %v7767_v30 = vld [vmem:[#allocation5 + $0x368] sm:$0xff]  ;;  %v7771_v19 = vsub.f32 %v391_v39, %v7718_v38  ;;  %1833 = vmatprep.subr.mxu0 %v7548_v61  ;;  %v7779_v2 = vand.u32 4294901760, %v386_v45  ;;  %v382_v49 = vld [vmem:[#allocation5 + $0x350] sm:$0xff] }
 0x15c   : > { %11402 = vst [vmem:[#allocation104_spill] sm:$0xff] %v7751_v35  ;;  %2064 = vmatpush1.msra.mxu1 %v11404_v47  ;;  %v7777_v47 = vand.u32 4294901760, %v387_v58  ;;  %1835 = vmatpush2.msra.mxu0 %v7538_v11  ;;  %v11410_v37 = vand.u32 4294901760, %v7564_v25  ;;  %v11411_v61 = vand.u32 4294901760, %v7695_v56  ;;  %v7791_v14 = vand.u32 4294901760, %v384_v6 }
 0x15d   : > { %11405 = vst [vmem:[#allocation81_spill] sm:$0xff] %v7765_v54  ;;  %11406 = vst [vmem:[#allocation105_spill] sm:$0xff] %v7771_v19  ;;  %2070 = vmatprep.subr.mxu1 %v11407_v7  ;;  %v7794_v26 = vsub.f32 %v389_v36, %v7744_v42  ;;  %1837 = vmatprep.subr.mxu0 %v7571_v13  ;;  %v11414_v33 = vand.u32 4294901760, %v7600_v41  ;;  %v7811_v36 = vand.u32 4294901760, %v7767_v30  ;;  %v11418_v41 = vand.u32 4294901760, %v7612_v23 }
 0x15e   : > { %11408 = vst [vmem:[#allocation83_spill] sm:$0xff] %v7777_v47  ;;  %11409 = vst [vmem:[#allocation106_spill] sm:$0xff] %v7779_v2  ;;  %2076 = vmatpush1.msra.mxu1 %v11410_v37  ;;  %v7789_v7 = vsub.f32 %v7695_v56, %v11411_v61  ;;  %v11415_v37 = vand.u32 4294901760, %v7705_v15  ;;  %v11416_v61 = vand.u32 4294901760, %v7685_v52  ;;  %1839 = vmatpush2.msra.mxu0 %v7591_v57  ;;  %v11421_v57 = vand.u32 4294901760, %v7650_v43 }
 0x15f   : > { %11412 = vst [vmem:[#allocation98_spill] sm:$0xff] %v7791_v14  ;;  %11413 = vst [vmem:[#allocation85_spill] sm:$0xff] %v7794_v26  ;;  %2082 = vmatprep.subr.mxu1 %v11414_v33  ;;  %v11419_v33 = vand.u32 4294901760, %v7716_v27  ;;  %1841 = vmatprep.subr.mxu0 %v7615_v46  ;;  %v7829_v23 = vsub.f32 %v386_v45, %v7779_v2  ;;  %v7836_v13 = vand.u32 4294901760, %v380_v48  ;;  %v273_v46 = vld [vmem:[%s5948_s27 + $0x18] sm:$0xff] }
 0x160   : > { %v7803_v39 = vsub.f32 %v7705_v15, %v11415_v37  ;;  %v7808_v11 = vsub.f32 %v7685_v52, %v11416_v61  ;;  %11417 = vst [vmem:[#allocation100_spill] sm:$0xff] %v7811_v36  ;;  %2088 = vmatpush1.msra.mxu1 %v11418_v41  ;;  %v383_v37 = vld [vmem:[#allocation5 + $0x358] sm:$0xff]  ;;  %v7822_v15 = vand.u32 4294901760, %v382_v49  ;;  %v381_v52 = vld [vmem:[#allocation5 + $0x348] sm:$0xff]  ;;  %v11423_v41 = vand.u32 4294901760, %v7733_v5  ;;  %1843 = vmatpush2.msra.mxu0 %v7603_v12 }
 0x161   : > { %v7819_v25 = vsub.f32 %v7716_v27, %v11419_v33  ;;  %2094 = vmatprep.subr.mxu1 %v11421_v57  ;;  %11422 = vst [vmem:[#allocation108_spill] sm:$0xff] %v7829_v23  ;;  %11424 = vst [vmem:[#allocation109_spill] sm:$0xff] %v7836_v13  ;;  %v7839_v27 = vsub.f32 %v387_v58, %v7777_v47  ;;  %v11426_v61 = vand.u32 4294901760, %v7626_v51  ;;  %v2141_v57 = vand.u32 4294901760, %v7789_v7 }
 0x162   : > { %11420 = vst [vmem:[#allocation107_spill] sm:$0xff] %v7822_v15  ;;  %v7834_v33 = vsub.f32 %v7733_v5, %v11423_v41  ;;  %v7846_v45 = vsub.f32 %v384_v6, %v7791_v14  ;;  %1845 = vmatprep.subr.mxu0 %v7655_v63  ;;  %v11428_v58 = vand.u32 4294901760, %v7673_v8  ;;  %v2153_v12 = vand.u32 4294901760, %v7803_v39  ;;  %v378_v6 = vld [vmem:[#allocation5 + $0x330] sm:$0xff]  ;;  %v376_v5 = vld [vmem:[#allocation5 + $0x320] sm:$0xff] }
 0x163   : > { %11425 = vst [vmem:[#allocation110_spill] sm:$0xff] %v7839_v27  ;;  %2100 = vmatpush1.msra.mxu1 %v11426_v61  ;;  %v2159_v51 = vand.u32 4294901760, %v7808_v11  ;;  %v7855_v61 = vand.u32 4294901760, %v383_v37  ;;  %v7857_v7 = vand.u32 4294901760, %v381_v52  ;;  %1847 = vmatpush2.msra.mxu0 %v7640_v29  ;;  %v11430_v41 = vand.u32 4294901760, %v7678_v34  ;;  %v272_v29 = vld [vmem:[%s5948_s27 + $0x10] sm:$0xff] }
 0x164   : > { %11427 = vst [vmem:[#allocation111_spill] sm:$0xff] %v7846_v45  ;;  %2106 = vmatprep.subr.mxu1 %v11428_v58  ;;  %v11431_v8 = vand.u32 4294901760, %v7771_v19  ;;  %v7870_v11 = vsub.f32 %v382_v49, %v7822_v15  ;;  %v11433_v39 = vand.u32 4294901760, %v7751_v35  ;;  %1849 = vmatprep.subr.mxu0 %v7661_v10  ;;  %v2165_v34 = vand.u32 4294901760, %v7834_v33 }
 0x165   : > { %11429 = vst [vmem:[#allocation112_spill] sm:$0xff] %v7855_v61  ;;  %2112 = vmatpush2.msra.mxu1 %v11430_v41  ;;  %v7881_v41 = vsub.f32 %v380_v48, %v7836_v13  ;;  %v7886_v49 = vsub.f32 %v7767_v30, %v7811_v36  ;;  %1851 = vmatpush2.msra.mxu0 %v7664_v32  ;;  %v11437_v10 = vand.u32 4294901760, %v7794_v26  ;;  %v11438_v48 = vand.u32 4294901760, %v7765_v54 }
 0x166   : > { %v7867_v58 = vsub.f32 %v7771_v19, %v11431_v8  ;;  %11432 = vst [vmem:[#allocation113_spill] sm:$0xff] %v7870_v11  ;;  %v7875_v63 = vsub.f32 %v7751_v35, %v11433_v39  ;;  %2118 = vmatprep.subr.mxu1 %v2117_v50  ;;  %v379_v8 = vld [vmem:[#allocation5 + $0x338] sm:$0xff]  ;;  %v11436_v39 = vand.u32 4294901760, %v7690_v44  ;;  %v7901_v43 = vand.u32 4294901760, %v378_v6  ;;  %v377_v35 = vld [vmem:[#allocation5 + $0x328] sm:$0xff]  ;;  %1853 = vmatprep.subr.mxu0 %v7718_v38 }
 0x167   : > { %11434 = vst [vmem:[#allocation114_spill] sm:$0xff] %v7881_v41  ;;  %11435 = vst [vmem:[#allocation115_spill] sm:$0xff] %v7886_v49  ;;  %v7894_v50 = vsub.f32 %v7794_v26, %v11437_v10  ;;  %v7899_v33 = vsub.f32 %v7765_v54, %v11438_v48  ;;  %v7903_v30 = vand.u32 4294901760, %v273_v46  ;;  %v11440_v44 = vand.u32 4294901760, %v7730_v60  ;;  %1855 = vmatpush2.msra.mxu0 %v7701_v55 }
 0x168   : > { %2124 = vmatpush2.msra.mxu1 %v11436_v39  ;;  %v7909_v32 = vand.u32 4294901760, %v376_v5  ;;  %v7912_v10 = vsub.f32 %v383_v37, %v7855_v61  ;;  %v7914_v26 = vand.u32 4294901760, %v272_v29  ;;  %v11443_v48 = vand.u32 4294901760, %v7742_v0  ;;  %1857 = vmatprep.subr.mxu0 %v7744_v42  ;;  %v374_v42 = vld [vmem:[#allocation5 + $0x310] sm:$0xff] }
 0x169   : > { %11439 = vst [vmem:[#allocation116_spill] sm:$0xff] %v7903_v30  ;;  %2130 = vmatprep.subr.mxu1 %v11440_v44  ;;  %v2177_v54 = vand.u32 4294901760, %v7867_v58  ;;  %v2183_v38 = vand.u32 4294901760, %v7875_v63  ;;  %v7921_v60 = vand.u32 4294901760, %v379_v8  ;;  %v11444_v37 = vand.u32 4294901760, %v7839_v27  ;;  %1859 = vmatpush2.msra.mxu0 %v7720_v21 }
 0x16a   : > { %11441 = vst [vmem:[#allocation117_spill] sm:$0xff] %v7912_v10  ;;  %11442 = vst [vmem:[#allocation118_spill] sm:$0xff] %v7914_v26  ;;  %2136 = vmatpush2.msra.mxu1 %v11443_v48  ;;  %v7930_v55 = vand.u32 4294901760, %v377_v35  ;;  %v375_v48 = vld [vmem:[#allocation5 + $0x318] sm:$0xff]  ;;  %v7934_v58 = vsub.f32 %v381_v52, %v7857_v7  ;;  %v11447_v63 = vand.u32 4294901760, %v7756_v17  ;;  %v2195_v44 = vand.u32 4294901760, %v7899_v33  ;;  %1861 = vmatprep.subr.mxu0 %v7777_v47 }
 0x16b   : > { %2142 = vmatprep.subr.mxu1 %v2141_v57  ;;  %v7928_v39 = vsub.f32 %v7839_v27, %v11444_v37  ;;  %v2189_v57 = vand.u32 4294901760, %v7894_v50  ;;  %v7942_v37 = vsub.f32 %v378_v6, %v7901_v43  ;;  %v7945_v27 = vsub.f32 %v273_v46, %v7903_v30  ;;  %v373_v33 = vld [vmem:[#allocation5 + $0x308] sm:$0xff]  ;;  %1863 = vmatpush2.msra.mxu0 %v7779_v2 }
 0x16c   : > { %11445 = vst [vmem:[#allocation119_spill] sm:$0xff] %v7930_v55  ;;  %11446 = vst [vmem:[#allocation120_spill] sm:$0xff] %v7934_v58  ;;  %2148 = vmatpush2.msra.mxu1 %v11447_v63  ;;  %v11448_v52 = vand.u32 4294901760, %v7829_v23  ;;  %v7952_v17 = vsub.f32 %v376_v5, %v7909_v32  ;;  %v372_v63 = vld [vmem:[#allocation5 + $0x300] sm:$0xff]  ;;  %v7956_v6 = vsub.f32 %v272_v29, %v7914_v26  ;;  %v11449_v46 = vand.u32 4294901760, %v7846_v45 }
 0x16d   : > { %2154 = vmatprep.subr.mxu1 %v2153_v12  ;;  %v7962_v47 = vand.u32 4294901760, %v375_v48  ;;  %v7966_v5 = vsub.f32 %v379_v8, %v7921_v60  ;;  %1865 = vmatprep.subr.mxu0 %v7811_v36  ;;  %v2201_v29 = vand.u32 4294901760, %v7928_v39  ;;  %v11450_v50 = vand.u32 4294901760, %v7886_v49 }
 0x16e   : > { %v2206_v0 = vsub.f32 %v7829_v23, %v11448_v52  ;;  %2160 = vmatpush2.msra.mxu1 %v2159_v51  ;;  %v2218_v12 = vsub.f32 %v7846_v45, %v11449_v46  ;;  %v7973_v2 = vand.u32 4294901760, %v374_v42  ;;  %1867 = vmatpush2.msra.mxu0 %v7791_v14  ;;  %v11451_v52 = vand.u32 4294901760, %v7819_v25 }
 0x16f   : > { %2166 = vmatprep.subr.mxu1 %v2165_v34  ;;  %v2212_v51 = vsub.f32 %v7886_v49, %v11450_v50  ;;  %v7979_v8 = vand.u32 4294901760, %v373_v33  ;;  %v7981_v21 = vand.u32 4294901760, %v372_v63  ;;  %v7985_v39 = vsub.f32 %v377_v35, %v7930_v55  ;;  %1869 = vmatprep.subr.mxu0 %v7855_v61 }
 0x170   : > { %2172 = vmatpush2.msra.mxu1 %v11451_v52  ;;  %v2207_v50 = vand.u32 4294901760, %v2206_v0  ;;  %v11452_v46 = vand.u32 4294901760, %v7912_v10  ;;  %v10562_v25 = vand.u32 4294901760, %v7881_v41  ;;  %1871 = vmatpush2.msra.mxu0 %v7822_v15  ;;  %v2219_v36 = vand.u32 4294901760, %v2218_v12 }
 0x171   : > { %2178 = vmatprep.subr.mxu1 %v2177_v54  ;;  %v11453_v34 = vand.u32 4294901760, %v7870_v11  ;;  %v7999_v54 = vsub.f32 %v375_v48, %v7962_v47  ;;  %1873 = vmatprep.subr.mxu0 %v7857_v7  ;;  %v2213_v0 = vand.u32 4294901760, %v2212_v51  ;;  %v11454_v52 = vand.u32 4294901760, %v7934_v58 }
 0x172   : > { %v2224_v14 = vsub.f32 %v7912_v10, %v11452_v46  ;;  %2184 = vmatpush2.msra.mxu1 %v2183_v38  ;;  %v8003_v46 = vsub.f32 %v374_v42, %v7973_v2  ;;  %1875 = vmatpush2.msra.mxu0 %v7836_v13  ;;  %v11456_v48 = vand.u32 4294901760, %v7945_v27  ;;  %v8018_v42 = vsub.f32 %v373_v33, %v7979_v8 }
 0x173   : > { %v2230_v35 = vsub.f32 %v7870_v11, %v11453_v34  ;;  %2190 = vmatprep.subr.mxu1 %v2189_v57  ;;  %v2236_v38 = vsub.f32 %v7934_v58, %v11454_v52  ;;  %v8011_v34 = vsub.f32 %v372_v63, %v7981_v21  ;;  %1877 = vmatprep.subr.mxu0 %v7921_v60  ;;  %v11458_v63 = vand.u32 4294901760, %v7956_v6 }
 0x174   : > { %2196 = vmatpush2.msra.mxu1 %v2195_v44  ;;  %v1895_v57 = vsub.f32 %v7945_v27, %v11456_v48  ;;  %11457 = vst [vmem:[#allocation122_spill] sm:$0xff] %v8018_v42  ;;  %v2225_v52 = vand.u32 4294901760, %v2224_v14  ;;  %v2242_v44 = vsub.f32 %v7881_v41, %v10562_v25  ;;  %1879 = vmatpush2.msra.mxu0 %v7901_v43  ;;  %v11459_v33 = vand.u32 4294901760, %v7966_v5 }
 0x175   : > { %11455 = vst [vmem:[#allocation121_spill] sm:$0xff] %v8011_v34  ;;  %2202 = vmatprep.subr.mxu1 %v2201_v29  ;;  %v1901_v12 = vsub.f32 %v7956_v6, %v11458_v63  ;;  %v2231_v48 = vand.u32 4294901760, %v2230_v35  ;;  %1881 = vmatprep.subr.mxu0 %v7930_v55  ;;  %v2237_v29 = vand.u32 4294901760, %v2236_v38  ;;  %v11460_v25 = vand.u32 4294901760, %v7942_v37 }
 0x176   : > { %2208 = vmatpush2.msra.mxu1 %v2207_v50  ;;  %v2248_v51 = vsub.f32 %v7966_v5, %v11459_v33  ;;  %1883 = vmatpush2.msra.mxu0 %v7909_v32  ;;  %v1896_v50 = vand.u32 4294901760, %v1895_v57  ;;  %v11461_v35 = vand.u32 4294901760, %v7985_v39  ;;  %v10566_v14 = vand.u32 4294901760, %v8018_v42 }
 0x177   : > { %2214 = vmatprep.subr.mxu1 %v2213_v0  ;;  %v2254_v63 = vsub.f32 %v7942_v37, %v11460_v25  ;;  %1885 = vmatprep.subr.mxu0 %v7962_v47  ;;  %v2243_v0 = vand.u32 4294901760, %v2242_v44  ;;  %v1902_v38 = vand.u32 4294901760, %v1901_v12  ;;  %v11462_v55 = vand.u32 4294901760, %v7952_v17 }
 0x178   : > { %2220 = vmatpush2.msra.mxu1 %v2219_v36  ;;  %v2260_v33 = vsub.f32 %v7985_v39, %v11461_v35  ;;  %v10565_v61 = vand.u32 4294901760, %v8011_v34  ;;  %1887 = vmatpush2.msra.mxu0 %v7973_v2  ;;  %v2249_v36 = vand.u32 4294901760, %v2248_v51  ;;  %v11463_v57 = vand.u32 4294901760, %v7999_v54 }
 0x179   : > { %2226 = vmatprep.subr.mxu1 %v2225_v52  ;;  %v2266_v25 = vsub.f32 %v7952_v17, %v11462_v55  ;;  %1889 = vmatprep.subr.mxu0 %v7979_v8  ;;  %v2255_v52 = vand.u32 4294901760, %v2254_v63  ;;  %v11464_v12 = vand.u32 4294901760, %v8003_v46  ;;  %v2284_v51 = vsub.f32 %v8018_v42, %v10566_v14  ;;  %v11482_v14 = vld [vmem:[#allocation38_spill] sm:$0xff] }
 0x17a   : > { %2232 = vmatpush2.msra.mxu1 %v2231_v48  ;;  %v2272_v35 = vsub.f32 %v7999_v54, %v11463_v57  ;;  %1891 = vmatpush2.msra.mxu0 %v7981_v21  ;;  %v2261_v55 = vand.u32 4294901760, %v2260_v33  ;;  %v11465_v33 = vld [vmem:[#allocation14_spill] sm:$0xff] }
 0x17b   : > { %2238 = vmatprep.subr.mxu1 %v2237_v29  ;;  %v2278_v44 = vsub.f32 %v8003_v46, %v11464_v12  ;;  %1897 = vmatprep.mubr.f32.mxu0 %v1896_v50  ;;  %v2267_v48 = vand.u32 4294901760, %v2266_v25  ;;  %v2290_v29 = vsub.f32 %v8011_v34, %v10565_v61  ;;  %v2285_v57 = vand.u32 4294901760, %v2284_v51  ;;  %v11467_v25 = vld [vmem:[#allocation57_spill] sm:$0xff]  ;;  %v11471_v12 = vld [vmem:[#allocation75_spill] sm:$0xff]  ;;  %v11481_v61 = vld [vmem:[#allocation40_spill] sm:$0xff] }
 0x17c   : > { %2244 = vmatpush2.msra.mxu1 %v2243_v0  ;;  %1903 = vmatmul.mubr.f32.vlgmr.msra.gmra.mxu0 %v1902_v38  ;;  %v2273_v63 = vand.u32 4294901760, %v2272_v35  ;;  %v11466_v0 = vld [vmem:[#allocation49_spill] sm:$0xff]  ;;  %v11469_v35 = vld [vmem:[#allocation67_spill] sm:$0xff] }
 0x17d   : > { %2250 = vmatprep.subr.mxu1 %v2249_v36  ;;  %2304 = vmatprep.subr.mxu0 %v7107_v16  ;;  %v2279_v50 = vand.u32 4294901760, %v2278_v44  ;;  %v2291_v38 = vand.u32 4294901760, %v2290_v29  ;;  %v11468_v36 = vld [vmem:[#allocation59_spill] sm:$0xff]  ;;  %v11472_v44 = vld [vmem:[#allocation12_spill] sm:$0xff]  ;;  %v11474_v51 = vld [vmem:[#allocation89_spill] sm:$0xff] }
 0x17e   : > { %2256 = vmatpush2.msra.mxu1 %v2255_v52  ;;  %2307 = vmatpush1.msra.mxu0 %v7113_v22  ;;  %v11470_v52 = vld [vmem:[#allocation69_spill] sm:$0xff]  ;;  %v11476_v29 = vld [vmem:[#allocation30_spill] sm:$0xff] }
 0x17f   : > { %2262 = vmatprep.subr.mxu1 %v2261_v55  ;;  %2310 = vmatprep.subr.mxu0 %v11465_v33  ;;  %v11473_v55 = vld [vmem:[#allocation73_spill] sm:$0xff] }
 0x180   : > { %2268 = vmatpush2.msra.mxu1 %v2267_v48  ;;  %2313 = vmatpush1.msra.mxu0 %v11466_v0  ;;  %v11475_v48 = vld [vmem:[#allocation79_spill] sm:$0xff] }
 0x181   : > { %2274 = vmatprep.subr.mxu1 %v2273_v63  ;;  %2316 = vmatprep.subr.mxu0 %v11467_v25  ;;  %v11477_v63 = vld [vmem:[#allocation15_spill] sm:$0xff] }
 0x182   : > { %2280 = vmatpush2.msra.mxu1 %v2279_v50  ;;  %2319 = vmatpush1.msra.mxu0 %v11468_v36  ;;  %v11478_v50 = vld [vmem:[#allocation13_spill] sm:$0xff] }
 0x183   : > { %2286 = vmatprep.subr.mxu1 %v2285_v57  ;;  %2322 = vmatprep.subr.mxu0 %v11469_v35  ;;  %v11479_v57 = vld [vmem:[#allocation93_spill] sm:$0xff] }
 0x184   : > { %2292 = vmatpush2.msra.mxu1 %v2291_v38  ;;  %2294 = vmatprep.mubr.f32.mxu1 %v7903_v30  ;;  %v11480_v38 = vld [vmem:[#allocation32_spill] sm:$0xff]  ;;  %v11484_v30 = vld [vmem:[#allocation42_spill] sm:$0xff] }
 0x185   : > { %2325 = vmatpush1.msra.mxu0 %v11470_v52  ;;  %2296 = vmatmul.mubr.f32.vlgmr.msra.gmra.mxu1 %v7914_v26  ;;  %v11483_v26 = vld [vmem:[#allocation55_spill] sm:$0xff] }
 0x186   : > { %2328 = vmatprep.subr.mxu0 %v11471_v12  ;;  %2506 = vmatprep.subr.mxu1 %v11472_v44 }
 0x187   : > { %2331 = vmatpush1.msra.mxu0 %v11473_v55  ;;  %2508 = vmatpush1.msra.mxu1 %v7091_v31 }
 0x188   : > { %2334 = vmatprep.subr.mxu0 %v11474_v51  ;;  %2510 = vmatprep.subr.mxu1 %v7099_v4 }
 0x189   : > { %2337 = vmatpush1.msra.mxu0 %v11475_v48  ;;  %2512 = vmatpush1.msra.mxu1 %v11476_v29  ;;  %v11485_v48 = vld [vmem:[#allocation61_spill] sm:$0xff]  ;;  %v11486_v29 = vld [vmem:[#allocation19_spill] sm:$0xff] }
 0x18a   : > { %2340 = vmatprep.subr.mxu0 %v11477_v63  ;;  %2514 = vmatprep.subr.mxu1 %v11478_v50  ;;  %v11487_v50 = vld [vmem:[#allocation48_spill] sm:$0xff] }
 0x18b   : > { %2343 = vmatpush1.msra.mxu0 %v11479_v57  ;;  %2516 = vmatpush1.msra.mxu1 %v11480_v38  ;;  %v11488_v57 = vld [vmem:[#allocation71_spill] sm:$0xff]  ;;  %v11489_v38 = vld [vmem:[#allocation46_spill] sm:$0xff] }
 0x18c   : > { %2346 = vmatprep.subr.mxu0 %v11481_v61  ;;  %2518 = vmatprep.subr.mxu1 %v7134_v62  ;;  %v11490_v61 = vld [vmem:[#allocation65_spill] sm:$0xff]  ;;  %v11491_v62 = vld [vmem:[#allocation50_spill] sm:$0xff] }
 0x18d   : > { %2349 = vmatpush1.msra.mxu0 %v11482_v14  ;;  %2520 = vmatpush1.msra.mxu1 %v11483_v26  ;;  %v11492_v26 = vld [vmem:[#allocation23_spill] sm:$0xff] }
 0x18e   : > { %2352 = vmatprep.subr.mxu0 %v11484_v30  ;;  %2522 = vmatprep.subr.mxu1 %v11485_v48  ;;  %v11493_v48 = vld [vmem:[#allocation26_spill] sm:$0xff] }
 0x18f   : > { %2355 = vmatpush1.msra.mxu0 %v11486_v29  ;;  %2524 = vmatpush1.msra.mxu1 %v7154_v3  ;;  %v11494_v29 = vld [vmem:[#allocation34_spill] sm:$0xff] }
 0x190   : > { %2358 = vmatprep.subr.mxu0 %v11487_v50  ;;  %2526 = vmatprep.subr.mxu1 %v11488_v57  ;;  %v11495_v3 = vld [vmem:[#allocation54_spill] sm:$0xff]  ;;  %v11496_v50 = vld [vmem:[#allocation91_spill] sm:$0xff] }
 0x191   : > { %2361 = vmatpush1.msra.mxu0 %v11489_v38  ;;  %2528 = vmatpush1.msra.mxu1 %v11490_v61  ;;  %v11497_v57 = vld [vmem:[#allocation27_spill] sm:$0xff]  ;;  %v11498_v38 = vld [vmem:[#allocation36_spill] sm:$0xff]  ;;  %v11499_v61 = vld [vmem:[#allocation58_spill] sm:$0xff] }
 0x192   : > { %2364 = vmatprep.subr.mxu0 %v11491_v62  ;;  %2530 = vmatprep.subr.mxu1 %v7206_v9  ;;  %v11500_v62 = vld [vmem:[#allocation16_spill] sm:$0xff] }
 0x193   : > { %2367 = vmatpush1.msra.mxu0 %v11492_v26  ;;  %2532 = vmatpush1.msra.mxu1 %v7208_v28  ;;  %v11501_v26 = vld [vmem:[#allocation18_spill] sm:$0xff] }
 0x194   : > { %2370 = vmatprep.subr.mxu0 %v11493_v48  ;;  %2534 = vmatprep.subr.mxu1 %v11494_v29  ;;  %v11502_v28 = vld [vmem:[#allocation62_spill] sm:$0xff]  ;;  %v11503_v48 = vld [vmem:[#allocation17_spill] sm:$0xff] }
 0x195   : > { %2373 = vmatpush1.msra.mxu0 %v11495_v3  ;;  %2536 = vmatpush1.msra.mxu1 %v11496_v50  ;;  %v11504_v29 = vld [vmem:[#allocation33_spill] sm:$0xff]  ;;  %v11505_v3 = vld [vmem:[#allocation44_spill] sm:$0xff]  ;;  %v11506_v50 = vld [vmem:[#allocation66_spill] sm:$0xff] }
 0x196   : > { %2376 = vmatprep.subr.mxu0 %v11497_v57  ;;  %2538 = vmatprep.subr.mxu1 %v11498_v38  ;;  %v11507_v57 = vld [vmem:[#allocation20_spill] sm:$0xff] }
 0x197   : > { %2379 = vmatpush1.msra.mxu0 %v11499_v61  ;;  %2540 = vmatpush1.msra.mxu1 %v11500_v62  ;;  %v11508_v61 = vld [vmem:[#allocation22_spill] sm:$0xff]  ;;  %v11509_v62 = vld [vmem:[#allocation35_spill] sm:$0xff] }
 0x198   : > { %2382 = vmatprep.subr.mxu0 %v7489_v24  ;;  %2542 = vmatprep.subr.mxu1 %v11501_v26  ;;  %v11510_v24 = vld [vmem:[#allocation21_spill] sm:$0xff] }
 0x199   : > { %2385 = vmatpush1.msra.mxu0 %v11502_v28  ;;  %2544 = vmatpush1.msra.mxu1 %v11503_v48  ;;  %v11511_v28 = vld [vmem:[#allocation52_spill] sm:$0xff] }
 0x19a   : > { %2388 = vmatprep.subr.mxu0 %v11504_v29  ;;  %2546 = vmatprep.subr.mxu1 %v11505_v3  ;;  %v11512_v29 = vld [vmem:[#allocation24_spill] sm:$0xff] }
 0x19b   : > { %2391 = vmatpush1.msra.mxu0 %v11506_v50  ;;  %2548 = vmatpush1.msra.mxu1 %v11507_v57  ;;  %v11513_v50 = vld [vmem:[#allocation56_spill] sm:$0xff] }
 0x19c   : > { %2394 = vmatprep.subr.mxu0 %v7552_v20  ;;  %2550 = vmatprep.subr.mxu1 %v11508_v61  ;;  %v11514_v20 = vld [vmem:[#allocation25_spill] sm:$0xff]  ;;  %v11515_v61 = vld [vmem:[#allocation82_spill] sm:$0xff] }
 0x19d   : > { %2397 = vmatpush1.msra.mxu0 %v11509_v62  ;;  %2552 = vmatpush1.msra.mxu1 %v11510_v24  ;;  %v11516_v62 = vld [vmem:[#allocation60_spill] sm:$0xff] }
 0x19e   : > { %2400 = vmatprep.subr.mxu0 %v7577_v18  ;;  %2554 = vmatprep.subr.mxu1 %v11511_v28  ;;  %v11517_v18 = vld [vmem:[#allocation28_spill] sm:$0xff] }
 0x19f   : > { %2403 = vmatpush2.msra.mxu0 %v7559_v1  ;;  %2556 = vmatpush1.msra.mxu1 %v11512_v29  ;;  %v11518_v1 = vld [vmem:[#allocation64_spill] sm:$0xff]  ;;  %v11519_v29 = vld [vmem:[#allocation86_spill] sm:$0xff] }
 0x1a0   : > { %2406 = vmatprep.subr.mxu0 %v7618_v40  ;;  %2558 = vmatprep.subr.mxu1 %v11513_v50  ;;  %v11520_v40 = vld [vmem:[#allocation29_spill] sm:$0xff]  ;;  %v11521_v50 = vld [vmem:[#allocation96_spill] sm:$0xff] }
 0x1a1   : > { %2409 = vmatpush2.msra.mxu0 %v7589_v53  ;;  %2560 = vmatpush1.msra.mxu1 %v11514_v20  ;;  %v11522_v53 = vld [vmem:[#allocation70_spill] sm:$0xff]  ;;  %v11523_v20 = vld [vmem:[#allocation92_spill] sm:$0xff] }
 0x1a2   : > { %2412 = vmatprep.subr.mxu0 %v11515_v61  ;;  %2562 = vmatprep.subr.mxu1 %v11516_v62  ;;  %v11524_v61 = vld [vmem:[#allocation68_spill] sm:$0xff]  ;;  %v11525_v62 = vld [vmem:[#allocation102_spill] sm:$0xff] }
 0x1a3   : > { %2415 = vmatpush2.msra.mxu0 %v7638_v59  ;;  %2564 = vmatpush1.msra.mxu1 %v11517_v18  ;;  %v11526_v59 = vld [vmem:[#allocation72_spill] sm:$0xff]  ;;  %v11527_v18 = vld [vmem:[#allocation97_spill] sm:$0xff] }
 0x1a4   : > { %2418 = vmatprep.subr.mxu0 %v7695_v56  ;;  %2566 = vmatprep.subr.mxu1 %v11518_v1  ;;  %v11528_v56 = vld [vmem:[#allocation37_spill] sm:$0xff] }
 0x1a5   : > { %2421 = vmatpush2.msra.mxu0 %v11519_v29  ;;  %2568 = vmatpush1.msra.mxu1 %v11520_v40  ;;  %v11529_v29 = vld [vmem:[#allocation41_spill] sm:$0xff]  ;;  %v11530_v40 = vld [vmem:[#allocation104_spill] sm:$0xff] }
 0x1a6   : > { %2424 = vmatprep.subr.mxu0 %v11521_v50  ;;  %2570 = vmatprep.subr.mxu1 %v11522_v53  ;;  %v11531_v50 = vld [vmem:[#allocation78_spill] sm:$0xff]  ;;  %v11532_v53 = vld [vmem:[#allocation85_spill] sm:$0xff] }
 0x1a7   : > { %2427 = vmatpush2.msra.mxu0 %v11523_v20  ;;  %2572 = vmatpush2.msra.mxu1 %v11524_v61  ;;  %v11533_v20 = vld [vmem:[#allocation80_spill] sm:$0xff]  ;;  %v11534_v61 = vld [vmem:[#allocation81_spill] sm:$0xff] }
 0x1a8   : > { %2430 = vmatprep.subr.mxu0 %v11525_v62  ;;  %2574 = vmatprep.subr.mxu1 %v11526_v59  ;;  %v11535_v62 = vld [vmem:[#allocation45_spill] sm:$0xff]  ;;  %v11536_v59 = vld [vmem:[#allocation110_spill] sm:$0xff] }
 0x1a9   : > { %2433 = vmatpush2.msra.mxu0 %v11527_v18  ;;  %2576 = vmatpush2.msra.mxu1 %v11528_v56  ;;  %v11537_v18 = vld [vmem:[#allocation87_spill] sm:$0xff] }
 0x1aa   : > { %2436 = vmatprep.subr.mxu0 %v7771_v19  ;;  %2578 = vmatprep.subr.mxu1 %v11529_v29  ;;  %v11538_v19 = vld [vmem:[#allocation51_spill] sm:$0xff] }
 0x1ab   : > { %2439 = vmatpush2.msra.mxu0 %v11530_v40  ;;  %2580 = vmatpush2.msra.mxu1 %v11531_v50  ;;  %v11539_v40 = vld [vmem:[#allocation88_spill] sm:$0xff] }
 0x1ac   : > { %2442 = vmatprep.subr.mxu0 %v11532_v53  ;;  %2582 = vmatprep.subr.mxu1 %v11533_v20  ;;  %v11540_v53 = vld [vmem:[#allocation90_spill] sm:$0xff] }
 0x1ad   : > { %2445 = vmatpush2.msra.mxu0 %v11534_v61  ;;  %2584 = vmatpush2.msra.mxu1 %v11535_v62  ;;  %v11541_v61 = vld [vmem:[#allocation99_spill] sm:$0xff] }
 0x1ae   : > { %2448 = vmatprep.subr.mxu0 %v11536_v59  ;;  %2586 = vmatprep.subr.mxu1 %v11537_v18  ;;  %v11542_v59 = vld [vmem:[#allocation95_spill] sm:$0xff] }
 0x1af   : > { %2451 = vmatpush2.msra.mxu0 %v7829_v23  ;;  %2588 = vmatpush2.msra.mxu1 %v11538_v19  ;;  %v11543_v23 = vld [vmem:[#allocation103_spill] sm:$0xff] }
 0x1b0   : > { %2454 = vmatprep.subr.mxu0 %v7886_v49  ;;  %2590 = vmatprep.subr.mxu1 %v11539_v40  ;;  %v11544_v49 = vld [vmem:[#allocation101_spill] sm:$0xff] }
 0x1b1   : > { %2457 = vmatpush2.msra.mxu0 %v7846_v45  ;;  %2592 = vmatpush2.msra.mxu1 %v11540_v53  ;;  %v11545_v45 = vld [vmem:[#allocation83_spill] sm:$0xff] }
 0x1b2   : > { %2460 = vmatprep.subr.mxu0 %v7912_v10  ;;  %2594 = vmatprep.subr.mxu1 %v11541_v61  ;;  %v11546_v10 = vld [vmem:[#allocation106_spill] sm:$0xff] }
 0x1b3   : > { %2463 = vmatpush2.msra.mxu0 %v7870_v11  ;;  %2596 = vmatpush2.msra.mxu1 %v11542_v59  ;;  %v11547_v11 = vld [vmem:[#allocation100_spill] sm:$0xff] }
 0x1b4   : > { %2466 = vmatprep.subr.mxu0 %v7934_v58  ;;  %2598 = vmatprep.subr.mxu1 %v11543_v23  ;;  %v11548_v58 = vld [vmem:[#allocation98_spill] sm:$0xff] }
 0x1b5   : > { %2469 = vmatpush2.msra.mxu0 %v7881_v41  ;;  %2600 = vmatpush2.msra.mxu1 %v11544_v49  ;;  %v11549_v41 = vld [vmem:[#allocation112_spill] sm:$0xff] }
 0x1b6   : > { %2472 = vmatprep.subr.mxu0 %v7966_v5  ;;  %2602 = vmatprep.subr.mxu1 %v11545_v45 }
 0x1b7   : > { %2475 = vmatpush2.msra.mxu0 %v7942_v37  ;;  %2604 = vmatpush2.msra.mxu1 %v11546_v10 }
 0x1b8   : > { %2478 = vmatprep.subr.mxu0 %v7985_v39  ;;  %2606 = vmatprep.subr.mxu1 %v11547_v11 }
 0x1b9   : > { %2481 = vmatpush2.msra.mxu0 %v7952_v17  ;;  %2608 = vmatpush2.msra.mxu1 %v11548_v58 }
 0x1ba   : > { %2484 = vmatprep.subr.mxu0 %v7999_v54  ;;  %2610 = vmatprep.subr.mxu1 %v11549_v41  ;;  %v11550_v41 = vand.u32 4294901760, %v7107_v16  ;;  %v11555_v16 = vand.u32 4294901760, %v11467_v25  ;;  %v11563_v25 = vand.u32 4294901760, %v11474_v51 }
 0x1bb   : > { %2487 = vmatpush2.msra.mxu0 %v8003_v46  ;;  %2612 = vmatpush2.msra.mxu1 %v7822_v15  ;;  %v11551_v15 = vand.u32 4294901760, %v7113_v22  ;;  %v11556_v22 = vand.u32 4294901760, %v11468_v36 }
 0x1bc   : > { %2490 = vmatprep.subr.mxu0 %v8018_v42  ;;  %2614 = vmatprep.subr.mxu1 %v7857_v7  ;;  %v11552_v42 = vld [vmem:[#allocation119_spill] sm:$0xff] }
 0x1bd   : > { %2493 = vmatpush2.msra.mxu0 %v8011_v34  ;;  %2496 = vmatprep.mubr.f32.mxu0 %v7945_v27  ;;  %v11553_v34 = vand.u32 4294901760, %v11465_v33  ;;  %v11561_v33 = vand.u32 4294901760, %v11471_v12  ;;  %v11569_v12 = vld [vmem:[#allocation93_spill] sm:$0xff] }
 0x1be   : > { %2616 = vmatpush2.msra.mxu1 %v7836_v13  ;;  %2499 = vmatmul.mubr.f32.vlgmr.msra.gmra.mxu0 %v7956_v6  ;;  %v11554_v13 = vand.u32 4294901760, %v11466_v0  ;;  %v11562_v0 = vand.u32 4294901760, %v11473_v55  ;;  %v11571_v55 = vld [vmem:[#allocation32_spill] sm:$0xff] }
 0x1bf   : > { %2618 = vmatprep.subr.mxu1 %v7921_v60  ;;  %2649 = vmatprep.subr.mxu0 %v11550_v41  ;;  %v11558_v41 = vand.u32 4294901760, %v7945_v27  ;;  %v11564_v27 = vld [vmem:[#allocation79_spill] sm:$0xff] }
 0x1c0   : > { %2620 = vmatpush2.msra.mxu1 %v7901_v43  ;;  %2653 = vmatpush1.msra.mxu0 %v11551_v15  ;;  %v11557_v15 = vand.u32 4294901760, %v11469_v35  ;;  %v11565_v36 = vand.u32 4294901760, %v11564_v27  ;;  %v11567_v35 = vand.u32 4294901760, %v11477_v63  ;;  %v11577_v63 = vand.u32 4294901760, %v11484_v30  ;;  %v11585_v27 = vld [vmem:[#allocation46_spill] sm:$0xff] }
 0x1c1   : > { %2622 = vmatprep.subr.mxu1 %v11552_v42  ;;  %2657 = vmatprep.subr.mxu0 %v11553_v34  ;;  %v11560_v34 = vand.u32 4294901760, %v7956_v6  ;;  %v11566_v6 = vld [vmem:[#allocation30_spill] sm:$0xff] }
 0x1c2   : > { %2624 = vmatpush2.msra.mxu1 %v7909_v32  ;;  %2661 = vmatpush1.msra.mxu0 %v11554_v13  ;;  %v11559_v13 = vand.u32 4294901760, %v11470_v52  ;;  %v11568_v52 = vld [vmem:[#allocation13_spill] sm:$0xff] }
 0x1c3   : > { %2626 = vmatprep.subr.mxu1 %v7962_v47  ;;  %2665 = vmatprep.subr.mxu0 %v11555_v16  ;;  %v11574_v16 = vld [vmem:[#allocation53_spill] sm:$0xff] }
 0x1c4   : > { %2628 = vmatpush2.msra.mxu1 %v7973_v2  ;;  %2669 = vmatpush1.msra.mxu0 %v11556_v22  ;;  %v11576_v22 = vld [vmem:[#allocation55_spill] sm:$0xff] }
 0x1c5   : > { %2630 = vmatprep.subr.mxu1 %v7979_v8  ;;  %2673 = vmatprep.subr.mxu0 %v11557_v15  ;;  %v11578_v15 = vld [vmem:[#allocation61_spill] sm:$0xff] }
 0x1c6   : > { %2632 = vmatpush2.msra.mxu1 %v7981_v21  ;;  %2636 = vmatprep.mubr.f32.mxu1 %v11558_v41  ;;  %v11579_v41 = vld [vmem:[#allocation19_spill] sm:$0xff] }
 0x1c7   : > { %2677 = vmatpush1.msra.mxu0 %v11559_v13  ;;  %2640 = vmatmul.mubr.f32.vlgmr.msra.gmra.mxu1 %v11560_v34  ;;  %v11580_v13 = vand.u32 4294901760, %v11579_v41  ;;  %v11581_v34 = vld [vmem:[#allocation63_spill] sm:$0xff]  ;;  %v11603_v41 = vld [vmem:[#allocation16_spill] sm:$0xff] }
 0x1c8   : > { %2681 = vmatprep.subr.mxu0 %v11561_v33  ;;  %2912 = vmatprep.subr.mxu1 %v11472_v44  ;;  %v11570_v44 = vand.u32 4294901760, %v11569_v12  ;;  %v11582_v33 = vld [vmem:[#allocation48_spill] sm:$0xff]  ;;  %v11592_v12 = vld [vmem:[#allocation77_spill] sm:$0xff] }
 0x1c9   : > { %2685 = vmatpush1.msra.mxu0 %v11562_v0  ;;  %2914 = vmatpush1.msra.mxu1 %v7091_v31  ;;  %v11572_v31 = vld [vmem:[#allocation40_spill] sm:$0xff]  ;;  %v11583_v0 = vand.u32 4294901760, %v11582_v33  ;;  %v11606_v33 = vld [vmem:[#allocation62_spill] sm:$0xff] }
 0x1ca   : > { %2689 = vmatprep.subr.mxu0 %v11563_v25  ;;  %2916 = vmatprep.subr.mxu1 %v7099_v4  ;;  %v11573_v51 = vand.u32 4294901760, %v11572_v31  ;;  %v11575_v4 = vand.u32 4294901760, %v11482_v14  ;;  %v11584_v25 = vld [vmem:[#allocation71_spill] sm:$0xff]  ;;  %v11586_v14 = vand.u32 4294901760, %v11585_v27  ;;  %v11595_v31 = vld [vmem:[#allocation34_spill] sm:$0xff] }
 0x1cb   : > { %2693 = vmatpush1.msra.mxu0 %v11565_v36  ;;  %2918 = vmatpush1.msra.mxu1 %v11566_v6  ;;  %v11587_v36 = vld [vmem:[#allocation65_spill] sm:$0xff]  ;;  %v11588_v6 = vld [vmem:[#allocation50_spill] sm:$0xff] }
 0x1cc   : > { %2697 = vmatprep.subr.mxu0 %v11567_v35  ;;  %2920 = vmatprep.subr.mxu1 %v11568_v52  ;;  %v11589_v30 = vand.u32 4294901760, %v11588_v6  ;;  %v11590_v35 = vld [vmem:[#allocation23_spill] sm:$0xff] }
 0x1cd   : > { %2701 = vmatpush1.msra.mxu0 %v11570_v44  ;;  %2922 = vmatpush1.msra.mxu1 %v11571_v55  ;;  %v11591_v52 = vand.u32 4294901760, %v11590_v35  ;;  %v11593_v44 = vld [vmem:[#allocation26_spill] sm:$0xff] }
 0x1ce   : > { %2705 = vmatprep.subr.mxu0 %v11573_v51  ;;  %2924 = vmatprep.subr.mxu1 %v11574_v16  ;;  %v11594_v55 = vand.u32 4294901760, %v11593_v44  ;;  %v11596_v51 = vld [vmem:[#allocation54_spill] sm:$0xff]  ;;  %v11621_v44 = vld [vmem:[#allocation24_spill] sm:$0xff] }
 0x1cf   : > { %2709 = vmatpush1.msra.mxu0 %v11575_v4  ;;  %2926 = vmatpush1.msra.mxu1 %v11576_v22  ;;  %v11597_v16 = vand.u32 4294901760, %v11596_v51  ;;  %v11598_v4 = vld [vmem:[#allocation91_spill] sm:$0xff] }
 0x1d0   : > { %2713 = vmatprep.subr.mxu0 %v11577_v63  ;;  %2928 = vmatprep.subr.mxu1 %v11578_v15  ;;  %v11599_v22 = vld [vmem:[#allocation27_spill] sm:$0xff] }
 0x1d1   : > { %2717 = vmatpush1.msra.mxu0 %v11580_v13  ;;  %2930 = vmatpush1.msra.mxu1 %v11581_v34  ;;  %v11600_v63 = vand.u32 4294901760, %v11599_v22  ;;  %v11604_v13 = vld [vmem:[#allocation31_spill] sm:$0xff] }
 0x1d2   : > { %2721 = vmatprep.subr.mxu0 %v11583_v0  ;;  %2932 = vmatprep.subr.mxu1 %v11584_v25  ;;  %v11605_v34 = vand.u32 4294901760, %v11604_v13  ;;  %v11607_v0 = vand.u32 4294901760, %v11606_v33  ;;  %v11608_v25 = vld [vmem:[#allocation33_spill] sm:$0xff]  ;;  %v11625_v51 = vld [vmem:[#allocation43_spill] sm:$0xff]  ;;  %v434_v13 = vld [vmem:[#allocation5 + $0x4f0] sm:$0xff] }
 0x1d3   : > { %2725 = vmatpush1.msra.mxu0 %v11586_v14  ;;  %2934 = vmatpush1.msra.mxu1 %v11587_v36  ;;  %v11609_v27 = vand.u32 4294901760, %v11608_v25  ;;  %v11612_v36 = vld [vmem:[#allocation39_spill] sm:$0xff] }
 0x1d4   : > { %2729 = vmatprep.subr.mxu0 %v11589_v30  ;;  %2936 = vmatprep.subr.mxu1 %v7206_v9  ;;  %v11601_v9 = vld [vmem:[#allocation58_spill] sm:$0xff]  ;;  %v11613_v6 = vand.u32 4294901760, %v11612_v36  ;;  %v11640_v36 = vld [vmem:[#allocation96_spill] sm:$0xff] }
 0x1d5   : > { %2733 = vmatpush1.msra.mxu0 %v11591_v52  ;;  %2938 = vmatpush1.msra.mxu1 %v11592_v12  ;;  %v11602_v15 = vand.u32 4294901760, %v11601_v9  ;;  %v11614_v30 = vld [vmem:[#allocation22_spill] sm:$0xff]  ;;  %v11631_v9 = vld [vmem:[#allocation84_spill] sm:$0xff] }
 0x1d6   : > { %2737 = vmatprep.subr.mxu0 %v11594_v55  ;;  %2940 = vmatprep.subr.mxu1 %v11595_v31  ;;  %v11624_v31 = vld [vmem:[#allocation56_spill] sm:$0xff] }
 0x1d7   : > { %2741 = vmatpush1.msra.mxu0 %v11597_v16  ;;  %2942 = vmatpush1.msra.mxu1 %v11598_v4  ;;  %v11626_v16 = vand.u32 4294901760, %v11625_v51  ;;  %v11627_v4 = vld [vmem:[#allocation25_spill] sm:$0xff] }
 0x1d8   : > { %2745 = vmatprep.subr.mxu0 %v11600_v63  ;;  %2944 = vmatprep.subr.mxu1 %v11498_v38  ;;  %v11610_v38 = vld [vmem:[#allocation66_spill] sm:$0xff]  ;;  %v11630_v63 = vld [vmem:[#allocation60_spill] sm:$0xff]  ;;  %v11651_v51 = vld [vmem:[#allocation97_spill] sm:$0xff] }
 0x1d9   : > { %2749 = vmatpush1.msra.mxu0 %v11602_v15  ;;  %2946 = vmatpush1.msra.mxu1 %v11603_v41  ;;  %v11611_v14 = vand.u32 4294901760, %v11610_v38  ;;  %v11632_v15 = vand.u32 4294901760, %v11631_v9  ;;  %v11633_v41 = vld [vmem:[#allocation28_spill] sm:$0xff] }
 0x1da   : > { %2753 = vmatprep.subr.mxu0 %v11605_v34  ;;  %2948 = vmatprep.subr.mxu1 %v11501_v26  ;;  %v11615_v26 = vld [vmem:[#allocation35_spill] sm:$0xff]  ;;  %v11634_v34 = vld [vmem:[#allocation94_spill] sm:$0xff] }
 0x1db   : > { %2757 = vmatpush1.msra.mxu0 %v11607_v0  ;;  %2950 = vmatpush1.msra.mxu1 %v11503_v48  ;;  %v11616_v35 = vand.u32 4294901760, %v11615_v26  ;;  %v11617_v48 = vld [vmem:[#allocation76_spill] sm:$0xff]  ;;  %v11635_v33 = vand.u32 4294901760, %v11634_v34  ;;  %v11636_v0 = vld [vmem:[#allocation86_spill] sm:$0xff]  ;;  %v8316_v26 = vand.u32 4294901760, %v434_v13 }
 0x1dc   : > { %2761 = vmatprep.subr.mxu0 %v11609_v27  ;;  %2952 = vmatprep.subr.mxu1 %v11505_v3  ;;  %v11618_v52 = vand.u32 4294901760, %v11617_v48  ;;  %v11619_v3 = vld [vmem:[#allocation74_spill] sm:$0xff]  ;;  %v11637_v25 = vand.u32 4294901760, %v11636_v0  ;;  %v11638_v27 = vld [vmem:[#allocation29_spill] sm:$0xff]  ;;  %v11644_v48 = vld [vmem:[#allocation92_spill] sm:$0xff] }
 0x1dd   : > { %2765 = vmatpush1.msra.mxu0 %v11611_v14  ;;  %2954 = vmatpush1.msra.mxu1 %v11507_v57  ;;  %v11620_v12 = vand.u32 4294901760, %v11619_v3  ;;  %v11622_v57 = vld [vmem:[#allocation47_spill] sm:$0xff]  ;;  %11643 = vst [vmem:[#allocation49_spill] sm:$0xff] %v8316_v26  ;;  %v431_v3 = vld [vmem:[#allocation5 + $0x4d8] sm:$0xff]  ;;  %v11657_v34 = vld [vmem:[#allocation104_spill] sm:$0xff] }
 0x1de   : > { %2769 = vmatprep.subr.mxu0 %v11613_v6  ;;  %2956 = vmatprep.subr.mxu1 %v11614_v30  ;;  %v11623_v55 = vand.u32 4294901760, %v11622_v57  ;;  %v433_v14 = vld [vmem:[#allocation5 + $0x4e8] sm:$0xff]  ;;  %v11641_v6 = vand.u32 4294901760, %v11640_v36  ;;  %v11642_v30 = vld [vmem:[#allocation70_spill] sm:$0xff]  ;;  %v11649_v57 = vld [vmem:[#allocation72_spill] sm:$0xff] }
 0x1df   : > { %2773 = vmatpush1.msra.mxu0 %v11616_v35  ;;  %2958 = vmatpush1.msra.mxu1 %v11510_v24  ;;  %v11628_v24 = vld [vmem:[#allocation82_spill] sm:$0xff] }
 0x1e0   : > { %2777 = vmatprep.subr.mxu0 %v11618_v52  ;;  %2960 = vmatprep.subr.mxu1 %v11511_v28  ;;  %v11629_v22 = vand.u32 4294901760, %v11628_v24  ;;  %v435_v28 = vld [vmem:[#allocation5 + $0x4f8] sm:$0xff]  ;;  %v432_v35 = vld [vmem:[#allocation5 + $0x4e0] sm:$0xff]  ;;  %v11645_v52 = vand.u32 4294901760, %v11644_v48  ;;  %v429_v24 = vld [vmem:[#allocation5 + $0x4c8] sm:$0xff] }
 0x1e1   : > { %2781 = vmatpush2.msra.mxu0 %v11620_v12  ;;  %2962 = vmatpush1.msra.mxu1 %v11621_v44  ;;  %v8311_v38 = vand.u32 4294901760, %v435_v28  ;;  %v11647_v12 = vld [vmem:[#allocation102_spill] sm:$0xff] }
 0x1e2   : > { %2785 = vmatprep.subr.mxu0 %v11623_v55  ;;  %2964 = vmatprep.subr.mxu1 %v11624_v31  ;;  %v11648_v44 = vand.u32 4294901760, %v11647_v12  ;;  %v8324_v55 = vand.u32 4294901760, %v433_v14  ;;  %v430_v31 = vld [vmem:[#allocation5 + $0x4d0] sm:$0xff]  ;;  %v428_v0 = vld [vmem:[#allocation5 + $0x4c0] sm:$0xff] }
 0x1e3   : > { %2789 = vmatpush2.msra.mxu0 %v11626_v16  ;;  %2966 = vmatpush1.msra.mxu1 %v11627_v4  ;;  %11639 = vst [vmem:[#allocation14_spill] sm:$0xff] %v8311_v38  ;;  %v11652_v16 = vand.u32 4294901760, %v11651_v51  ;;  %v8329_v4 = vand.u32 4294901760, %v432_v35  ;;  %v424_v12 = vld [vmem:[#allocation5 + $0x4a0] sm:$0xff] }
 0x1e4   : > { %2793 = vmatprep.subr.mxu0 %v11629_v22  ;;  %2968 = vmatprep.subr.mxu1 %v11630_v63  ;;  %11650 = vst [vmem:[#allocation57_spill] sm:$0xff] %v8324_v55  ;;  %v8332_v22 = vsub.f32 %v435_v28, %v8311_v38  ;;  %v11654_v63 = vld [vmem:[#allocation105_spill] sm:$0xff]  ;;  %v8353_v36 = vsub.f32 %v433_v14, %v8324_v55 }
 0x1e5   : > { %2797 = vmatpush2.msra.mxu0 %v11632_v15  ;;  %2970 = vmatpush1.msra.mxu1 %v11633_v41  ;;  %11653 = vst [vmem:[#allocation59_spill] sm:$0xff] %v8329_v4  ;;  %v11655_v9 = vand.u32 4294901760, %v11654_v63  ;;  %v8338_v15 = vsub.f32 %v434_v13, %v8316_v26  ;;  %v8340_v41 = vand.u32 4294901760, %v431_v3  ;;  %v11660_v28 = vld [vmem:[#allocation85_spill] sm:$0xff]  ;;  %v426_v13 = vld [vmem:[#allocation5 + $0x4b0] sm:$0xff]  ;;  %v11675_v63 = vld [vmem:[#allocation115_spill] sm:$0xff] }
 0x1e6   : > { %2801 = vmatprep.subr.mxu0 %v11635_v33  ;;  %2972 = vmatprep.subr.mxu1 %v11518_v1  ;;  %v11646_v1 = vld [vmem:[#allocation68_spill] sm:$0xff]  ;;  %v11658_v33 = vand.u32 4294901760, %v11657_v34  ;;  %11663 = vst [vmem:[#allocation12_spill] sm:$0xff] %v8353_v36  ;;  %v10597_v48 = vand.u32 4294901760, %v8332_v22 }
 0x1e7   : > { %2805 = vmatpush2.msra.mxu0 %v11637_v25  ;;  %2974 = vmatpush1.msra.mxu1 %v11638_v27  ;;  %11656 = vst [vmem:[#allocation67_spill] sm:$0xff] %v8340_v41  ;;  %v11661_v25 = vand.u32 4294901760, %v11660_v28  ;;  %v8350_v27 = vand.u32 4294901760, %v429_v24  ;;  %v10595_v14 = vand.u32 4294901760, %v8338_v15  ;;  %v8396_v28 = vand.u32 4294901760, %v424_v12 }
 0x1e8   : > { %2809 = vmatprep.subr.mxu0 %v11641_v6  ;;  %2976 = vmatprep.subr.mxu1 %v11642_v30  ;;  %v11664_v6 = vld [vmem:[#allocation81_spill] sm:$0xff] }
 0x1e9   : > { %2813 = vmatpush2.msra.mxu0 %v11645_v52  ;;  %2978 = vmatpush2.msra.mxu1 %v11646_v1  ;;  %11662 = vst [vmem:[#allocation75_spill] sm:$0xff] %v8350_v27  ;;  %v11665_v30 = vand.u32 4294901760, %v11664_v6  ;;  %v11667_v52 = vld [vmem:[#allocation110_spill] sm:$0xff]  ;;  %v8386_v34 = vsub.f32 %v429_v24, %v8350_v27  ;;  %11680 = vst [vmem:[#allocation18_spill] sm:$0xff] %v8396_v28  ;;  %v11681_v6 = vld [vmem:[#allocation117_spill] sm:$0xff] }
 0x1ea   : > { %2817 = vmatprep.subr.mxu0 %v11648_v44  ;;  %2980 = vmatprep.subr.mxu1 %v11649_v57  ;;  %v11668_v1 = vand.u32 4294901760, %v11667_v52  ;;  %v8369_v44 = vsub.f32 %v431_v3, %v8340_v41  ;;  %v11671_v57 = vld [vmem:[#allocation108_spill] sm:$0xff]  ;;  %v10594_v3 = vand.u32 4294901760, %v8353_v36 }
 0x1eb   : > { %2821 = vmatpush2.msra.mxu0 %v11652_v16  ;;  %2982 = vmatpush2.msra.mxu1 %v11528_v56  ;;  %v8345_v56 = vand.u32 4294901760, %v430_v31  ;;  %v8379_v16 = vand.u32 4294901760, %v426_v13  ;;  %11677 = vst [vmem:[#allocation36_spill] sm:$0xff] %v8386_v34 }
 0x1ec   : > { %2825 = vmatprep.subr.mxu0 %v11655_v9  ;;  %2984 = vmatprep.subr.mxu1 %v11529_v29  ;;  %v427_v29 = vld [vmem:[#allocation5 + $0x4b8] sm:$0xff]  ;;  %11670 = vst [vmem:[#allocation15_spill] sm:$0xff] %v8369_v44  ;;  %v11676_v9 = vand.u32 4294901760, %v11675_v63 }
 0x1ed   : > { %2829 = vmatpush2.msra.mxu0 %v11658_v33  ;;  %2986 = vmatpush2.msra.mxu1 %v11531_v50  ;;  %11659 = vst [vmem:[#allocation69_spill] sm:$0xff] %v8345_v56  ;;  %v8359_v50 = vsub.f32 %v432_v35, %v8329_v4  ;;  %v8375_v35 = vsub.f32 %v430_v31, %v8345_v56  ;;  %v8377_v51 = vand.u32 4294901760, %v427_v29  ;;  %11674 = vst [vmem:[#allocation42_spill] sm:$0xff] %v8379_v16  ;;  %v11678_v33 = vld [vmem:[#allocation111_spill] sm:$0xff] }
 0x1ee   : > { %2833 = vmatprep.subr.mxu0 %v11661_v25  ;;  %2988 = vmatprep.subr.mxu1 %v11533_v20  ;;  %v8365_v20 = vand.u32 4294901760, %v428_v0  ;;  %v8394_v31 = vsub.f32 %v8332_v22, %v10597_v48  ;;  %v11698_v48 = vand.u32 4294901760, %v7942_v37  ;;  %v416_v37 = vld [vmem:[#allocation5 + $0x460] sm:$0xff] }
 0x1ef   : > { %2837 = vmatpush2.msra.mxu0 %v11665_v30  ;;  %2990 = vmatpush2.msra.mxu1 %v11535_v62  ;;  %11666 = vst [vmem:[#allocation73_spill] sm:$0xff] %v8359_v50  ;;  %v11672_v62 = vand.u32 4294901760, %v11671_v57  ;;  %11673 = vst [vmem:[#allocation38_spill] sm:$0xff] %v8375_v35  ;;  %v10596_v25 = vand.u32 4294901760, %v8359_v50  ;;  %v11682_v30 = vand.u32 4294901760, %v11681_v6  ;;  %v422_v57 = vld [vmem:[#allocation5 + $0x490] sm:$0xff]  ;;  %v8429_v6 = vsub.f32 %v8353_v36, %v10594_v3 }
 0x1f0   : > { %2841 = vmatprep.subr.mxu0 %v11668_v1  ;;  %2992 = vmatprep.subr.mxu1 %v11537_v18  ;;  %11669 = vst [vmem:[#allocation89_spill] sm:$0xff] %v8365_v20  ;;  %v425_v18 = vld [vmem:[#allocation5 + $0x4a8] sm:$0xff]  ;;  %v8403_v24 = vsub.f32 %v428_v0, %v8365_v20  ;;  %v10598_v1 = vand.u32 4294901760, %v8369_v44  ;;  %v10599_v0 = vand.u32 4294901760, %v8375_v35  ;;  %v410_v36 = vld [vmem:[#allocation5 + $0x430] sm:$0xff] }
 0x1f1   : > { %2845 = vmatpush2.msra.mxu0 %v11672_v62  ;;  %2994 = vmatpush2.msra.mxu1 %v11538_v19  ;;  %v11679_v19 = vand.u32 4294901760, %v11678_v33  ;;  %v8410_v52 = vand.u32 4294901760, %v425_v18  ;;  %v11685_v62 = vld [vmem:[#allocation113_spill] sm:$0xff]  ;;  %v11689_v33 = vld [vmem:[#allocation120_spill] sm:$0xff]  ;;  %v421_v3 = vld [vmem:[#allocation5 + $0x488] sm:$0xff] }
 0x1f2   : > { %2849 = vmatprep.subr.mxu0 %v11676_v9  ;;  %2996 = vmatprep.subr.mxu1 %v11539_v40  ;;  %v423_v40 = vld [vmem:[#allocation5 + $0x498] sm:$0xff]  ;;  %11683 = vst [vmem:[#allocation17_spill] sm:$0xff] %v8403_v24  ;;  %v11686_v63 = vand.u32 4294901760, %v11685_v62  ;;  %v8421_v9 = vsub.f32 %v427_v29, %v8377_v51  ;;  %v11692_v62 = vld [vmem:[#allocation114_spill] sm:$0xff]  ;;  %v11703_v29 = vand.u32 4294901760, %v7952_v17 }
 0x1f3   : > { %2853 = vmatpush2.msra.mxu0 %v11679_v19  ;;  %2998 = vmatpush2.msra.mxu1 %v11540_v53  ;;  %v8408_v53 = vsub.f32 %v8338_v15, %v10595_v14  ;;  %11684 = vst [vmem:[#allocation44_spill] sm:$0xff] %v8410_v52  ;;  %v11690_v19 = vand.u32 4294901760, %v11689_v33  ;;  %v8439_v33 = vsub.f32 %v424_v12, %v8396_v28  ;;  %v11696_v14 = vand.u32 4294901760, %v7966_v5 }
 0x1f4   : > { %2857 = vmatprep.subr.mxu0 %v11682_v30  ;;  %3000 = vmatprep.subr.mxu1 %v11541_v61  ;;  %v8417_v61 = vsub.f32 %v426_v13, %v8379_v16  ;;  %11688 = vst [vmem:[#allocation21_spill] sm:$0xff] %v8421_v9  ;;  %v8431_v30 = vand.u32 4294901760, %v423_v40  ;;  %v420_v13 = vld [vmem:[#allocation5 + $0x480] sm:$0xff]  ;;  %v8455_v12 = vsub.f32 %v8369_v44, %v10598_v1  ;;  %v418_v1 = vld [vmem:[#allocation5 + $0x470] sm:$0xff] }
 0x1f5   : > { %2861 = vmatpush2.msra.mxu0 %v11686_v63  ;;  %3002 = vmatpush2.msra.mxu1 %v11542_v59  ;;  %v10600_v59 = vand.u32 4294901760, %v8386_v34  ;;  %v11693_v63 = vand.u32 4294901760, %v11692_v62  ;;  %11694 = vst [vmem:[#allocation64_spill] sm:$0xff] %v8439_v33  ;;  %v10601_v62 = vand.u32 4294901760, %v8403_v24  ;;  %v8469_v5 = vand.u32 4294901760, %v420_v13  ;;  %v11725_v44 = vld [vmem:[#allocation118_spill] sm:$0xff] }
 0x1f6   : > { %11687 = vst [vmem:[#allocation20_spill] sm:$0xff] %v8417_v61  ;;  %2865 = vmatprep.subr.mxu0 %v11690_v19  ;;  %3004 = vmatprep.subr.mxu1 %v11543_v23  ;;  %11691 = vst [vmem:[#allocation52_spill] sm:$0xff] %v8431_v30  ;;  %v8444_v23 = vsub.f32 %v8359_v50, %v10596_v25  ;;  %v8446_v19 = vand.u32 4294901760, %v422_v57  ;;  %v8459_v25 = vsub.f32 %v425_v18, %v8410_v52 }
 0x1f7   : > { %2869 = vmatpush2.msra.mxu0 %v11693_v63  ;;  %3006 = vmatpush2.msra.mxu1 %v11544_v49  ;;  %v419_v63 = vld [vmem:[#allocation5 + $0x478] sm:$0xff]  ;;  %11699 = vst [vmem:[#allocation78_spill] sm:$0xff] %v8469_v5  ;;  %v11700_v18 = vand.u32 4294901760, %v7985_v39  ;;  %v11710_v49 = vld [vmem:[#allocation107_spill] sm:$0xff]  ;;  %v11713_v17 = vand.u32 4294901760, %v8417_v61 }
 0x1f8   : > { %11695 = vst [vmem:[#allocation37_spill] sm:$0xff] %v8446_v19  ;;  %2873 = vmatprep.subr.mxu0 %v11696_v14  ;;  %3008 = vmatprep.subr.mxu1 %v11545_v45  ;;  %11697 = vst [vmem:[#allocation41_spill] sm:$0xff] %v8459_v25  ;;  %v8467_v45 = vsub.f32 %v8375_v35, %v10599_v0  ;;  %v8485_v0 = vsub.f32 %v423_v40, %v8431_v30  ;;  %v11707_v40 = vld [vmem:[#allocation112_spill] sm:$0xff]  ;;  %v11709_v14 = vand.u32 4294901760, %v8003_v46  ;;  %v415_v39 = vld [vmem:[#allocation5 + $0x458] sm:$0xff] }
 0x1f9   : > { %2877 = vmatpush2.msra.mxu0 %v11698_v48  ;;  %3010 = vmatpush2.msra.mxu1 %v11546_v10  ;;  %v8477_v10 = vand.u32 4294901760, %v421_v3  ;;  %v8482_v48 = vsub.f32 %v8386_v34, %v10600_v59  ;;  %v11706_v59 = vand.u32 4294901760, %v7999_v54  ;;  %v11714_v46 = vld [vmem:[#allocation122_spill] sm:$0xff]  ;;  %v414_v34 = vld [vmem:[#allocation5 + $0x450] sm:$0xff]  ;;  %v11727_v50 = vand.u32 4294901760, %v8459_v25 }
 0x1fa   : > { %2881 = vmatprep.subr.mxu0 %v11700_v18  ;;  %3012 = vmatprep.subr.mxu1 %v11547_v11  ;;  %11702 = vst [vmem:[#allocation45_spill] sm:$0xff] %v8485_v0  ;;  %v8492_v11 = vsub.f32 %v422_v57, %v8446_v19  ;;  %v8494_v18 = vand.u32 4294901760, %v419_v63  ;;  %v417_v57 = vld [vmem:[#allocation5 + $0x468] sm:$0xff] }
 0x1fb   : > { %11701 = vst [vmem:[#allocation80_spill] sm:$0xff] %v8477_v10  ;;  %2885 = vmatpush2.msra.mxu0 %v11703_v29  ;;  %3014 = vmatpush2.msra.mxu1 %v11548_v58  ;;  %v8504_v58 = vsub.f32 %v8403_v24, %v10601_v62  ;;  %v8506_v29 = vand.u32 4294901760, %v418_v1  ;;  %v8524_v24 = vsub.f32 %v8417_v61, %v11713_v17  ;;  %v11720_v17 = vld [vmem:[#allocation116_spill] sm:$0xff]  ;;  %v8539_v61 = vand.u32 4294901760, %v417_v57 }
 0x1fc   : > { %11704 = vst [vmem:[#allocation87_spill] sm:$0xff] %v8492_v11  ;;  %11705 = vst [vmem:[#allocation51_spill] sm:$0xff] %v8494_v18  ;;  %2889 = vmatprep.subr.mxu0 %v11706_v59  ;;  %3016 = vmatprep.subr.mxu1 %v11707_v40  ;;  %v8514_v59 = vsub.f32 %v420_v13, %v8469_v5  ;;  %v11712_v40 = vand.u32 4294901760, %v8421_v9  ;;  %v8530_v13 = vand.u32 4294901760, %v416_v37 }
 0x1fd   : > { %11708 = vst [vmem:[#allocation88_spill] sm:$0xff] %v8506_v29  ;;  %2893 = vmatpush2.msra.mxu0 %v11709_v14  ;;  %3018 = vmatpush2.msra.mxu1 %v11710_v49  ;;  %v11715_v14 = vand.u32 4294901760, %v11714_v46  ;;  %11721 = vst [vmem:[#allocation103_spill] sm:$0xff] %v8539_v61  ;;  %v11722_v46 = vand.u32 4294901760, %v8439_v33  ;;  %v412_v49 = vld [vmem:[#allocation5 + $0x440] sm:$0xff]  ;;  %v8548_v54 = vsub.f32 %v419_v63, %v8494_v18 }
 0x1fe   : > { %11711 = vst [vmem:[#allocation90_spill] sm:$0xff] %v8514_v59  ;;  %v8519_v62 = vsub.f32 %v8421_v9, %v11712_v40  ;;  %3020 = vmatprep.subr.mxu1 %v7857_v7  ;;  %11716 = vst [vmem:[#allocation99_spill] sm:$0xff] %v8530_v13  ;;  %v8534_v40 = vsub.f32 %v421_v3, %v8477_v10  ;;  %v11718_v9 = vld [vmem:[#allocation121_spill] sm:$0xff]  ;;  %2903 = vmatprep.mubr.f32.mxu0 %v11720_v17 }
 0x1ff   : > { %2897 = vmatprep.subr.mxu0 %v11715_v14  ;;  %v11719_v35 = vand.u32 4294901760, %v11718_v9  ;;  %v8544_v7 = vsub.f32 %v8439_v33, %v11722_v46  ;;  %11723 = vst [vmem:[#allocation101_spill] sm:$0xff] %v8548_v54  ;;  %v11724_v3 = vld [vmem:[#allocation109_spill] sm:$0xff]  ;;  %v8554_v9 = vsub.f32 %v418_v1, %v8506_v29  ;;  %v8559_v46 = vsub.f32 %v8459_v25, %v11727_v50 }
 0x200   : > { %11717 = vst [vmem:[#allocation95_spill] sm:$0xff] %v8534_v40  ;;  %3022 = vmatpush2.msra.mxu1 %v11724_v3  ;;  %v8561_v33 = vand.u32 4294901760, %v415_v39  ;;  %v8567_v14 = vand.u32 4294901760, %v414_v34  ;;  %v8573_v50 = vsub.f32 %v416_v37, %v8530_v13  ;;  %v8581_v3 = vand.u32 4294901760, %v412_v49  ;;  %3040 = vmatprep.mubr.f32.mxu1 %v11720_v17 }
 0x201   : > { %2901 = vmatpush2.msra.mxu0 %v11719_v35  ;;  %11726 = vst [vmem:[#allocation83_spill] sm:$0xff] %v8554_v9  ;;  %3024 = vmatprep.subr.mxu1 %v7921_v60  ;;  %v413_v35 = vld [vmem:[#allocation5 + $0x448] sm:$0xff]  ;;  %v11731_v60 = vand.u32 4294901760, %v8485_v0  ;;  %v11733_v37 = vand.u32 4294901760, %v8492_v11 }
 0x202   : > { %2905 = vmatmul.mubr.f32.vlgmr.msra.gmra.mxu0 %v11725_v44  ;;  %11728 = vst [vmem:[#allocation106_spill] sm:$0xff] %v8561_v33  ;;  %3049 = vmatprep.subr.mxu0 %v8311_v38  ;;  %11729 = vst [vmem:[#allocation100_spill] sm:$0xff] %v8567_v14  ;;  %v411_v38 = vld [vmem:[#allocation5 + $0x438] sm:$0xff]  ;;  %v8598_v63 = vand.u32 4294901760, %v413_v35 }
 0x203   : > { %3026 = vmatpush2.msra.mxu1 %v7901_v43  ;;  %3051 = vmatpush1.msra.mxu0 %v8316_v26  ;;  %11730 = vst [vmem:[#allocation98_spill] sm:$0xff] %v8573_v50  ;;  %v8578_v25 = vsub.f32 %v8485_v0, %v11731_v60  ;;  %11732 = vst [vmem:[#allocation119_spill] sm:$0xff] %v8581_v3  ;;  %v8589_v1 = vsub.f32 %v8492_v11, %v11733_v37  ;;  %v8616_v60 = vand.u32 4294901760, %v410_v36  ;;  %v409_v43 = vld [vmem:[#allocation5 + $0x428] sm:$0xff] }
 0x204   : > { %3028 = vmatprep.subr.mxu1 %v11552_v42  ;;  %3053 = vmatprep.subr.mxu0 %v8324_v55  ;;  %v8593_v0 = vsub.f32 %v417_v57, %v8539_v61  ;;  %11735 = vst [vmem:[#allocation30_spill] sm:$0xff] %v8598_v63  ;;  %v408_v55 = vld [vmem:[#allocation5 + $0x420] sm:$0xff]  ;;  %v8602_v26 = vsub.f32 %v415_v39, %v8561_v33  ;;  %v8614_v42 = vand.u32 4294901760, %v411_v38  ;;  %v11741_v39 = vand.u32 4294901760, %v8534_v40 }
 0x205   : > { %3030 = vmatpush2.msra.mxu1 %v7909_v32  ;;  %3055 = vmatpush1.msra.mxu0 %v8329_v4  ;;  %v8607_v57 = vsub.f32 %v414_v34, %v8567_v14  ;;  %v11738_v32 = vand.u32 4294901760, %v8514_v59  ;;  %11740 = vst [vmem:[#allocation40_spill] sm:$0xff] %v8616_v60  ;;  %v8627_v11 = vsub.f32 %v412_v49, %v8581_v3 }
 0x206   : > { %11734 = vst [vmem:[#allocation79_spill] sm:$0xff] %v8593_v0  ;;  %11736 = vst [vmem:[#allocation13_spill] sm:$0xff] %v8602_v26  ;;  %3032 = vmatprep.subr.mxu1 %v7962_v47  ;;  %3057 = vmatprep.subr.mxu0 %v8340_v41  ;;  %v8624_v34 = vsub.f32 %v8534_v40, %v11741_v39  ;;  %v8639_v39 = vand.u32 4294901760, %v408_v55  ;;  %v406_v40 = vld [vmem:[#allocation5 + $0x410] sm:$0xff]  ;;  %v8658_v17 = vsub.f32 %v410_v36, %v8616_v60 }
 0x207   : > { %11737 = vst [vmem:[#allocation93_spill] sm:$0xff] %v8607_v57  ;;  %v8612_v37 = vsub.f32 %v8514_v59, %v11738_v32  ;;  %11739 = vst [vmem:[#allocation32_spill] sm:$0xff] %v8614_v42  ;;  %3034 = vmatpush2.msra.mxu1 %v7973_v2  ;;  %3059 = vmatpush1.msra.mxu0 %v8345_v56  ;;  %v11743_v59 = vand.u32 4294901760, %v8548_v54  ;;  %v8648_v2 = vand.u32 4294901760, %v409_v43  ;;  %v407_v32 = vld [vmem:[#allocation5 + $0x418] sm:$0xff]  ;;  %v404_v56 = vld [vmem:[#allocation5 + $0x400] sm:$0xff] }
 0x208   : > { %11742 = vst [vmem:[#allocation53_spill] sm:$0xff] %v8627_v11  ;;  %3036 = vmatprep.subr.mxu1 %v7979_v8  ;;  %3061 = vmatprep.subr.mxu0 %v8350_v27  ;;  %11744 = vst [vmem:[#allocation55_spill] sm:$0xff] %v8639_v39  ;;  %v11745_v8 = vand.u32 4294901760, %v8554_v9  ;;  %v8673_v36 = vand.u32 4294901760, %v406_v40 }
 0x209   : > { %v8636_v47 = vsub.f32 %v8548_v54, %v11743_v59  ;;  %3038 = vmatpush2.msra.mxu1 %v7981_v21  ;;  %11746 = vst [vmem:[#allocation61_spill] sm:$0xff] %v8648_v2  ;;  %v8652_v54 = vsub.f32 %v413_v35, %v8598_v63  ;;  %3063 = vmatpush1.msra.mxu0 %v8365_v20  ;;  %11748 = vst [vmem:[#allocation63_spill] sm:$0xff] %v8658_v17  ;;  %v11750_v35 = vand.u32 4294901760, %v8394_v31  ;;  %v405_v20 = vld [vmem:[#allocation5 + $0x408] sm:$0xff] }
 0x20a   : > { %v8646_v49 = vsub.f32 %v8554_v9, %v11745_v8  ;;  %3042 = vmatmul.mubr.f32.vlgmr.msra.gmra.mxu1 %v11725_v44  ;;  %v8662_v9 = vsub.f32 %v411_v38, %v8614_v42  ;;  %3065 = vmatprep.subr.mxu0 %v8377_v51  ;;  %v11751_v44 = vand.u32 4294901760, %v8573_v50  ;;  %11752 = vst [vmem:[#allocation71_spill] sm:$0xff] %v8673_v36  ;;  %v11753_v38 = vand.u32 4294901760, %v8408_v53 }
 0x20b   : > { %11747 = vst [vmem:[#allocation19_spill] sm:$0xff] %v8652_v54  ;;  %3198 = vmatprep.subr.mxu1 %v11750_v35  ;;  %3067 = vmatpush1.msra.mxu0 %v8379_v16  ;;  %v11754_v35 = vand.u32 4294901760, %v8593_v0  ;;  %v11757_v8 = vand.u32 4294901760, %v8429_v6  ;;  %v466_v16 = vld [vmem:[#allocation5 + $0x5f0] sm:$0xff]  ;;  %v11761_v6 = vand.u32 4294901760, %v8607_v57  ;;  %v8710_v53 = vand.u32 4294901760, %v405_v20 }
 0x20c   : > { %11749 = vst [vmem:[#allocation48_spill] sm:$0xff] %v8662_v9  ;;  %v8671_v21 = vsub.f32 %v8573_v50, %v11751_v44  ;;  %3204 = vmatpush1.msra.mxu1 %v11753_v38  ;;  %v8686_v44 = vsub.f32 %v408_v55, %v8639_v39  ;;  %v8688_v50 = vand.u32 4294901760, %v407_v32  ;;  %3069 = vmatprep.subr.mxu0 %v8410_v52  ;;  %v11758_v38 = vand.u32 4294901760, %v8602_v26  ;;  %v467_v55 = vld [vmem:[#allocation5 + $0x5f8] sm:$0xff] }
 0x20d   : > { %v8683_v59 = vsub.f32 %v8593_v0, %v11754_v35  ;;  %3210 = vmatprep.subr.mxu1 %v11757_v8  ;;  %v8700_v0 = vand.u32 4294901760, %v404_v56  ;;  %3071 = vmatpush1.msra.mxu0 %v8396_v28  ;;  %v11760_v52 = vand.u32 4294901760, %v8444_v23  ;;  %v8708_v8 = vsub.f32 %v8607_v57, %v11761_v6  ;;  %11762 = vst [vmem:[#allocation23_spill] sm:$0xff] %v8710_v53  ;;  %v464_v28 = vld [vmem:[#allocation5 + $0x5e0] sm:$0xff] }
 0x20e   : > { %11755 = vst [vmem:[#allocation46_spill] sm:$0xff] %v8686_v44  ;;  %11756 = vst [vmem:[#allocation65_spill] sm:$0xff] %v8688_v50  ;;  %v8697_v31 = vsub.f32 %v8602_v26, %v11758_v38  ;;  %v8714_v35 = vsub.f32 %v409_v43, %v8648_v2  ;;  %3073 = vmatprep.subr.mxu0 %v8431_v30  ;;  %v11764_v26 = vand.u32 4294901760, %v8455_v12  ;;  %v11766_v6 = vand.u32 4294901760, %v8627_v11 }
 0x20f   : > { %11759 = vst [vmem:[#allocation50_spill] sm:$0xff] %v8700_v0  ;;  %3216 = vmatpush1.msra.mxu1 %v11760_v52  ;;  %v8721_v52 = vsub.f32 %v406_v40, %v8673_v36  ;;  %3075 = vmatpush1.msra.mxu0 %v8446_v19  ;;  %v11767_v43 = vand.u32 4294901760, %v8467_v45  ;;  %v8733_v12 = vand.u32 4294901760, %v467_v55  ;;  %v8735_v23 = vand.u32 4294901760, %v466_v16  ;;  %v465_v40 = vld [vmem:[#allocation5 + $0x5e8] sm:$0xff] }
 0x210   : > { %11763 = vst [vmem:[#allocation77_spill] sm:$0xff] %v8714_v35  ;;  %3222 = vmatprep.subr.mxu1 %v11764_v26  ;;  %v8726_v57 = vsub.f32 %v8627_v11, %v11766_v6  ;;  %v8738_v30 = vsub.f32 %v407_v32, %v8688_v50  ;;  %3077 = vmatprep.subr.mxu0 %v8477_v10  ;;  %v11771_v6 = vand.u32 4294901760, %v8482_v48  ;;  %v11772_v45 = vand.u32 4294901760, %v8652_v54 }
 0x211   : > { %11765 = vst [vmem:[#allocation26_spill] sm:$0xff] %v8721_v52  ;;  %3228 = vmatpush1.msra.mxu1 %v11767_v43  ;;  %11768 = vst [vmem:[#allocation34_spill] sm:$0xff] %v8733_v12  ;;  %v8750_v26 = vsub.f32 %v404_v56, %v8700_v0  ;;  %3079 = vmatpush1.msra.mxu0 %v8469_v5  ;;  %v11774_v32 = vand.u32 4294901760, %v8504_v58  ;;  %v8763_v10 = vand.u32 4294901760, %v464_v28  ;;  %v462_v56 = vld [vmem:[#allocation5 + $0x5d0] sm:$0xff]  ;;  %v11777_v11 = vand.u32 4294901760, %v8519_v62 }
 0x212   : > { %11769 = vst [vmem:[#allocation54_spill] sm:$0xff] %v8735_v23  ;;  %11770 = vst [vmem:[#allocation91_spill] sm:$0xff] %v8738_v30  ;;  %3234 = vmatprep.subr.mxu1 %v11771_v6  ;;  %v8747_v43 = vsub.f32 %v8652_v54, %v11772_v45  ;;  %v11775_v6 = vand.u32 4294901760, %v8662_v9  ;;  %3081 = vmatprep.subr.mxu0 %v8494_v18  ;;  %v8774_v5 = vand.u32 4294901760, %v465_v40  ;;  %v11781_v18 = vand.u32 4294901760, %v8524_v24 }
 0x213   : > { %11773 = vst [vmem:[#allocation27_spill] sm:$0xff] %v8750_v26  ;;  %3240 = vmatpush1.msra.mxu1 %v11774_v32  ;;  %11776 = vst [vmem:[#allocation58_spill] sm:$0xff] %v8763_v10  ;;  %v11778_v32 = vand.u32 4294901760, %v8658_v17  ;;  %v8777_v45 = vsub.f32 %v405_v20, %v8710_v53  ;;  %3083 = vmatpush1.msra.mxu0 %v8506_v29  ;;  %v8783_v62 = vsub.f32 %v466_v16, %v8735_v23 }
 0x214   : > { %v8760_v38 = vsub.f32 %v8662_v9, %v11775_v6  ;;  %3246 = vmatprep.subr.mxu1 %v11777_v11  ;;  %11779 = vst [vmem:[#allocation16_spill] sm:$0xff] %v8774_v5  ;;  %v463_v6 = vld [vmem:[#allocation5 + $0x5d8] sm:$0xff]  ;;  %3085 = vmatprep.subr.mxu0 %v8539_v61  ;;  %v11784_v20 = vand.u32 4294901760, %v8559_v46  ;;  %v11785_v24 = vand.u32 4294901760, %v8686_v44  ;;  %v461_v11 = vld [vmem:[#allocation5 + $0x5c8] sm:$0xff]  ;;  %v11791_v58 = vand.u32 4294901760, %v8578_v25 }
 0x215   : > { %v8772_v48 = vsub.f32 %v8658_v17, %v11778_v32  ;;  %11780 = vst [vmem:[#allocation31_spill] sm:$0xff] %v8777_v45  ;;  %3252 = vmatpush1.msra.mxu1 %v11781_v18  ;;  %11782 = vst [vmem:[#allocation62_spill] sm:$0xff] %v8783_v62  ;;  %v460_v32 = vld [vmem:[#allocation5 + $0x5c0] sm:$0xff]  ;;  %v8788_v17 = vsub.f32 %v467_v55, %v8733_v12  ;;  %v8799_v18 = vand.u32 4294901760, %v462_v56  ;;  %3087 = vmatpush1.msra.mxu0 %v8530_v13  ;;  %v459_v13 = vld [vmem:[#allocation5 + $0x5b8] sm:$0xff] }
 0x216   : > { %3258 = vmatprep.subr.mxu1 %v11784_v20  ;;  %v8797_v16 = vsub.f32 %v8686_v44, %v11785_v24  ;;  %v11787_v55 = vand.u32 4294901760, %v8544_v7  ;;  %v11788_v20 = vand.u32 4294901760, %v8714_v35  ;;  %v8812_v24 = vsub.f32 %v464_v28, %v8763_v10  ;;  %3089 = vmatprep.subr.mxu0 %v8561_v33  ;;  %v458_v61 = vld [vmem:[#allocation5 + $0x5b0] sm:$0xff] }
 0x217   : > { %11783 = vst [vmem:[#allocation33_spill] sm:$0xff] %v8788_v17  ;;  %11786 = vst [vmem:[#allocation66_spill] sm:$0xff] %v8799_v18  ;;  %v8814_v44 = vand.u32 4294901760, %v463_v6  ;;  %v8821_v46 = vand.u32 4294901760, %v460_v32  ;;  %3091 = vmatpush1.msra.mxu0 %v8567_v14  ;;  %v11794_v28 = vand.u32 4294901760, %v8589_v1  ;;  %v11795_v33 = vand.u32 4294901760, %v8738_v30 }
 0x218   : > { %3264 = vmatpush1.msra.mxu1 %v11787_v55  ;;  %v8809_v29 = vsub.f32 %v8714_v35, %v11788_v20  ;;  %11789 = vst [vmem:[#allocation39_spill] sm:$0xff] %v8812_v24  ;;  %v8824_v20 = vsub.f32 %v465_v40, %v8774_v5  ;;  %v8839_v55 = vand.u32 4294901760, %v461_v11  ;;  %3093 = vmatprep.subr.mxu0 %v8598_v63  ;;  %v11798_v14 = vand.u32 4294901760, %v8624_v34 }
 0x219   : > { %11790 = vst [vmem:[#allocation22_spill] sm:$0xff] %v8814_v44  ;;  %3270 = vmatprep.subr.mxu1 %v11791_v58  ;;  %11792 = vst [vmem:[#allocation35_spill] sm:$0xff] %v8821_v46  ;;  %v8832_v25 = vsub.f32 %v8738_v30, %v11795_v33  ;;  %v11796_v58 = vand.u32 4294901760, %v8721_v52  ;;  %v11800_v33 = vand.u32 4294901760, %v8750_v26  ;;  %3095 = vmatpush1.msra.mxu0 %v8581_v3  ;;  %v11801_v40 = vand.u32 4294901760, %v8612_v37 }
 0x21a   : > { %11793 = vst [vmem:[#allocation76_spill] sm:$0xff] %v8824_v20  ;;  %3276 = vmatpush1.msra.mxu1 %v11794_v28  ;;  %11797 = vst [vmem:[#allocation74_spill] sm:$0xff] %v8839_v55  ;;  %v8847_v28 = vsub.f32 %v462_v56, %v8799_v18  ;;  %v8859_v34 = vand.u32 4294901760, %v459_v13  ;;  %v8861_v1 = vand.u32 4294901760, %v458_v61  ;;  %v457_v56 = vld [vmem:[#allocation5 + $0x5a8] sm:$0xff]  ;;  %v8864_v63 = vsub.f32 %v463_v6, %v8814_v44 }
 0x21b   : > { %v8837_v7 = vsub.f32 %v8721_v52, %v11796_v58  ;;  %3282 = vmatprep.subr.mxu1 %v11798_v14  ;;  %v8852_v30 = vsub.f32 %v8750_v26, %v11800_v33  ;;  %v456_v52 = vld [vmem:[#allocation5 + $0x5a0] sm:$0xff]  ;;  %3097 = vmatprep.subr.mxu0 %v8614_v42  ;;  %v11805_v33 = vand.u32 4294901760, %v8636_v47  ;;  %v11806_v58 = vand.u32 4294901760, %v8777_v45  ;;  %v454_v26 = vld [vmem:[#allocation5 + $0x590] sm:$0xff]  ;;  %v455_v14 = vld [vmem:[#allocation5 + $0x598] sm:$0xff] }
 0x21c   : > { %11799 = vst [vmem:[#allocation24_spill] sm:$0xff] %v8847_v28  ;;  %3288 = vmatpush1.msra.mxu1 %v11801_v40  ;;  %11802 = vst [vmem:[#allocation47_spill] sm:$0xff] %v8859_v34  ;;  %v8875_v40 = vsub.f32 %v460_v32, %v8821_v46  ;;  %3099 = vmatpush1.msra.mxu0 %v8616_v60  ;;  %v11808_v6 = vand.u32 4294901760, %v8646_v49  ;;  %v11809_v42 = vand.u32 4294901760, %v8788_v17  ;;  %v8889_v32 = vand.u32 4294901760, %v456_v52 }
 0x21d   : > { %11803 = vst [vmem:[#allocation56_spill] sm:$0xff] %v8861_v1  ;;  %11804 = vst [vmem:[#allocation43_spill] sm:$0xff] %v8864_v63  ;;  %3294 = vmatprep.subr.mxu1 %v11805_v33  ;;  %v8872_v37 = vsub.f32 %v8777_v45, %v11806_v58  ;;  %3101 = vmatprep.subr.mxu0 %v8648_v2  ;;  %v11811_v3 = vand.u32 4294901760, %v8683_v59  ;;  %v8900_v33 = vand.u32 4294901760, %v457_v56  ;;  %v11815_v2 = vand.u32 4294901760, %v8671_v21 }
 0x21e   : > { %11807 = vst [vmem:[#allocation25_spill] sm:$0xff] %v8875_v40  ;;  %3300 = vmatpush1.msra.mxu1 %v11808_v6  ;;  %v8887_v58 = vsub.f32 %v8788_v17, %v11809_v42  ;;  %11810 = vst [vmem:[#allocation82_spill] sm:$0xff] %v8889_v32  ;;  %v11812_v6 = vand.u32 4294901760, %v8783_v62  ;;  %v8903_v42 = vsub.f32 %v461_v11, %v8839_v55  ;;  %3103 = vmatpush1.msra.mxu0 %v8639_v39 }
 0x21f   : > { %3306 = vmatprep.subr.mxu1 %v11811_v3  ;;  %11813 = vst [vmem:[#allocation60_spill] sm:$0xff] %v8900_v33  ;;  %v8909_v3 = vsub.f32 %v458_v61, %v8861_v1  ;;  %v8914_v60 = vsub.f32 %v459_v13, %v8859_v34  ;;  %3105 = vmatprep.subr.mxu0 %v8688_v50  ;;  %v11818_v11 = vand.u32 4294901760, %v8697_v31  ;;  %v11820_v21 = vand.u32 4294901760, %v8812_v24  ;;  %v453_v13 = vld [vmem:[#allocation5 + $0x588] sm:$0xff] }
 0x220   : > { %v8898_v47 = vsub.f32 %v8783_v62, %v11812_v6  ;;  %11814 = vst [vmem:[#allocation84_spill] sm:$0xff] %v8903_v42  ;;  %3312 = vmatpush1.msra.mxu1 %v11815_v2  ;;  %v452_v6 = vld [vmem:[#allocation5 + $0x580] sm:$0xff]  ;;  %v11819_v2 = vand.u32 4294901760, %v8824_v20  ;;  %v8930_v59 = vand.u32 4294901760, %v454_v26  ;;  %3107 = vmatpush1.msra.mxu0 %v8673_v36  ;;  %v11822_v31 = vand.u32 4294901760, %v8708_v8 }
 0x221   : > { %11816 = vst [vmem:[#allocation28_spill] sm:$0xff] %v8909_v3  ;;  %11817 = vst [vmem:[#allocation94_spill] sm:$0xff] %v8914_v60  ;;  %3318 = vmatprep.subr.mxu1 %v11818_v11  ;;  %v8928_v49 = vsub.f32 %v8812_v24, %v11820_v21  ;;  %v8937_v39 = vsub.f32 %v456_v52, %v8889_v32  ;;  %3109 = vmatprep.subr.mxu0 %v8710_v53  ;;  %v11825_v21 = vand.u32 4294901760, %v8747_v43  ;;  %v450_v11 = vld [vmem:[#allocation5 + $0x570] sm:$0xff] }
 0x222   : > { %v8923_v61 = vsub.f32 %v8824_v20, %v11819_v2  ;;  %11821 = vst [vmem:[#allocation86_spill] sm:$0xff] %v8930_v59  ;;  %3324 = vmatpush1.msra.mxu1 %v11822_v31  ;;  %v8939_v2 = vand.u32 4294901760, %v455_v14  ;;  %v8947_v8 = vand.u32 4294901760, %v452_v6  ;;  %v451_v31 = vld [vmem:[#allocation5 + $0x578] sm:$0xff]  ;;  %v8950_v52 = vsub.f32 %v457_v56, %v8900_v33  ;;  %3111 = vmatpush1.msra.mxu0 %v8700_v0 }
 0x223   : > { %11823 = vst [vmem:[#allocation29_spill] sm:$0xff] %v8937_v39  ;;  %3330 = vmatprep.subr.mxu1 %v11825_v21  ;;  %v11828_v50 = vand.u32 4294901760, %v8726_v57  ;;  %v11829_v53 = vand.u32 4294901760, %v8864_v63  ;;  %v11830_v21 = vand.u32 4294901760, %v8847_v28  ;;  %v8965_v36 = vand.u32 4294901760, %v453_v13  ;;  %3113 = vmatprep.subr.mxu0 %v8733_v12  ;;  %v8989_v57 = vld [vmem:[#allocation5 + $0x568] sm:$0xff] }
 0x224   : > { %11824 = vst [vmem:[#allocation96_spill] sm:$0xff] %v8939_v2  ;;  %11826 = vst [vmem:[#allocation70_spill] sm:$0xff] %v8947_v8  ;;  %v11832_v0 = vand.u32 4294901760, %v8760_v38  ;;  %3115 = vmatpush2.msra.mxu0 %v8735_v23  ;;  %v11835_v56 = vand.u32 4294901760, %v8875_v40  ;;  %v8987_v38 = vand.u32 4294901760, %v450_v11  ;;  %v11852_v23 = vand.u32 4294901760, %v8872_v37 }
 0x225   : > { %11827 = vst [vmem:[#allocation92_spill] sm:$0xff] %v8950_v52  ;;  %3336 = vmatpush1.msra.mxu1 %v11828_v50  ;;  %v8958_v43 = vsub.f32 %v8864_v63, %v11829_v53  ;;  %v8963_v24 = vsub.f32 %v8847_v28, %v11830_v21  ;;  %11831 = vst [vmem:[#allocation68_spill] sm:$0xff] %v8965_v36  ;;  %v8974_v53 = vsub.f32 %v454_v26, %v8930_v59  ;;  %v448_v26 = vld [vmem:[#allocation5 + $0x560] sm:$0xff] }
 0x226   : > { %3342 = vmatprep.subr.mxu1 %v11832_v0  ;;  %v11834_v21 = vand.u32 4294901760, %v8772_v48  ;;  %v8983_v12 = vsub.f32 %v8875_v40, %v11835_v56  ;;  %v8985_v0 = vand.u32 4294901760, %v451_v31  ;;  %11837 = vst [vmem:[#allocation97_spill] sm:$0xff] %v8987_v38  ;;  %v8992_v50 = vsub.f32 %v455_v14, %v8939_v2  ;;  %3117 = vmatprep.subr.mxu0 %v8774_v5 }
 0x227   : > { %11833 = vst [vmem:[#allocation102_spill] sm:$0xff] %v8974_v53  ;;  %v11839_v48 = vand.u32 4294901760, %v8809_v29  ;;  %v9003_v63 = vsub.f32 %v452_v6, %v8947_v8  ;;  %3119 = vmatpush2.msra.mxu0 %v8763_v10  ;;  %v11842_v14 = vand.u32 4294901760, %v8797_v16  ;;  %v3413_v29 = vand.u32 4294901760, %v8958_v43  ;;  %v447_v6 = vld [vmem:[#allocation5 + $0x558] sm:$0xff] }
 0x228   : > { %3348 = vmatpush1.msra.mxu1 %v11834_v21  ;;  %11836 = vst [vmem:[#allocation72_spill] sm:$0xff] %v8985_v0  ;;  %11838 = vst [vmem:[#allocation105_spill] sm:$0xff] %v8992_v50  ;;  %v11840_v21 = vand.u32 4294901760, %v8903_v42  ;;  %v11843_v5 = vand.u32 4294901760, %v8914_v60  ;;  %3121 = vmatprep.subr.mxu0 %v8814_v44  ;;  %v11845_v40 = vand.u32 4294901760, %v8832_v25  ;;  %v11846_v16 = vand.u32 4294901760, %v8909_v3 }
 0x229   : > { %3354 = vmatprep.subr.mxu1 %v11839_v48  ;;  %11841 = vst [vmem:[#allocation104_spill] sm:$0xff] %v9003_v63  ;;  %v9031_v48 = vand.u32 4294901760, %v448_v26  ;;  %3123 = vmatpush2.msra.mxu0 %v8799_v18  ;;  %v444_v44 = vld [vmem:[#allocation5 + $0x540] sm:$0xff]  ;;  %v9043_v10 = vsub.f32 %v451_v31, %v8985_v0  ;;  %v9059_v31 = vand.u32 4294901760, %v447_v6 }
 0x22a   : > { %v9000_v56 = vsub.f32 %v8903_v42, %v11840_v21  ;;  %3360 = vmatpush1.msra.mxu1 %v11842_v14  ;;  %v9015_v21 = vsub.f32 %v8914_v60, %v11843_v5  ;;  %v9018_v42 = vsub.f32 %v453_v13, %v8965_v36  ;;  %v9026_v43 = vsub.f32 %v8909_v3, %v11846_v16  ;;  %v446_v5 = vld [vmem:[#allocation5 + $0x550] sm:$0xff]  ;;  %v445_v16 = vld [vmem:[#allocation5 + $0x548] sm:$0xff] }
 0x22b   : > { %3366 = vmatprep.subr.mxu1 %v11845_v40  ;;  %v9029_v14 = vand.u32 4294901760, %v8989_v57  ;;  %11848 = vst [vmem:[#allocation110_spill] sm:$0xff] %v9031_v48  ;;  %v11849_v13 = vand.u32 4294901760, %v8837_v7  ;;  %v9039_v40 = vsub.f32 %v450_v11, %v8987_v38  ;;  %11851 = vst [vmem:[#allocation115_spill] sm:$0xff] %v9043_v10  ;;  %3125 = vmatprep.subr.mxu0 %v8839_v55  ;;  %v11853_v7 = vand.u32 4294901760, %v8950_v52  ;;  %v442_v55 = vld [vmem:[#allocation5 + $0x530] sm:$0xff] }
 0x22c   : > { %11844 = vst [vmem:[#allocation85_spill] sm:$0xff] %v9018_v42  ;;  %v3425_v18 = vand.u32 4294901760, %v9000_v56  ;;  %v11854_v11 = vand.u32 4294901760, %v8937_v39  ;;  %11855 = vst [vmem:[#allocation111_spill] sm:$0xff] %v9059_v31  ;;  %3127 = vmatpush2.msra.mxu0 %v8821_v46  ;;  %v3437_v37 = vand.u32 4294901760, %v9015_v21  ;;  %v9065_v56 = vand.u32 4294901760, %v446_v5 }
 0x22d   : > { %11847 = vst [vmem:[#allocation81_spill] sm:$0xff] %v9029_v14  ;;  %3372 = vmatpush1.msra.mxu1 %v11849_v13  ;;  %11850 = vst [vmem:[#allocation108_spill] sm:$0xff] %v9039_v40  ;;  %v9052_v13 = vsub.f32 %v8950_v52, %v11853_v7  ;;  %3129 = vmatprep.subr.mxu0 %v8859_v34  ;;  %v3443_v52 = vand.u32 4294901760, %v9026_v43  ;;  %v9074_v46 = vsub.f32 %v448_v26, %v9031_v48  ;;  %v275_v7 = vld [vmem:[%s5948_s27 + $0x28] sm:$0xff] }
 0x22e   : > { %3378 = vmatprep.subr.mxu1 %v11852_v23  ;;  %v9057_v25 = vsub.f32 %v8937_v39, %v11854_v11  ;;  %v11856_v23 = vand.u32 4294901760, %v8852_v30  ;;  %11857 = vst [vmem:[#allocation117_spill] sm:$0xff] %v9065_v56  ;;  %v11858_v39 = vand.u32 4294901760, %v8887_v58  ;;  %v11860_v30 = vand.u32 4294901760, %v8974_v53  ;;  %3131 = vmatpush2.msra.mxu0 %v8861_v1  ;;  %v443_v1 = vld [vmem:[#allocation5 + $0x538] sm:$0xff] }
 0x22f   : > { %11859 = vst [vmem:[#allocation113_spill] sm:$0xff] %v9074_v46  ;;  %v11862_v11 = vand.u32 4294901760, %v8898_v47  ;;  %v9092_v26 = vand.u32 4294901760, %v445_v16  ;;  %v9095_v34 = vand.u32 4294901760, %v442_v55  ;;  %3133 = vmatprep.subr.mxu0 %v8900_v33  ;;  %v3449_v47 = vand.u32 4294901760, %v9052_v13 }
 0x230   : > { %3384 = vmatpush1.msra.mxu1 %v11856_v23  ;;  %v9079_v21 = vsub.f32 %v8974_v53, %v11860_v30  ;;  %v9081_v23 = vand.u32 4294901760, %v444_v44  ;;  %v274_v30 = vld [vmem:[%s5948_s27 + $0x20] sm:$0xff]  ;;  %v11864_v53 = vand.u32 4294901760, %v8923_v61  ;;  %3135 = vmatpush2.msra.mxu0 %v8889_v32  ;;  %v11866_v43 = vand.u32 4294901760, %v8928_v49  ;;  %s5722_s27 = sshll.u32 %s5795_s23, 4  ;;  %s5723_s27 = int_to_ptr.vmem [resolvable:$false] %s5722_s27 }
 0x231   : > { %3390 = vmatprep.subr.mxu1 %v11858_v39  ;;  %v11863_v39 = vand.u32 4294901760, %v8992_v50  ;;  %v9112_v33 = vsub.f32 %v446_v5, %v9065_v56  ;;  %v11867_v61 = vand.u32 4294901760, %v9018_v42  ;;  %3137 = vmatprep.subr.mxu0 %v8939_v2  ;;  %v9140_v2 = vand.u32 4294901760, %v443_v1  ;;  %s5724_s22 = scalar_lea.vmem %s5723_s27, 256  ;;  %p5725_p6 = scmp.lt.s32.totalorder %s5251_s6, %s5723_s27 }
 0x232   : > { %11861 = vst [vmem:[#allocation120_spill] sm:$0xff] %v9081_v23  ;;  %3396 = vmatpush2.msra.mxu1 %v11862_v11  ;;  %v3455_v11 = vand.u32 4294901760, %v9057_v25  ;;  %v11868_v25 = vand.u32 4294901760, %v9003_v63  ;;  %v3467_v49 = vand.u32 4294901760, %v9079_v21  ;;  %v9129_v5 = vsub.f32 %v444_v44, %v9081_v23  ;;  %3139 = vmatpush2.msra.mxu0 %v8930_v59  ;;  %p5726_p12 = scmp.lt.s32.totalorder %s5724_s22, %s5718_s16 }
 0x233   : > { %v9090_v58 = vsub.f32 %v8992_v50, %v11863_v39  ;;  %3402 = vmatprep.subr.mxu1 %v11864_v53  ;;  %v9106_v50 = vsub.f32 %v8989_v57, %v9029_v14  ;;  %v9117_v53 = vsub.f32 %v9018_v42, %v11867_v61  ;;  %v9124_v57 = vand.u32 4294901760, %v275_v7  ;;  %3141 = vmatprep.subr.mxu0 %v8965_v36  ;;  %v438_v42 = vld [vmem:[#allocation5 + $0x510] sm:$0xff] }
 0x234   : > { %3408 = vmatpush2.msra.mxu1 %v11866_v43  ;;  %v9122_v13 = vsub.f32 %v9003_v63, %v11868_v25  ;;  %11870 = vst [vmem:[#allocation107_spill] sm:$0xff] %v9129_v5  ;;  %v441_v43 = vld [vmem:[#allocation5 + $0x528] sm:$0xff]  ;;  %v9132_v39 = vsub.f32 %v447_v6, %v9059_v31  ;;  %v9134_v61 = vand.u32 4294901760, %v274_v30  ;;  %v11873_v25 = vand.u32 4294901760, %v8963_v24  ;;  %v440_v6 = vld [vmem:[#allocation5 + $0x520] sm:$0xff]  ;;  %v439_v63 = vld [vmem:[#allocation5 + $0x518] sm:$0xff]  ;;  %3143 = vmatpush2.msra.mxu0 %v8947_v8  ;;  %p5727_p3 = por %p5726_p12, %p5725_p6 }
 0x235   : > { %11865 = vst [vmem:[#allocation114_spill] sm:$0xff] %v9106_v50  ;;  %11869 = vst [vmem:[#allocation112_spill] sm:$0xff] %v9124_v57  ;;  %3414 = vmatprep.subr.mxu1 %v3413_v29  ;;  %v3461_v32 = vand.u32 4294901760, %v9090_v58  ;;  %v11874_v29 = vand.u32 4294901760, %v9043_v10  ;;  %v9148_v21 = vsub.f32 %v442_v55, %v9095_v34  ;;  %v11875_v24 = vand.u32 4294901760, %v9039_v40  ;;  %3145 = vmatprep.subr.mxu0 %v8985_v0 }
 0x236   : > { %11871 = vst [vmem:[#allocation122_spill] sm:$0xff] %v9132_v39  ;;  %11872 = vst [vmem:[#allocation121_spill] sm:$0xff] %v9134_v61  ;;  %3420 = vmatpush2.msra.mxu1 %v11873_v25  ;;  %v11877_v55 = vand.u32 4294901760, %v8983_v12  ;;  %v3479_v36 = vand.u32 4294901760, %v9122_v13  ;;  %v9172_v59 = vand.u32 4294901760, %v440_v6  ;;  %v437_v12 = vld [vmem:[#allocation5 + $0x508] sm:$0xff]  ;;  %3147 = vmatpush2.msra.mxu0 %v8987_v38  ;;  %v9186_v0 = vsub.f32 %v443_v1, %v9140_v2  ;;  %p5728_p9 = pnand %p5727_p3, %p5721_p2 }
 0x237   : > { %v9145_v44 = vsub.f32 %v9043_v10, %v11874_v29  ;;  %3426 = vmatprep.subr.mxu1 %v3425_v18  ;;  %v9154_v25 = vsub.f32 %v9039_v40, %v11875_v24  ;;  %v9159_v29 = vsub.f32 %v445_v16, %v9092_v26  ;;  %v3473_v18 = vand.u32 4294901760, %v9117_v53  ;;  %3149 = vmatprep.subr.mxu0 %v9029_v14 }
 0x238   : > { %3432 = vmatpush2.msra.mxu1 %v11877_v55  ;;  %v9166_v10 = vand.u32 4294901760, %v441_v43  ;;  %v9169_v24 = vsub.f32 %v275_v7, %v9124_v57  ;;  %v9174_v16 = vand.u32 4294901760, %v439_v63  ;;  %v436_v55 = vld [vmem:[#allocation5 + $0x500] sm:$0xff]  ;;  %v9178_v53 = vsub.f32 %v274_v30, %v9134_v61  ;;  %3151 = vmatpush2.msra.mxu0 %v9031_v48 }
 0x239   : > { %11876 = vst [vmem:[#allocation116_spill] sm:$0xff] %v9159_v29  ;;  %3438 = vmatprep.subr.mxu1 %v3437_v37  ;;  %v3485_v7 = vand.u32 4294901760, %v9145_v44  ;;  %v9182_v13 = vand.u32 4294901760, %v438_v42  ;;  %v3491_v58 = vand.u32 4294901760, %v9154_v25  ;;  %v11879_v30 = vand.u32 4294901760, %v9106_v50  ;;  %3153 = vmatprep.subr.mxu0 %v9059_v31 }
 0x23a   : > { %11878 = vst [vmem:[#allocation109_spill] sm:$0xff] %v9166_v10  ;;  %3444 = vmatpush2.msra.mxu1 %v3443_v52  ;;  %v11880_v52 = vand.u32 4294901760, %v9074_v46  ;;  %v9198_v1 = vand.u32 4294901760, %v437_v12  ;;  %v9200_v37 = vand.u32 4294901760, %v436_v55  ;;  %v9204_v25 = vsub.f32 %v441_v43, %v9166_v10  ;;  %3155 = vmatpush2.msra.mxu0 %v9065_v56 }
 0x23b   : > { %3450 = vmatprep.subr.mxu1 %v3449_v47  ;;  %v3496_v8 = vsub.f32 %v9106_v50, %v11879_v30  ;;  %v9208_v30 = vsub.f32 %v440_v6, %v9172_v59  ;;  %v9217_v43 = vsub.f32 %v438_v42, %v9182_v13  ;;  %v11882_v47 = vand.u32 4294901760, %v9112_v33  ;;  %3157 = vmatprep.subr.mxu0 %v9092_v26 }
 0x23c   : > { %v3502_v44 = vsub.f32 %v9074_v46, %v11880_v52  ;;  %3456 = vmatpush2.msra.mxu1 %v3455_v11  ;;  %v11881_v52 = vand.u32 4294901760, %v9132_v39  ;;  %v9224_v31 = vsub.f32 %v439_v63, %v9174_v16  ;;  %v11883_v11 = vand.u32 4294901760, %v9159_v29  ;;  %3159 = vmatpush2.msra.mxu0 %v9081_v23 }
 0x23d   : > { %3462 = vmatprep.subr.mxu1 %v3461_v32  ;;  %v3514_v32 = vsub.f32 %v9112_v33, %v11882_v47  ;;  %v9233_v47 = vsub.f32 %v436_v55, %v9200_v37  ;;  %v11885_v63 = vand.u32 4294901760, %v9169_v24  ;;  %3161 = vmatprep.subr.mxu0 %v9140_v2  ;;  %v11888_v55 = vand.u32 4294901760, %v9178_v53 }
 0x23e   : > { %v3508_v38 = vsub.f32 %v9132_v39, %v11881_v52  ;;  %3468 = vmatpush2.msra.mxu1 %v3467_v49  ;;  %v3497_v52 = vand.u32 4294901760, %v3496_v8  ;;  %v3503_v48 = vand.u32 4294901760, %v3502_v44  ;;  %v3520_v49 = vsub.f32 %v9159_v29, %v11883_v11  ;;  %3163 = vmatpush2.msra.mxu0 %v9095_v34 }
 0x23f   : > { %3474 = vmatprep.subr.mxu1 %v3473_v18  ;;  %11884 = vst [vmem:[#allocation118_spill] sm:$0xff] %v9233_v47  ;;  %v3179_v6 = vsub.f32 %v9169_v24, %v11885_v63  ;;  %v9240_v8 = vsub.f32 %v437_v12, %v9198_v1  ;;  %v11887_v11 = vand.u32 4294901760, %v9129_v5  ;;  %v3185_v42 = vsub.f32 %v9178_v53, %v11888_v55 }
 0x240   : > { %3480 = vmatpush2.msra.mxu1 %v3479_v36  ;;  %v3509_v44 = vand.u32 4294901760, %v3508_v38  ;;  %v3515_v63 = vand.u32 4294901760, %v3514_v32  ;;  %v11889_v12 = vand.u32 4294901760, %v9186_v0  ;;  %3165 = vmatprep.subr.mxu0 %v9166_v10  ;;  %v11891_v32 = vand.u32 4294901760, %v9204_v25 }
 0x241   : > { %11886 = vst [vmem:[#allocation123_spill] sm:$0xff] %v9240_v8  ;;  %3486 = vmatprep.subr.mxu1 %v3485_v7  ;;  %v3526_v36 = vsub.f32 %v9129_v5, %v11887_v11  ;;  %v3521_v7 = vand.u32 4294901760, %v3520_v49  ;;  %v11890_v11 = vand.u32 4294901760, %v9148_v21  ;;  %3167 = vmatpush2.msra.mxu0 %v9172_v59  ;;  %v10775_v38 = vand.u32 4294901760, %v9240_v8 }
 0x242   : > { %3492 = vmatpush2.msra.mxu1 %v3491_v58  ;;  %v3532_v18 = vsub.f32 %v9186_v0, %v11889_v12  ;;  %v3180_v58 = vand.u32 4294901760, %v3179_v6  ;;  %v3544_v12 = vsub.f32 %v9204_v25, %v11891_v32  ;;  %3169 = vmatprep.subr.mxu0 %v9174_v16  ;;  %v3186_v49 = vand.u32 4294901760, %v3185_v42 }
 0x243   : > { %3498 = vmatprep.subr.mxu1 %v3497_v52  ;;  %v3538_v55 = vsub.f32 %v9148_v21, %v11890_v11  ;;  %v3527_v52 = vand.u32 4294901760, %v3526_v36  ;;  %v11892_v10 = vand.u32 4294901760, %v9208_v30  ;;  %v10774_v23 = vand.u32 4294901760, %v9233_v47  ;;  %3171 = vmatpush2.msra.mxu0 %v9182_v13 }
 0x244   : > { %3504 = vmatpush2.msra.mxu1 %v3503_v48  ;;  %v3533_v48 = vand.u32 4294901760, %v3532_v18  ;;  %v11893_v6 = vand.u32 4294901760, %v9224_v31  ;;  %3173 = vmatprep.subr.mxu0 %v9198_v1  ;;  %v11894_v42 = vand.u32 4294901760, %v9217_v43  ;;  %v3568_v18 = vsub.f32 %v9240_v8, %v10775_v38  ;;  %v11912_v38 = vld [vmem:[#allocation90_spill] sm:$0xff] }
 0x245   : > { %3510 = vmatprep.subr.mxu1 %v3509_v44  ;;  %v3550_v11 = vsub.f32 %v9208_v30, %v11892_v10  ;;  %v3539_v44 = vand.u32 4294901760, %v3538_v55  ;;  %3175 = vmatpush2.msra.mxu0 %v9200_v37  ;;  %v3545_v10 = vand.u32 4294901760, %v3544_v12  ;;  %v11895_v12 = vld [vmem:[#allocation12_spill] sm:$0xff] }
 0x246   : > { %3516 = vmatpush2.msra.mxu1 %v3515_v63  ;;  %v3556_v32 = vsub.f32 %v9224_v31, %v11893_v6  ;;  %v3562_v36 = vsub.f32 %v9217_v43, %v11894_v42  ;;  %3181 = vmatprep.mubr.f32.mxu0 %v3180_v58  ;;  %v3569_v6 = vand.u32 4294901760, %v3568_v18  ;;  %v11901_v42 = vld [vmem:[#allocation21_spill] sm:$0xff] }
 0x247   : > { %3522 = vmatprep.subr.mxu1 %v3521_v7  ;;  %3187 = vmatmul.mubr.f32.vlgmr.msra.gmra.mxu0 %v3186_v49  ;;  %v3551_v63 = vand.u32 4294901760, %v3550_v11  ;;  %v3574_v7 = vsub.f32 %v9233_v47, %v10774_v23  ;;  %v11897_v11 = vld [vmem:[#allocation15_spill] sm:$0xff]  ;;  %v11904_v18 = vld [vmem:[#allocation49_spill] sm:$0xff] }
 0x248   : > { %3528 = vmatpush2.msra.mxu1 %v3527_v52  ;;  %3588 = vmatprep.subr.mxu0 %v8332_v22  ;;  %v3557_v55 = vand.u32 4294901760, %v3556_v32  ;;  %v3563_v58 = vand.u32 4294901760, %v3562_v36  ;;  %v11896_v52 = vld [vmem:[#allocation73_spill] sm:$0xff]  ;;  %v11899_v32 = vld [vmem:[#allocation36_spill] sm:$0xff]  ;;  %v11902_v36 = vld [vmem:[#allocation14_spill] sm:$0xff] }
 0x249   : > { %3534 = vmatprep.subr.mxu1 %v3533_v48  ;;  %3591 = vmatpush1.msra.mxu0 %v8338_v15  ;;  %v3575_v49 = vand.u32 4294901760, %v3574_v7  ;;  %v11898_v48 = vld [vmem:[#allocation38_spill] sm:$0xff]  ;;  %v11906_v7 = vld [vmem:[#allocation57_spill] sm:$0xff]  ;;  %v11911_v23 = vld [vmem:[#allocation95_spill] sm:$0xff] }
 0x24a   : > { %3540 = vmatpush2.msra.mxu1 %v3539_v44  ;;  %3594 = vmatprep.subr.mxu0 %v11895_v12  ;;  %v11900_v44 = vld [vmem:[#allocation17_spill] sm:$0xff] }
 0x24b   : > { %3546 = vmatprep.subr.mxu1 %v3545_v10  ;;  %3597 = vmatpush1.msra.mxu0 %v11896_v52  ;;  %v11903_v10 = vld [vmem:[#allocation20_spill] sm:$0xff] }
 0x24c   : > { %3552 = vmatpush2.msra.mxu1 %v3551_v63  ;;  %3600 = vmatprep.subr.mxu0 %v11897_v11  ;;  %v11905_v63 = vld [vmem:[#allocation41_spill] sm:$0xff] }
 0x24d   : > { %3558 = vmatprep.subr.mxu1 %v3557_v55  ;;  %3603 = vmatpush1.msra.mxu0 %v11898_v48  ;;  %v11907_v55 = vld [vmem:[#allocation64_spill] sm:$0xff] }
 0x24e   : > { %3564 = vmatpush2.msra.mxu1 %v3563_v58  ;;  %3606 = vmatprep.subr.mxu0 %v11899_v32  ;;  %v11908_v58 = vld [vmem:[#allocation45_spill] sm:$0xff] }
 0x24f   : > { %3570 = vmatprep.subr.mxu1 %v3569_v6  ;;  %3578 = vmatprep.mubr.f32.mxu1 %v9124_v57  ;;  %v11909_v6 = vld [vmem:[#allocation87_spill] sm:$0xff]  ;;  %v11914_v57 = vld [vmem:[#allocation101_spill] sm:$0xff] }
 0x250   : > { %3576 = vmatpush2.msra.mxu1 %v3575_v49  ;;  %3609 = vmatpush1.msra.mxu0 %v11900_v44  ;;  %v11910_v49 = vld [vmem:[#allocation69_spill] sm:$0xff] }
 0x251   : > { %3580 = vmatmul.mubr.f32.vlgmr.msra.gmra.mxu1 %v9134_v61  ;;  %3612 = vmatprep.subr.mxu0 %v11901_v42  ;;  %v11913_v61 = vld [vmem:[#allocation89_spill] sm:$0xff] }
 0x252   : > { %3790 = vmatprep.subr.mxu1 %v11902_v36  ;;  %3615 = vmatpush1.msra.mxu0 %v11903_v10 }
 0x253   : > { %3792 = vmatpush1.msra.mxu1 %v11904_v18  ;;  %3618 = vmatprep.subr.mxu0 %v11905_v63 }
 0x254   : > { %3794 = vmatprep.subr.mxu1 %v11906_v7  ;;  %3621 = vmatpush1.msra.mxu0 %v11907_v55 }
 0x255   : > { %3796 = vmatpush1.msra.mxu1 %v8329_v4  ;;  %3624 = vmatprep.subr.mxu0 %v11908_v58  ;;  %v11915_v4 = vld [vmem:[#allocation83_spill] sm:$0xff]  ;;  %v11916_v58 = vld [vmem:[#allocation42_spill] sm:$0xff] }
 0x256   : > { %3798 = vmatprep.subr.mxu1 %v8340_v41  ;;  %3627 = vmatpush1.msra.mxu0 %v11909_v6  ;;  %v11917_v41 = vld [vmem:[#allocation79_spill] sm:$0xff]  ;;  %v11918_v6 = vld [vmem:[#allocation44_spill] sm:$0xff] }
 0x257   : > { %3800 = vmatpush1.msra.mxu1 %v11910_v49  ;;  %3630 = vmatprep.subr.mxu0 %v11911_v23  ;;  %v11919_v49 = vld [vmem:[#allocation98_spill] sm:$0xff] }
 0x258   : > { %3802 = vmatprep.subr.mxu1 %v8350_v27  ;;  %3633 = vmatpush1.msra.mxu0 %v11912_v38  ;;  %v11920_v23 = vld [vmem:[#allocation18_spill] sm:$0xff]  ;;  %v11921_v27 = vld [vmem:[#allocation13_spill] sm:$0xff]  ;;  %v11922_v38 = vld [vmem:[#allocation52_spill] sm:$0xff] }
 0x259   : > { %3804 = vmatpush1.msra.mxu1 %v11913_v61  ;;  %3636 = vmatprep.subr.mxu0 %v11914_v57  ;;  %v11923_v61 = vld [vmem:[#allocation93_spill] sm:$0xff] }
 0x25a   : > { %3806 = vmatprep.subr.mxu1 %v8377_v51  ;;  %3639 = vmatpush1.msra.mxu0 %v11915_v4  ;;  %v11924_v4 = vld [vmem:[#allocation80_spill] sm:$0xff] }
 0x25b   : > { %3808 = vmatpush1.msra.mxu1 %v11916_v58  ;;  %3642 = vmatprep.subr.mxu0 %v11917_v41  ;;  %v11925_v58 = vld [vmem:[#allocation53_spill] sm:$0xff]  ;;  %v11926_v41 = vld [vmem:[#allocation78_spill] sm:$0xff] }
 0x25c   : > { %3810 = vmatprep.subr.mxu1 %v11918_v6  ;;  %3645 = vmatpush1.msra.mxu0 %v11919_v49  ;;  %v11927_v49 = vld [vmem:[#allocation51_spill] sm:$0xff] }
 0x25d   : > { %3812 = vmatpush1.msra.mxu1 %v11920_v23  ;;  %3648 = vmatprep.subr.mxu0 %v11921_v27  ;;  %v11928_v23 = vld [vmem:[#allocation63_spill] sm:$0xff]  ;;  %v11929_v27 = vld [vmem:[#allocation88_spill] sm:$0xff] }
 0x25e   : > { %3814 = vmatprep.subr.mxu1 %v11922_v38  ;;  %3651 = vmatpush1.msra.mxu0 %v11923_v61  ;;  %v11930_v61 = vld [vmem:[#allocation103_spill] sm:$0xff] }
 0x25f   : > { %3816 = vmatpush1.msra.mxu1 %v8446_v19  ;;  %3654 = vmatprep.subr.mxu0 %v8652_v54  ;;  %v11931_v19 = vld [vmem:[#allocation46_spill] sm:$0xff]  ;;  %v11932_v54 = vld [vmem:[#allocation99_spill] sm:$0xff] }
 0x260   : > { %3818 = vmatprep.subr.mxu1 %v11924_v4  ;;  %3657 = vmatpush1.msra.mxu0 %v11925_v58  ;;  %v11933_v4 = vld [vmem:[#allocation91_spill] sm:$0xff]  ;;  %v11934_v58 = vld [vmem:[#allocation106_spill] sm:$0xff] }
 0x261   : > { %3820 = vmatpush1.msra.mxu1 %v11926_v41  ;;  %3660 = vmatprep.subr.mxu0 %v8662_v9  ;;  %v11935_v41 = vld [vmem:[#allocation26_spill] sm:$0xff]  ;;  %v11936_v9 = vld [vmem:[#allocation100_spill] sm:$0xff] }
 0x262   : > { %3822 = vmatprep.subr.mxu1 %v11927_v49  ;;  %3663 = vmatpush1.msra.mxu0 %v11928_v23  ;;  %v11937_v23 = vld [vmem:[#allocation30_spill] sm:$0xff] }
 0x263   : > { %3824 = vmatpush1.msra.mxu1 %v11929_v27  ;;  %3666 = vmatprep.subr.mxu0 %v8714_v35  ;;  %v11938_v27 = vld [vmem:[#allocation27_spill] sm:$0xff] }
 0x264   : > { %3826 = vmatprep.subr.mxu1 %v11930_v61  ;;  %3669 = vmatpush1.msra.mxu0 %v11931_v19  ;;  %v11939_v35 = vld [vmem:[#allocation119_spill] sm:$0xff]  ;;  %v11940_v19 = vld [vmem:[#allocation32_spill] sm:$0xff] }
 0x265   : > { %3828 = vmatpush1.msra.mxu1 %v11932_v54  ;;  %3672 = vmatprep.subr.mxu0 %v11933_v4  ;;  %v11941_v4 = vld [vmem:[#allocation40_spill] sm:$0xff] }
 0x266   : > { %3830 = vmatprep.subr.mxu1 %v11934_v58  ;;  %3675 = vmatpush1.msra.mxu0 %v11935_v41  ;;  %v11942_v41 = vld [vmem:[#allocation61_spill] sm:$0xff] }
 0x267   : > { %3832 = vmatpush1.msra.mxu1 %v11936_v9  ;;  %3678 = vmatprep.subr.mxu0 %v8777_v45  ;;  %v11943_v9 = vld [vmem:[#allocation39_spill] sm:$0xff] }
 0x268   : > { %3834 = vmatprep.subr.mxu1 %v11937_v23  ;;  %3681 = vmatpush1.msra.mxu0 %v11938_v27  ;;  %v11944_v45 = vld [vmem:[#allocation55_spill] sm:$0xff]  ;;  %v11946_v27 = vld [vmem:[#allocation65_spill] sm:$0xff] }
 0x269   : > { %3836 = vmatpush1.msra.mxu1 %v11939_v35  ;;  %3684 = vmatprep.subr.mxu0 %v8788_v17  ;;  %v11945_v23 = vld [vmem:[#allocation43_spill] sm:$0xff] }
 0x26a   : > { %3838 = vmatprep.subr.mxu1 %v11940_v19  ;;  %3687 = vmatpush2.msra.mxu0 %v8783_v62  ;;  %v11947_v17 = vld [vmem:[#allocation71_spill] sm:$0xff]  ;;  %v11948_v19 = vld [vmem:[#allocation84_spill] sm:$0xff] }
 0x26b   : > { %3840 = vmatpush1.msra.mxu1 %v11941_v4  ;;  %3690 = vmatprep.subr.mxu0 %v8824_v20  ;;  %v11949_v62 = vld [vmem:[#allocation23_spill] sm:$0xff]  ;;  %v11950_v4 = vld [vmem:[#allocation25_spill] sm:$0xff]  ;;  %v11951_v20 = vld [vmem:[#allocation50_spill] sm:$0xff] }
 0x26c   : > { %3842 = vmatprep.subr.mxu1 %v11942_v41  ;;  %3693 = vmatpush2.msra.mxu0 %v11943_v9  ;;  %v11952_v9 = vld [vmem:[#allocation34_spill] sm:$0xff] }
 0x26d   : > { %3844 = vmatpush1.msra.mxu1 %v11944_v45  ;;  %3696 = vmatprep.subr.mxu0 %v11945_v23  ;;  %v11953_v23 = vld [vmem:[#allocation54_spill] sm:$0xff] }
 0x26e   : > { %3846 = vmatprep.subr.mxu1 %v11946_v27  ;;  %3699 = vmatpush2.msra.mxu0 %v8847_v28  ;;  %v11954_v27 = vld [vmem:[#allocation92_spill] sm:$0xff] }
 0x26f   : > { %3848 = vmatpush1.msra.mxu1 %v11947_v17  ;;  %3702 = vmatprep.subr.mxu0 %v11948_v19  ;;  %v11955_v28 = vld [vmem:[#allocation16_spill] sm:$0xff]  ;;  %v11956_v17 = vld [vmem:[#allocation29_spill] sm:$0xff]  ;;  %v11957_v19 = vld [vmem:[#allocation58_spill] sm:$0xff] }
 0x270   : > { %3850 = vmatprep.subr.mxu1 %v11949_v62  ;;  %3705 = vmatpush2.msra.mxu0 %v11950_v4  ;;  %v11958_v62 = vld [vmem:[#allocation105_spill] sm:$0xff]  ;;  %v11959_v4 = vld [vmem:[#allocation22_spill] sm:$0xff] }
 0x271   : > { %3852 = vmatpush1.msra.mxu1 %v11951_v20  ;;  %3708 = vmatprep.subr.mxu0 %v8914_v60  ;;  %v11960_v20 = vld [vmem:[#allocation102_spill] sm:$0xff] }
 0x272   : > { %3854 = vmatprep.subr.mxu1 %v11952_v9  ;;  %3711 = vmatpush2.msra.mxu0 %v8909_v3  ;;  %v11961_v60 = vld [vmem:[#allocation66_spill] sm:$0xff]  ;;  %v11962_v9 = vld [vmem:[#allocation85_spill] sm:$0xff] }
 0x273   : > { %3856 = vmatpush2.msra.mxu1 %v11953_v23  ;;  %3714 = vmatprep.subr.mxu0 %v11954_v27  ;;  %v11963_v3 = vld [vmem:[#allocation74_spill] sm:$0xff]  ;;  %v11964_v23 = vld [vmem:[#allocation104_spill] sm:$0xff]  ;;  %v11965_v27 = vld [vmem:[#allocation35_spill] sm:$0xff] }
 0x274   : > { %3858 = vmatprep.subr.mxu1 %v11955_v28  ;;  %3717 = vmatpush2.msra.mxu0 %v11956_v17  ;;  %v11966_v28 = vld [vmem:[#allocation115_spill] sm:$0xff] }
 0x275   : > { %3860 = vmatpush2.msra.mxu1 %v11957_v19  ;;  %3720 = vmatprep.subr.mxu0 %v11958_v62  ;;  %v11967_v17 = vld [vmem:[#allocation47_spill] sm:$0xff]  ;;  %v11968_v62 = vld [vmem:[#allocation56_spill] sm:$0xff] }
 0x276   : > { %3862 = vmatprep.subr.mxu1 %v11959_v4  ;;  %3723 = vmatpush2.msra.mxu0 %v11960_v20  ;;  %v11969_v20 = vld [vmem:[#allocation60_spill] sm:$0xff] }
 0x277   : > { %3864 = vmatpush2.msra.mxu1 %v11961_v60  ;;  %3726 = vmatprep.subr.mxu0 %v11962_v9  ;;  %v11970_v9 = vld [vmem:[#allocation82_spill] sm:$0xff] }
 0x278   : > { %3866 = vmatprep.subr.mxu1 %v11963_v3  ;;  %3729 = vmatpush2.msra.mxu0 %v11964_v23  ;;  %v11971_v23 = vld [vmem:[#allocation96_spill] sm:$0xff] }
 0x279   : > { %3868 = vmatpush2.msra.mxu1 %v11965_v27  ;;  %3732 = vmatprep.subr.mxu0 %v11966_v28  ;;  %v11972_v28 = vld [vmem:[#allocation86_spill] sm:$0xff] }
 0x27a   : > { %3870 = vmatprep.subr.mxu1 %v11967_v17  ;;  %3735 = vmatpush2.msra.mxu0 %v9039_v40  ;;  %v11973_v40 = vld [vmem:[#allocation68_spill] sm:$0xff] }
 0x27b   : > { %3872 = vmatpush2.msra.mxu1 %v11968_v62  ;;  %3738 = vmatprep.subr.mxu0 %v9106_v50  ;;  %v11974_v50 = vld [vmem:[#allocation70_spill] sm:$0xff] }
 0x27c   : > { %3874 = vmatprep.subr.mxu1 %v11969_v20  ;;  %3741 = vmatpush2.msra.mxu0 %v9074_v46  ;;  %v11975_v46 = vld [vmem:[#allocation72_spill] sm:$0xff] }
 0x27d   : > { %3876 = vmatpush2.msra.mxu1 %v11970_v9  ;;  %3744 = vmatprep.subr.mxu0 %v9132_v39  ;;  %v11976_v39 = vld [vmem:[#allocation97_spill] sm:$0xff] }
 0x27e   : > { %3878 = vmatprep.subr.mxu1 %v11971_v23  ;;  %3747 = vmatpush2.msra.mxu0 %v9112_v33 }
 0x27f   : > { %3880 = vmatpush2.msra.mxu1 %v11972_v28  ;;  %3750 = vmatprep.subr.mxu0 %v9159_v29  ;;  %v11977_v29 = vld [vmem:[#allocation110_spill] sm:$0xff] }
 0x280   : > { %3882 = vmatprep.subr.mxu1 %v11973_v40  ;;  %3753 = vmatpush2.msra.mxu0 %v9129_v5  ;;  %v11978_v5 = vld [vmem:[#allocation111_spill] sm:$0xff] }
 0x281   : > { %3884 = vmatpush2.msra.mxu1 %v11974_v50  ;;  %3756 = vmatprep.subr.mxu0 %v9186_v0 }
 0x282   : > { %3886 = vmatprep.subr.mxu1 %v11975_v46  ;;  %3759 = vmatpush2.msra.mxu0 %v9148_v21 }
 0x283   : > { %3888 = vmatpush2.msra.mxu1 %v11976_v39  ;;  %3762 = vmatprep.subr.mxu0 %v9204_v25 }
 0x284   : > { %3890 = vmatprep.subr.mxu1 %v9029_v14  ;;  %3765 = vmatpush2.msra.mxu0 %v9208_v30  ;;  %v11979_v14 = vld [vmem:[#allocation120_spill] sm:$0xff] }
 0x285   : > { %3892 = vmatpush2.msra.mxu1 %v11977_v29  ;;  %3768 = vmatprep.subr.mxu0 %v9224_v31 }
 0x286   : > { %3894 = vmatprep.subr.mxu1 %v11978_v5  ;;  %3771 = vmatpush2.msra.mxu0 %v9217_v43  ;;  %v11980_v5 = vand.u32 4294901760, %v8332_v22  ;;  %v11985_v22 = vand.u32 4294901760, %v11897_v11  ;;  %v11993_v11 = vand.u32 4294901760, %v11905_v63 }
 0x287   : > { %3896 = vmatpush2.msra.mxu1 %v9065_v56  ;;  %3774 = vmatprep.subr.mxu0 %v9240_v8  ;;  %v11981_v56 = vand.u32 4294901760, %v8338_v15  ;;  %v11982_v8 = vld [vmem:[#allocation109_spill] sm:$0xff]  ;;  %v11986_v15 = vand.u32 4294901760, %v11898_v48 }
 0x288   : > { %3898 = vmatprep.subr.mxu1 %v9092_v26  ;;  %3777 = vmatpush2.msra.mxu0 %v9233_v47  ;;  %v11983_v47 = vand.u32 4294901760, %v11895_v12  ;;  %v11991_v12 = vand.u32 4294901760, %v11901_v42  ;;  %v11996_v48 = vld [vmem:[#allocation45_spill] sm:$0xff]  ;;  %v11999_v42 = vld [vmem:[#allocation87_spill] sm:$0xff] }
 0x289   : > { %3780 = vmatprep.mubr.f32.mxu0 %v9169_v24  ;;  %3900 = vmatpush2.msra.mxu1 %v11979_v14  ;;  %v11984_v14 = vand.u32 4294901760, %v11896_v52  ;;  %v11992_v52 = vand.u32 4294901760, %v11903_v10  ;;  %v12001_v10 = vld [vmem:[#allocation69_spill] sm:$0xff] }
 0x28a   : > { %3783 = vmatmul.mubr.f32.vlgmr.msra.gmra.mxu0 %v9178_v53  ;;  %3902 = vmatprep.subr.mxu1 %v9140_v2 }
 0x28b   : > { %3933 = vmatprep.subr.mxu0 %v11980_v5  ;;  %3904 = vmatpush2.msra.mxu1 %v9095_v34  ;;  %v11988_v5 = vand.u32 4294901760, %v9169_v24  ;;  %v11994_v24 = vand.u32 4294901760, %v11907_v55 }
 0x28c   : > { %3937 = vmatpush1.msra.mxu0 %v11981_v56  ;;  %3906 = vmatprep.subr.mxu1 %v11982_v8  ;;  %v11987_v56 = vand.u32 4294901760, %v11899_v32  ;;  %v11997_v32 = vand.u32 4294901760, %v11996_v48  ;;  %v12017_v48 = vld [vmem:[#allocation13_spill] sm:$0xff] }
 0x28d   : > { %3941 = vmatprep.subr.mxu0 %v11983_v47  ;;  %3908 = vmatpush2.msra.mxu1 %v9172_v59  ;;  %v11990_v47 = vand.u32 4294901760, %v9178_v53  ;;  %v11995_v53 = vld [vmem:[#allocation59_spill] sm:$0xff] }
 0x28e   : > { %3945 = vmatpush1.msra.mxu0 %v11984_v14  ;;  %3910 = vmatprep.subr.mxu1 %v9174_v16  ;;  %v11989_v14 = vand.u32 4294901760, %v11900_v44  ;;  %v11998_v44 = vld [vmem:[#allocation67_spill] sm:$0xff] }
 0x28f   : > { %3949 = vmatprep.subr.mxu0 %v11985_v22  ;;  %3912 = vmatpush2.msra.mxu1 %v9182_v13  ;;  %v12004_v22 = vld [vmem:[#allocation75_spill] sm:$0xff] }
 0x290   : > { %3953 = vmatpush1.msra.mxu0 %v11986_v15  ;;  %3914 = vmatprep.subr.mxu1 %v9198_v1  ;;  %v12007_v15 = vld [vmem:[#allocation89_spill] sm:$0xff] }
 0x291   : > { %3957 = vmatprep.subr.mxu0 %v11987_v56  ;;  %3916 = vmatpush2.msra.mxu1 %v9200_v37  ;;  %v12008_v56 = vand.u32 4294901760, %v11914_v57  ;;  %v12018_v57 = vand.u32 4294901760, %v12017_v48 }
 0x292   : > { %3920 = vmatprep.mubr.f32.mxu1 %v11988_v5  ;;  %3961 = vmatpush1.msra.mxu0 %v11989_v14  ;;  %v12009_v5 = vld [vmem:[#allocation83_spill] sm:$0xff] }
 0x293   : > { %3924 = vmatmul.mubr.f32.vlgmr.msra.gmra.mxu1 %v11990_v47  ;;  %3965 = vmatprep.subr.mxu0 %v11991_v12  ;;  %v12010_v14 = vand.u32 4294901760, %v12009_v5  ;;  %v12011_v47 = vld [vmem:[#allocation42_spill] sm:$0xff]  ;;  %v12012_v12 = vld [vmem:[#allocation79_spill] sm:$0xff] }
 0x294   : > { %4196 = vmatprep.subr.mxu1 %v11902_v36  ;;  %3969 = vmatpush1.msra.mxu0 %v11992_v52  ;;  %v12000_v36 = vand.u32 4294901760, %v11999_v42  ;;  %v12013_v52 = vand.u32 4294901760, %v12012_v12  ;;  %v12022_v42 = vld [vmem:[#allocation19_spill] sm:$0xff] }
 0x295   : > { %4198 = vmatpush1.msra.mxu1 %v11904_v18  ;;  %3973 = vmatprep.subr.mxu0 %v11993_v11  ;;  %v12002_v18 = vld [vmem:[#allocation95_spill] sm:$0xff]  ;;  %v12014_v11 = vld [vmem:[#allocation98_spill] sm:$0xff] }
 0x296   : > { %4200 = vmatprep.subr.mxu1 %v11906_v7  ;;  %3977 = vmatpush1.msra.mxu0 %v11994_v24  ;;  %v12003_v63 = vand.u32 4294901760, %v12002_v18  ;;  %v12005_v7 = vld [vmem:[#allocation90_spill] sm:$0xff]  ;;  %v12015_v24 = vand.u32 4294901760, %v12014_v11  ;;  %v12037_v12 = vld [vmem:[#allocation91_spill] sm:$0xff] }
 0x297   : > { %4202 = vmatpush1.msra.mxu1 %v11995_v53  ;;  %3981 = vmatprep.subr.mxu0 %v11997_v32  ;;  %v12006_v55 = vand.u32 4294901760, %v12005_v7  ;;  %v12016_v53 = vld [vmem:[#allocation18_spill] sm:$0xff] }
 0x298   : > { %4204 = vmatprep.subr.mxu1 %v11998_v44  ;;  %3985 = vmatpush1.msra.mxu0 %v12000_v36  ;;  %v12021_v44 = vld [vmem:[#allocation37_spill] sm:$0xff]  ;;  %v12023_v36 = vand.u32 4294901760, %v12022_v42 }
 0x299   : > { %4206 = vmatpush1.msra.mxu1 %v12001_v10  ;;  %3989 = vmatprep.subr.mxu0 %v12003_v63  ;;  %v12024_v10 = vld [vmem:[#allocation80_spill] sm:$0xff]  ;;  %v12027_v63 = vld [vmem:[#allocation78_spill] sm:$0xff] }
 0x29a   : > { %4208 = vmatprep.subr.mxu1 %v12004_v22  ;;  %3993 = vmatpush1.msra.mxu0 %v12006_v55  ;;  %v12028_v22 = vld [vmem:[#allocation48_spill] sm:$0xff] }
 0x29b   : > { %4210 = vmatpush1.msra.mxu1 %v12007_v15  ;;  %3997 = vmatprep.subr.mxu0 %v12008_v56  ;;  %v12029_v7 = vand.u32 4294901760, %v12028_v22  ;;  %v12032_v15 = vld [vmem:[#allocation88_spill] sm:$0xff]  ;;  %v12033_v56 = vld [vmem:[#allocation77_spill] sm:$0xff] }
 0x29c   : > { %4212 = vmatprep.subr.mxu1 %v8377_v51  ;;  %4001 = vmatpush1.msra.mxu0 %v12010_v14  ;;  %v12019_v51 = vld [vmem:[#allocation93_spill] sm:$0xff]  ;;  %v12034_v5 = vand.u32 4294901760, %v12033_v56  ;;  %v12035_v14 = vld [vmem:[#allocation46_spill] sm:$0xff]  ;;  %v12063_v56 = vld [vmem:[#allocation84_spill] sm:$0xff] }
 0x29d   : > { %4214 = vmatpush1.msra.mxu1 %v12011_v47  ;;  %4005 = vmatprep.subr.mxu0 %v12013_v52  ;;  %v12020_v32 = vand.u32 4294901760, %v12019_v51  ;;  %v12036_v47 = vand.u32 4294901760, %v12035_v14  ;;  %v12038_v52 = vand.u32 4294901760, %v12037_v12  ;;  %v12065_v14 = vld [vmem:[#allocation23_spill] sm:$0xff]  ;;  %v12068_v12 = vld [vmem:[#allocation50_spill] sm:$0xff] }
 0x29e   : > { %4216 = vmatprep.subr.mxu1 %v11918_v6  ;;  %4009 = vmatpush1.msra.mxu0 %v12015_v24  ;;  %v12025_v6 = vld [vmem:[#allocation53_spill] sm:$0xff]  ;;  %v12041_v24 = vld [vmem:[#allocation100_spill] sm:$0xff] }
 0x29f   : > { %4218 = vmatpush1.msra.mxu1 %v12016_v53  ;;  %4013 = vmatprep.subr.mxu0 %v12018_v57  ;;  %v12026_v18 = vand.u32 4294901760, %v12025_v6  ;;  %v12042_v53 = vld [vmem:[#allocation31_spill] sm:$0xff]  ;;  %v12044_v57 = vld [vmem:[#allocation30_spill] sm:$0xff] }
 0x2a0   : > { %4220 = vmatprep.subr.mxu1 %v11922_v38  ;;  %4017 = vmatpush1.msra.mxu0 %v12020_v32  ;;  %v12030_v38 = vld [vmem:[#allocation63_spill] sm:$0xff]  ;;  %v12043_v48 = vand.u32 4294901760, %v12042_v53  ;;  %v12074_v53 = vld [vmem:[#allocation54_spill] sm:$0xff] }
 0x2a1   : > { %4222 = vmatpush1.msra.mxu1 %v12021_v44  ;;  %4021 = vmatprep.subr.mxu0 %v12023_v36  ;;  %v12031_v55 = vand.u32 4294901760, %v12030_v38  ;;  %v12049_v44 = vld [vmem:[#allocation32_spill] sm:$0xff] }
 0x2a2   : > { %4224 = vmatprep.subr.mxu1 %v12024_v10  ;;  %4025 = vmatpush1.msra.mxu0 %v12026_v18  ;;  %v12052_v36 = vld [vmem:[#allocation40_spill] sm:$0xff]  ;;  %v12055_v18 = vld [vmem:[#allocation39_spill] sm:$0xff] }
 0x2a3   : > { %4226 = vmatpush1.msra.mxu1 %v12027_v63  ;;  %4029 = vmatprep.subr.mxu0 %v12029_v7  ;;  %v12053_v10 = vld [vmem:[#allocation76_spill] sm:$0xff]  ;;  %v12056_v63 = vand.u32 4294901760, %v12055_v18  ;;  %v12059_v7 = vld [vmem:[#allocation65_spill] sm:$0xff] }
 0x2a4   : > { %4228 = vmatprep.subr.mxu1 %v11927_v49  ;;  %4033 = vmatpush1.msra.mxu0 %v12031_v55  ;;  %v12039_v49 = vld [vmem:[#allocation26_spill] sm:$0xff]  ;;  %v12054_v6 = vand.u32 4294901760, %v12053_v10  ;;  %v12060_v38 = vld [vmem:[#allocation24_spill] sm:$0xff] }
 0x2a5   : > { %4230 = vmatpush1.msra.mxu1 %v12032_v15  ;;  %4037 = vmatprep.subr.mxu0 %v12034_v5  ;;  %v12040_v11 = vand.u32 4294901760, %v12039_v49  ;;  %v12061_v55 = vand.u32 4294901760, %v12060_v38  ;;  %v12062_v15 = vld [vmem:[#allocation71_spill] sm:$0xff]  ;;  %v12064_v5 = vand.u32 4294901760, %v12063_v56  ;;  %v12071_v49 = vld [vmem:[#allocation34_spill] sm:$0xff] }
 0x2a6   : > { %4232 = vmatprep.subr.mxu1 %v11930_v61  ;;  %4041 = vmatpush1.msra.mxu0 %v12036_v47  ;;  %v12045_v61 = vld [vmem:[#allocation27_spill] sm:$0xff]  ;;  %v12114_v56 = vld [vmem:[#allocation118_spill] sm:$0xff] }
 0x2a7   : > { %4234 = vmatpush1.msra.mxu1 %v11932_v54  ;;  %4045 = vmatprep.subr.mxu0 %v12038_v52  ;;  %v12046_v51 = vand.u32 4294901760, %v12045_v61  ;;  %v12047_v54 = vld [vmem:[#allocation33_spill] sm:$0xff]  ;;  %v12077_v61 = vld [vmem:[#allocation16_spill] sm:$0xff] }
 0x2a8   : > { %4236 = vmatprep.subr.mxu1 %v11934_v58  ;;  %4049 = vmatpush1.msra.mxu0 %v12040_v11  ;;  %v12048_v32 = vand.u32 4294901760, %v12047_v54  ;;  %v12050_v58 = vld [vmem:[#allocation62_spill] sm:$0xff]  ;;  %v12072_v11 = vld [vmem:[#allocation28_spill] sm:$0xff] }
 0x2a9   : > { %4238 = vmatpush1.msra.mxu1 %v12041_v24  ;;  %4053 = vmatprep.subr.mxu0 %v12043_v48  ;;  %v12051_v42 = vand.u32 4294901760, %v12050_v58  ;;  %v12073_v24 = vand.u32 4294901760, %v12072_v11  ;;  %v12075_v48 = vld [vmem:[#allocation92_spill] sm:$0xff]  ;;  %v12082_v58 = vld [vmem:[#allocation102_spill] sm:$0xff] }
 0x2aa   : > { %4240 = vmatprep.subr.mxu1 %v12044_v57  ;;  %4057 = vmatpush1.msra.mxu0 %v12046_v51  ;;  %v12076_v57 = vand.u32 4294901760, %v12075_v48  ;;  %v12078_v51 = vld [vmem:[#allocation29_spill] sm:$0xff] }
 0x2ab   : > { %4242 = vmatpush1.msra.mxu1 %v11939_v35  ;;  %4061 = vmatprep.subr.mxu0 %v12048_v32  ;;  %v12057_v35 = vld [vmem:[#allocation43_spill] sm:$0xff]  ;;  %v12079_v54 = vand.u32 4294901760, %v12078_v51  ;;  %v12080_v32 = vld [vmem:[#allocation105_spill] sm:$0xff] }
 0x2ac   : > { %4244 = vmatprep.subr.mxu1 %v12049_v44  ;;  %4065 = vmatpush2.msra.mxu0 %v12051_v42  ;;  %v12058_v22 = vand.u32 4294901760, %v12057_v35  ;;  %v12081_v44 = vand.u32 4294901760, %v12080_v32  ;;  %v12083_v42 = vand.u32 4294901760, %v12082_v58 }
 0x2ad   : > { %4246 = vmatpush1.msra.mxu1 %v12052_v36  ;;  %4069 = vmatprep.subr.mxu0 %v12054_v6  ;;  %v12084_v36 = vld [vmem:[#allocation85_spill] sm:$0xff]  ;;  %v12086_v6 = vld [vmem:[#allocation104_spill] sm:$0xff] }
 0x2ae   : > { %4248 = vmatprep.subr.mxu1 %v11942_v41  ;;  %4073 = vmatpush2.msra.mxu0 %v12056_v63  ;;  %v12066_v41 = vld [vmem:[#allocation25_spill] sm:$0xff]  ;;  %v12085_v10 = vand.u32 4294901760, %v12084_v36  ;;  %v12087_v18 = vand.u32 4294901760, %v12086_v6 }
 0x2af   : > { %4250 = vmatpush1.msra.mxu1 %v11944_v45  ;;  %4077 = vmatprep.subr.mxu0 %v12058_v22  ;;  %v12067_v47 = vand.u32 4294901760, %v12066_v41  ;;  %v12069_v45 = vld [vmem:[#allocation94_spill] sm:$0xff]  ;;  %v4363_v41 = vld [vmem:[#allocation7 + $0xe8] sm:$0xff] }
 0x2b0   : > { %4252 = vmatprep.subr.mxu1 %v12059_v7  ;;  %4081 = vmatpush2.msra.mxu0 %v12061_v55  ;;  %v12070_v52 = vand.u32 4294901760, %v12069_v45 }
 0x2b1   : > { %4254 = vmatpush1.msra.mxu1 %v12062_v15  ;;  %4085 = vmatprep.subr.mxu0 %v12064_v5  ;;  %v12116_v5 = vld [vmem:[#allocation112_spill] sm:$0xff] }
 0x2b2   : > { %4256 = vmatprep.subr.mxu1 %v12065_v14  ;;  %4089 = vmatpush2.msra.mxu0 %v12067_v47 }
 0x2b3   : > { %4258 = vmatpush1.msra.mxu1 %v12068_v12  ;;  %4093 = vmatprep.subr.mxu0 %v12070_v52  ;;  %v4346_v12 = vld [vmem:[#allocation7 + $0x60] sm:$0xff] }
 0x2b4   : > { %4260 = vmatprep.subr.mxu1 %v12071_v49  ;;  %4097 = vmatpush2.msra.mxu0 %v12073_v24 }
 0x2b5   : > { %4262 = vmatpush2.msra.mxu1 %v12074_v53  ;;  %4101 = vmatprep.subr.mxu0 %v12076_v57  ;;  %v9650_v57 = vand.u32 4294901760, %v4346_v12 }
 0x2b6   : > { %4264 = vmatprep.subr.mxu1 %v12077_v61  ;;  %4105 = vmatpush2.msra.mxu0 %v12079_v54 }
 0x2b7   : > { %4266 = vmatpush2.msra.mxu1 %v11957_v19  ;;  %4109 = vmatprep.subr.mxu0 %v12081_v44  ;;  %v12088_v19 = vld [vmem:[#allocation115_spill] sm:$0xff]  ;;  %v9664_v36 = vsub.f32 %v4346_v12, %v9650_v57 }
 0x2b8   : > { %4268 = vmatprep.subr.mxu1 %v11959_v4  ;;  %4113 = vmatpush2.msra.mxu0 %v12083_v42  ;;  %v12089_v63 = vand.u32 4294901760, %v12088_v19  ;;  %v12090_v4 = vld [vmem:[#allocation108_spill] sm:$0xff] }
 0x2b9   : > { %4270 = vmatpush2.msra.mxu1 %v11961_v60  ;;  %4117 = vmatprep.subr.mxu0 %v12085_v10  ;;  %v12091_v35 = vand.u32 4294901760, %v12090_v4  ;;  %v12092_v60 = vld [vmem:[#allocation114_spill] sm:$0xff] }
 0x2ba   : > { %4272 = vmatprep.subr.mxu1 %v11963_v3  ;;  %4121 = vmatpush2.msra.mxu0 %v12087_v18  ;;  %v12093_v22 = vand.u32 4294901760, %v12092_v60  ;;  %v12094_v3 = vld [vmem:[#allocation113_spill] sm:$0xff]  ;;  %v10813_v60 = vand.u32 4294901760, %v9664_v36 }
 0x2bb   : > { %4274 = vmatpush2.msra.mxu1 %v11965_v27  ;;  %4125 = vmatprep.subr.mxu0 %v12089_v63  ;;  %v12095_v7 = vand.u32 4294901760, %v12094_v3  ;;  %v12096_v27 = vld [vmem:[#allocation122_spill] sm:$0xff]  ;;  %v4345_v3 = vld [vmem:[#allocation7 + $0x58] sm:$0xff] }
 0x2bc   : > { %4276 = vmatprep.subr.mxu1 %v11967_v17  ;;  %4129 = vmatpush2.msra.mxu0 %v12091_v35  ;;  %v12097_v38 = vand.u32 4294901760, %v12096_v27  ;;  %v12098_v17 = vand.u32 4294901760, %v9112_v33  ;;  %v12104_v33 = vand.u32 4294901760, %v9148_v21  ;;  %v12111_v21 = vld [vmem:[#allocation117_spill] sm:$0xff] }
 0x2bd   : > { %4278 = vmatpush2.msra.mxu1 %v11968_v62  ;;  %4133 = vmatprep.subr.mxu0 %v12093_v22  ;;  %v12099_v62 = vld [vmem:[#allocation116_spill] sm:$0xff]  ;;  %v4361_v22 = vld [vmem:[#allocation7 + $0xd8] sm:$0xff] }
 0x2be   : > { %4280 = vmatprep.subr.mxu1 %v11969_v20  ;;  %4137 = vmatpush2.msra.mxu0 %v12095_v7  ;;  %v12100_v55 = vand.u32 4294901760, %v12099_v62  ;;  %v12101_v20 = vld [vmem:[#allocation107_spill] sm:$0xff]  ;;  %v4360_v7 = vld [vmem:[#allocation7 + $0xd0] sm:$0xff] }
 0x2bf   : > { %4282 = vmatpush2.msra.mxu1 %v11970_v9  ;;  %4141 = vmatprep.subr.mxu0 %v12097_v38  ;;  %v12102_v15 = vand.u32 4294901760, %v12101_v20  ;;  %v12103_v9 = vand.u32 4294901760, %v9186_v0  ;;  %v12109_v0 = vld [vmem:[#allocation111_spill] sm:$0xff] }
 0x2c0   : > { %4284 = vmatprep.subr.mxu1 %v11971_v23  ;;  %4145 = vmatpush2.msra.mxu0 %v12098_v17  ;;  %v12106_v23 = vld [vmem:[#allocation81_spill] sm:$0xff]  ;;  %v4359_v20 = vld [vmem:[#allocation7 + $0xc8] sm:$0xff] }
 0x2c1   : > { %4286 = vmatpush2.msra.mxu1 %v11972_v28  ;;  %4149 = vmatprep.subr.mxu0 %v12100_v55  ;;  %v12105_v28 = vand.u32 4294901760, %v9204_v25  ;;  %v4344_v55 = vld [vmem:[#allocation7 + $0x50] sm:$0xff] }
 0x2c2   : > { %4288 = vmatprep.subr.mxu1 %v11973_v40  ;;  %4153 = vmatpush2.msra.mxu0 %v12102_v15  ;;  %v12107_v40 = vand.u32 4294901760, %v9208_v30  ;;  %v12115_v30 = vand.u32 4294901760, %v12114_v56  ;;  %v4343_v15 = vld [vmem:[#allocation7 + $0x48] sm:$0xff] }
 0x2c3   : > { %4290 = vmatpush2.msra.mxu1 %v11974_v50  ;;  %4157 = vmatprep.subr.mxu0 %v12103_v9  ;;  %v12108_v50 = vand.u32 4294901760, %v9224_v31  ;;  %v12118_v31 = vld [vmem:[#allocation121_spill] sm:$0xff]  ;;  %v9707_v56 = vand.u32 4294901760, %v4343_v15 }
 0x2c4   : > { %4292 = vmatprep.subr.mxu1 %v11975_v46  ;;  %4161 = vmatpush2.msra.mxu0 %v12104_v33  ;;  %v12110_v46 = vand.u32 4294901760, %v9217_v43  ;;  %v4364_v43 = vld [vmem:[#allocation7 + $0xf0] sm:$0xff] }
 0x2c5   : > { %4294 = vmatpush2.msra.mxu1 %v11976_v39  ;;  %4165 = vmatprep.subr.mxu0 %v12105_v28  ;;  %v12112_v39 = vld [vmem:[#allocation123_spill] sm:$0xff]  ;;  %v4510_v28 = vsub.f32 %v9664_v36, %v10813_v60 }
 0x2c6   : > { %4296 = vmatprep.subr.mxu1 %v12106_v23  ;;  %4169 = vmatpush2.msra.mxu0 %v12107_v40  ;;  %v12113_v25 = vand.u32 4294901760, %v12112_v39  ;;  %v4358_v23 = vld [vmem:[#allocation7 + $0xc0] sm:$0xff]  ;;  %v9703_v39 = vand.u32 4294901760, %v4344_v55 }
 0x2c7   : > { %4298 = vmatpush2.msra.mxu1 %v11977_v29  ;;  %4173 = vmatprep.subr.mxu0 %v12108_v50  ;;  %v12117_v29 = vld [vmem:[#allocation120_spill] sm:$0xff]  ;;  %v9697_v50 = vand.u32 4294901760, %v4361_v22 }
 0x2c8   : > { %4300 = vmatprep.subr.mxu1 %v12109_v0  ;;  %4177 = vmatpush2.msra.mxu0 %v12110_v46  ;;  %v9699_v0 = vand.u32 4294901760, %v4345_v3  ;;  %v9701_v46 = vand.u32 4294901760, %v4360_v7 }
 0x2c9   : > { %4302 = vmatpush2.msra.mxu1 %v12111_v21  ;;  %4181 = vmatprep.subr.mxu0 %v12113_v25  ;;  %v9705_v25 = vand.u32 4294901760, %v4359_v20 }
 0x2ca   : > { %4304 = vmatprep.subr.mxu1 %v9092_v26  ;;  %4185 = vmatpush2.msra.mxu0 %v12115_v30  ;;  %v4365_v26 = vld [vmem:[#allocation7 + $0xf8] sm:$0xff]  ;;  %v9710_v30 = vsub.f32 %v4361_v22, %v9697_v50 }
 0x2cb   : > { %4187 = vmatprep.mubr.f32.mxu0 %v12116_v5  ;;  %4306 = vmatpush2.msra.mxu1 %v12117_v29  ;;  %v9617_v14 = vand.u32 4294901760, %v4365_v26  ;;  %v9716_v29 = vsub.f32 %v4360_v7, %v9701_v46 }
 0x2cc   : > { %4189 = vmatmul.mubr.f32.vlgmr.msra.gmra.mxu0 %v12118_v31  ;;  %4308 = vmatprep.subr.mxu1 %v9140_v2  ;;  %v4349_v2 = vld [vmem:[#allocation7 + $0x78] sm:$0xff] }
 0x2cd   : > { %4324 = vmatprep.mubr.f32.mxu1 %v12116_v5  ;;  %4310 = vmatpush2.msra.mxu1 %v9095_v34  ;;  %12119 = vst [vmem:[#allocation12_spill] sm:$0xff] %v9617_v14  ;;  %v9619_v34 = vand.u32 4294901760, %v4349_v2  ;;  %v9630_v45 = vsub.f32 %v4365_v26, %v9617_v14  ;;  %v9713_v5 = vsub.f32 %v4345_v3, %v9699_v0  ;;  %v4511_v26 = vand.u32 4294901760, %v4510_v28  ;;  %v4342_v28 = vld [vmem:[#allocation7 + $0x40] sm:$0xff] }
 0x2ce   : > { %4312 = vmatprep.subr.mxu1 %v11982_v8  ;;  %v9621_v8 = vand.u32 4294901760, %v4364_v43  ;;  %5354 = vmatprep.subr.mxu0 %v9617_v14 }
 0x2cf   : > { %4314 = vmatpush2.msra.mxu1 %v9172_v59  ;;  %v4348_v59 = vld [vmem:[#allocation7 + $0x70] sm:$0xff]  ;;  %12120 = vst [vmem:[#allocation73_spill] sm:$0xff] %v9630_v45  ;;  %v9633_v52 = vsub.f32 %v4349_v2, %v9619_v34  ;;  %5355 = vmatpush3.msra.mxu0 %v9619_v34  ;;  %v10823_v61 = vand.u32 4294901760, %v9630_v45  ;;  %v9722_v2 = vsub.f32 %v4344_v55, %v9703_v39 }
 0x2d0   : > { %4316 = vmatprep.subr.mxu1 %v9174_v16  ;;  %v4347_v16 = vld [vmem:[#allocation7 + $0x68] sm:$0xff]  ;;  %v9623_v47 = vand.u32 4294901760, %v4348_v59  ;;  %v9636_v49 = vsub.f32 %v4364_v43, %v9621_v8  ;;  %5356 = vmatprep.subr.mxu0 %v9621_v8  ;;  %v9725_v43 = vsub.f32 %v4359_v20, %v9705_v25 }
 0x2d1   : > { %4318 = vmatpush2.msra.mxu1 %v9182_v13  ;;  %v9625_v13 = vand.u32 4294901760, %v4363_v41  ;;  %v10821_v51 = vand.u32 4294901760, %v9633_v52  ;;  %v4601_v10 = vsub.f32 %v9630_v45, %v10823_v61 }
 0x2d2   : > { %4320 = vmatprep.subr.mxu1 %v9198_v1  ;;  %v9627_v1 = vand.u32 4294901760, %v4347_v16  ;;  %v9642_v24 = vsub.f32 %v4348_v59, %v9623_v47  ;;  %v10820_v54 = vand.u32 4294901760, %v9636_v49  ;;  %5357 = vmatpush3.msra.mxu0 %v9623_v47  ;;  %12121 = vst [vmem:[#allocation15_spill] sm:$0xff] %v9725_v43  ;;  %v9728_v59 = vsub.f32 %v4343_v15, %v9707_v56 }
 0x2d3   : > { %4322 = vmatpush2.msra.mxu1 %v9200_v37  ;;  %v4362_v37 = vld [vmem:[#allocation7 + $0xe0] sm:$0xff]  ;;  %v9645_v53 = vsub.f32 %v4363_v41, %v9625_v13  ;;  %v4489_v6 = vsub.f32 %v9633_v52, %v10821_v51  ;;  %5358 = vmatprep.subr.mxu0 %v9625_v13  ;;  %v4602_v27 = vand.u32 4294901760, %v4601_v10  ;;  %v10811_v41 = vand.u32 4294901760, %v9710_v30 }
 0x2d4   : > { %4326 = vmatmul.mubr.f32.vlgmr.msra.gmra.mxu1 %v12118_v31  ;;  %v9638_v11 = vand.u32 4294901760, %v4362_v37  ;;  %v9648_v48 = vsub.f32 %v4347_v16, %v9627_v1  ;;  %v10818_v44 = vand.u32 4294901760, %v9642_v24  ;;  %v4608_v18 = vsub.f32 %v9636_v49, %v10820_v54  ;;  %5359 = vmatpush3.msra.mxu0 %v9627_v1  ;;  %12122 = vst [vmem:[#allocation38_spill] sm:$0xff] %v9728_v59 }
 0x2d5   : > { %v10817_v58 = vand.u32 4294901760, %v9645_v53  ;;  %v4490_v38 = vand.u32 4294901760, %v4489_v6  ;;  %5389 = vmatprep.subr.mxu1 %v4602_v27  ;;  %v9718_v31 = vand.u32 4294901760, %v4358_v23  ;;  %v10810_v16 = vand.u32 4294901760, %v9713_v5 }
 0x2d6   : > { %v9657_v32 = vsub.f32 %v4362_v37, %v9638_v11  ;;  %v10815_v42 = vand.u32 4294901760, %v9648_v48  ;;  %v4496_v63 = vsub.f32 %v9642_v24, %v10818_v44  ;;  %v4609_v17 = vand.u32 4294901760, %v4608_v18  ;;  %5360 = vmatprep.subr.mxu0 %v9638_v11  ;;  %v4352_v44 = vld [vmem:[#allocation7 + $0x90] sm:$0xff] }
 0x2d7   : > { %v4615_v4 = vsub.f32 %v9645_v53, %v10817_v58  ;;  %5361 = vmatpush3.msra.mxu0 %v9650_v57  ;;  %5390 = vmatpush3.msra.mxu1 %v4490_v38  ;;  %v10809_v37 = vand.u32 4294901760, %v9716_v29  ;;  %v9735_v12 = vsub.f32 %v4358_v23, %v9718_v31  ;;  %v10807_v10 = vand.u32 4294901760, %v9722_v2 }
 0x2d8   : > { %v10814_v19 = vand.u32 4294901760, %v9657_v32  ;;  %v4503_v35 = vsub.f32 %v9648_v48, %v10815_v42  ;;  %v4497_v9 = vand.u32 4294901760, %v4496_v63  ;;  %5391 = vmatprep.subr.mxu1 %v4609_v17  ;;  %5362 = vmatprep.subr.mxu0 %v9697_v50  ;;  %v10806_v6 = vand.u32 4294901760, %v9725_v43  ;;  %v4337_v42 = vld [vmem:[#allocation7 + $0x18] sm:$0xff] }
 0x2d9   : > { %v4616_v33 = vand.u32 4294901760, %v4615_v4  ;;  %5363 = vmatpush3.msra.mxu0 %v9699_v0  ;;  %12123 = vst [vmem:[#allocation36_spill] sm:$0xff] %v9735_v12  ;;  %v10805_v18 = vand.u32 4294901760, %v9728_v59  ;;  %v4629_v63 = vsub.f32 %v9710_v30, %v10811_v41  ;;  %v4517_v4 = vsub.f32 %v9713_v5, %v10810_v16  ;;  %v4353_v41 = vld [vmem:[#allocation7 + $0x98] sm:$0xff] }
 0x2da   : > { %v4622_v62 = vsub.f32 %v9657_v32, %v10814_v19  ;;  %v4504_v40 = vand.u32 4294901760, %v4503_v35  ;;  %5392 = vmatpush3.msra.mxu1 %v4497_v9  ;;  %5364 = vmatprep.subr.mxu0 %v9701_v46  ;;  %v4636_v35 = vsub.f32 %v9716_v29, %v10809_v37  ;;  %v10804_v22 = vand.u32 4294901760, %v9735_v12 }
 0x2db   : > { %5393 = vmatprep.subr.mxu1 %v4616_v33  ;;  %5365 = vmatpush3.msra.mxu0 %v9703_v39  ;;  %v4524_v3 = vsub.f32 %v9722_v2, %v10807_v10  ;;  %v4643_v7 = vsub.f32 %v9725_v43, %v10806_v6  ;;  %v4531_v27 = vsub.f32 %v9728_v59, %v10805_v18  ;;  %v4630_v38 = vand.u32 4294901760, %v4629_v63  ;;  %v4354_v10 = vld [vmem:[#allocation7 + $0xa0] sm:$0xff] }
 0x2dc   : > { %v4623_v21 = vand.u32 4294901760, %v4622_v62  ;;  %5394 = vmatpush3.msra.mxu1 %v4504_v40  ;;  %5366 = vmatprep.subr.mxu0 %v9705_v25  ;;  %v4518_v17 = vand.u32 4294901760, %v4517_v4  ;;  %v4637_v62 = vand.u32 4294901760, %v4636_v35  ;;  %v4650_v55 = vsub.f32 %v9735_v12, %v10804_v22  ;;  %v4357_v40 = vld [vmem:[#allocation7 + $0xb8] sm:$0xff]  ;;  %v4356_v35 = vld [vmem:[#allocation7 + $0xb0] sm:$0xff] }
 0x2dd   : > { %5367 = vmatpush3.msra.mxu0 %v9707_v56  ;;  %v4525_v20 = vand.u32 4294901760, %v4524_v3  ;;  %v4644_v15 = vand.u32 4294901760, %v4643_v7  ;;  %v4532_v9 = vand.u32 4294901760, %v4531_v27  ;;  %v9767_v23 = vand.u32 4294901760, %v4342_v28  ;;  %v4340_v27 = vld [vmem:[#allocation7 + $0x30] sm:$0xff] }
 0x2de   : > { %5395 = vmatprep.subr.mxu1 %v4623_v21  ;;  %5368 = vmatprep.subr.mxu0 %v9718_v31  ;;  %v4651_v33 = vand.u32 4294901760, %v4650_v55  ;;  %v9769_v21 = vand.u32 4294901760, %v4357_v40  ;;  %v9780_v7 = vand.u32 4294901760, %v4356_v35  ;;  %v4355_v55 = vld [vmem:[#allocation7 + $0xa8] sm:$0xff]  ;;  %v9830_v58 = vand.u32 4294901760, %v4354_v10 }
 0x2df   : > { %5396 = vmatpush3.msra.mxu1 %v4511_v26  ;;  %v4341_v26 = vld [vmem:[#allocation7 + $0x38] sm:$0xff]  ;;  %v9772_v63 = vsub.f32 %v4342_v28, %v9767_v23  ;;  %5369 = vmatpush3.msra.mxu0 %v9767_v23  ;;  %v9838_v51 = vand.u32 4294901760, %v4353_v41 }
 0x2e0   : > { %5397 = vmatprep.subr.mxu1 %v4630_v38  ;;  %v9774_v4 = vand.u32 4294901760, %v4341_v26  ;;  %v9778_v3 = vsub.f32 %v4357_v40, %v9769_v21  ;;  %5370 = vmatprep.subr.mxu0 %v9769_v21  ;;  %12134 = vst [vmem:[#allocation52_spill] sm:$0xff] %v9830_v58 }
 0x2e1   : > { %5398 = vmatpush3.msra.mxu1 %v4518_v17  ;;  %12124 = vst [vmem:[#allocation17_spill] sm:$0xff] %v9772_v63  ;;  %v10808_v38 = vand.u32 4294901760, %v9772_v63  ;;  %12136 = vst [vmem:[#allocation103_spill] sm:$0xff] %v9838_v51 }
 0x2e2   : > { %5399 = vmatprep.subr.mxu1 %v4637_v62  ;;  %12125 = vst [vmem:[#allocation21_spill] sm:$0xff] %v9778_v3  ;;  %v9785_v17 = vsub.f32 %v4341_v26, %v9774_v4  ;;  %v9787_v62 = vand.u32 4294901760, %v4340_v27  ;;  %5371 = vmatpush3.msra.mxu0 %v9774_v4 }
 0x2e3   : > { %5400 = vmatpush3.msra.mxu1 %v4525_v20  ;;  %v10812_v20 = vand.u32 4294901760, %v9778_v3  ;;  %5372 = vmatprep.subr.mxu0 %v9780_v7  ;;  %v4538_v28 = vsub.f32 %v9772_v63, %v10808_v38  ;;  %v4338_v38 = vld [vmem:[#allocation7 + $0x20] sm:$0xff] }
 0x2e4   : > { %5401 = vmatprep.subr.mxu1 %v4644_v15  ;;  %12126 = vst [vmem:[#allocation14_spill] sm:$0xff] %v9785_v17  ;;  %12127 = vst [vmem:[#allocation20_spill] sm:$0xff] %v9787_v62  ;;  %v9792_v15 = vsub.f32 %v4356_v35, %v9780_v7  ;;  %v10816_v40 = vand.u32 4294901760, %v9785_v17  ;;  %v9802_v26 = vsub.f32 %v4340_v27, %v9787_v62  ;;  %5373 = vmatpush3.msra.mxu0 %v9787_v62 }
 0x2e5   : > { %5402 = vmatpush3.msra.mxu1 %v4532_v9  ;;  %v9794_v9 = vand.u32 4294901760, %v4355_v55  ;;  %v4657_v35 = vsub.f32 %v9778_v3, %v10812_v20  ;;  %v4539_v37 = vand.u32 4294901760, %v4538_v28 }
 0x2e6   : > { %5403 = vmatprep.subr.mxu1 %v4651_v33  ;;  %12128 = vst [vmem:[#allocation49_spill] sm:$0xff] %v9792_v15  ;;  %v4339_v33 = vld [vmem:[#allocation7 + $0x28] sm:$0xff]  ;;  %12130 = vst [vmem:[#allocation57_spill] sm:$0xff] %v9802_v26  ;;  %v10819_v22 = vand.u32 4294901760, %v9792_v15  ;;  %v4545_v27 = vsub.f32 %v9785_v17, %v10816_v40  ;;  %v10822_v16 = vand.u32 4294901760, %v9802_v26 }
 0x2e7   : > { %12129 = vst [vmem:[#allocation41_spill] sm:$0xff] %v9794_v9  ;;  %v9810_v18 = vsub.f32 %v4355_v55, %v9794_v9  ;;  %v9812_v6 = vand.u32 4294901760, %v4339_v33  ;;  %5374 = vmatprep.subr.mxu0 %v9794_v9  ;;  %v4658_v20 = vand.u32 4294901760, %v4657_v35  ;;  %5404 = vmatpush3.msra.mxu1 %v4539_v37  ;;  %v9832_v35 = vand.u32 4294901760, %v4338_v38  ;;  %v4336_v37 = vld [vmem:[#allocation7 + $0x10] sm:$0xff] }
 0x2e8   : > { %v4664_v55 = vsub.f32 %v9792_v15, %v10819_v22  ;;  %v4546_v28 = vand.u32 4294901760, %v4545_v27  ;;  %v4552_v40 = vsub.f32 %v9802_v26, %v10822_v16  ;;  %v9841_v16 = vsub.f32 %v4354_v10, %v9830_v58 }
 0x2e9   : > { %12131 = vst [vmem:[#allocation64_spill] sm:$0xff] %v9810_v18  ;;  %12132 = vst [vmem:[#allocation101_spill] sm:$0xff] %v9812_v6  ;;  %v10826_v60 = vand.u32 4294901760, %v9810_v18  ;;  %v9824_v19 = vsub.f32 %v4339_v33, %v9812_v6  ;;  %5375 = vmatpush3.msra.mxu0 %v9812_v6  ;;  %5405 = vmatprep.subr.mxu1 %v4658_v20  ;;  %v9844_v61 = vsub.f32 %v4338_v38, %v9832_v35 }
 0x2ea   : > { %12135 = vst [vmem:[#allocation51_spill] sm:$0xff] %v9832_v35  ;;  %v4665_v22 = vand.u32 4294901760, %v4664_v55  ;;  %5406 = vmatpush3.msra.mxu1 %v4546_v28  ;;  %v4553_v27 = vand.u32 4294901760, %v4552_v40  ;;  %12137 = vst [vmem:[#allocation99_spill] sm:$0xff] %v9841_v16  ;;  %v9846_v26 = vand.u32 4294901760, %v4337_v42  ;;  %5376 = vmatprep.subr.mxu0 %v9830_v58  ;;  %v9855_v40 = vand.u32 4294901760, %v4352_v44 }
 0x2eb   : > { %12133 = vst [vmem:[#allocation44_spill] sm:$0xff] %v9824_v19  ;;  %v4671_v33 = vsub.f32 %v9810_v18, %v10826_v60  ;;  %v10827_v54 = vand.u32 4294901760, %v9824_v19  ;;  %12138 = vst [vmem:[#allocation106_spill] sm:$0xff] %v9844_v61  ;;  %v9853_v60 = vsub.f32 %v4353_v41, %v9838_v51  ;;  %5377 = vmatpush3.msra.mxu0 %v9832_v35  ;;  %v10834_v10 = vand.u32 4294901760, %v9841_v16 }
 0x2ec   : > { %12139 = vst [vmem:[#allocation119_spill] sm:$0xff] %v9846_v26  ;;  %5407 = vmatprep.subr.mxu1 %v4665_v22  ;;  %12141 = vst [vmem:[#allocation55_spill] sm:$0xff] %v9855_v40  ;;  %v10839_v38 = vand.u32 4294901760, %v9844_v61  ;;  %v9861_v28 = vsub.f32 %v4337_v42, %v9846_v26  ;;  %v9863_v22 = vand.u32 4294901760, %v4336_v37  ;;  %5378 = vmatprep.subr.mxu0 %v9838_v51 }
 0x2ed   : > { %v4672_v20 = vand.u32 4294901760, %v4671_v33  ;;  %v4559_v55 = vsub.f32 %v9824_v19, %v10827_v54  ;;  %12140 = vst [vmem:[#allocation61_spill] sm:$0xff] %v9853_v60  ;;  %5408 = vmatpush3.msra.mxu1 %v4553_v27  ;;  %v4351_v33 = vld [vmem:[#allocation7 + $0x88] sm:$0xff]  ;;  %v10844_v54 = vand.u32 4294901760, %v9853_v60  ;;  %v9868_v19 = vsub.f32 %v4352_v44, %v9855_v40  ;;  %5379 = vmatpush3.msra.mxu0 %v9846_v26  ;;  %v4334_v26 = vld [vmem:[#allocation7] sm:$0xff] }
 0x2ee   : > { %12142 = vst [vmem:[#allocation58_spill] sm:$0xff] %v9861_v28  ;;  %12143 = vst [vmem:[#allocation22_spill] sm:$0xff] %v9863_v22  ;;  %v4678_v27 = vsub.f32 %v9841_v16, %v10834_v10  ;;  %v4566_v42 = vsub.f32 %v9844_v61, %v10839_v38  ;;  %5380 = vmatprep.subr.mxu0 %v9855_v40  ;;  %v9886_v10 = vand.u32 4294901760, %v4351_v33  ;;  %v4350_v16 = vld [vmem:[#allocation7 + $0x80] sm:$0xff] }
 0x2ef   : > { %5409 = vmatprep.subr.mxu1 %v4672_v20  ;;  %v4560_v41 = vand.u32 4294901760, %v4559_v55  ;;  %12144 = vst [vmem:[#allocation66_spill] sm:$0xff] %v9868_v19  ;;  %v9879_v20 = vsub.f32 %v4336_v37, %v9863_v22  ;;  %v4335_v55 = vld [vmem:[#allocation7 + $0x8] sm:$0xff]  ;;  %v4685_v44 = vsub.f32 %v9853_v60, %v10844_v54  ;;  %v10851_v15 = vand.u32 4294901760, %v9868_v19  ;;  %5381 = vmatpush3.msra.mxu0 %v9863_v22 }
 0x2f0   : > { %12146 = vst [vmem:[#allocation35_spill] sm:$0xff] %v9886_v10  ;;  %v4679_v38 = vand.u32 4294901760, %v4678_v27  ;;  %v4567_v18 = vand.u32 4294901760, %v4566_v42  ;;  %v12147_v37 = vand.u32 4294901760, %v9861_v28  ;;  %v9897_v60 = vsub.f32 %v4351_v33, %v9886_v10  ;;  %5382 = vmatprep.subr.mxu0 %v9886_v10 }
 0x2f1   : > { %12145 = vst [vmem:[#allocation74_spill] sm:$0xff] %v9879_v20  ;;  %5410 = vmatpush3.msra.mxu1 %v4560_v41  ;;  %v10852_v41 = vand.u32 4294901760, %v9879_v20  ;;  %v4686_v40 = vand.u32 4294901760, %v4685_v44  ;;  %v4692_v54 = vsub.f32 %v9868_v19, %v10851_v15  ;;  %v9899_v17 = vand.u32 4294901760, %v4335_v55 }
 0x2f2   : > { %v4573_v61 = vsub.f32 %v9861_v28, %v12147_v37  ;;  %12148 = vst [vmem:[#allocation47_spill] sm:$0xff] %v9897_v60  ;;  %5411 = vmatprep.subr.mxu1 %v4679_v38  ;;  %v9905_v37 = vand.u32 4294901760, %v4350_v16  ;;  %v9907_v44 = vand.u32 4294901760, %v4334_v26  ;;  %v10853_v15 = vand.u32 4294901760, %v9897_v60 }
 0x2f3   : > { %12149 = vst [vmem:[#allocation56_spill] sm:$0xff] %v9899_v17  ;;  %v4580_v42 = vsub.f32 %v9879_v20, %v10852_v41  ;;  %5412 = vmatpush3.msra.mxu1 %v4567_v18  ;;  %v4693_v28 = vand.u32 4294901760, %v4692_v54  ;;  %v9911_v33 = vsub.f32 %v4335_v55, %v9899_v17  ;;  %5383 = vmatpush3.msra.mxu0 %v9899_v17 }
 0x2f4   : > { %v4574_v27 = vand.u32 4294901760, %v4573_v61  ;;  %12150 = vst [vmem:[#allocation60_spill] sm:$0xff] %v9905_v37  ;;  %12151 = vst [vmem:[#allocation82_spill] sm:$0xff] %v9907_v44  ;;  %5413 = vmatprep.subr.mxu1 %v4686_v40  ;;  %v9915_v61 = vsub.f32 %v4350_v16, %v9905_v37  ;;  %v9918_v41 = vsub.f32 %v4334_v26, %v9907_v44  ;;  %5384 = vmatprep.subr.mxu0 %v9905_v37 }
 0x2f5   : > { %12152 = vst [vmem:[#allocation96_spill] sm:$0xff] %v9911_v33  ;;  %v4581_v38 = vand.u32 4294901760, %v4580_v42  ;;  %v4699_v54 = vsub.f32 %v9897_v60, %v10853_v15  ;;  %v10856_v18 = vand.u32 4294901760, %v9911_v33  ;;  %5385 = vmatpush3.msra.mxu0 %v9907_v44 }
 0x2f6   : > { %12153 = vst [vmem:[#allocation86_spill] sm:$0xff] %v9915_v61  ;;  %12154 = vst [vmem:[#allocation68_spill] sm:$0xff] %v9918_v41  ;;  %5414 = vmatpush3.msra.mxu1 %v4574_v27  ;;  %v10862_v40 = vand.u32 4294901760, %v9915_v61  ;;  %v10869_v16 = vand.u32 4294901760, %v9918_v41  ;;  %5424 = vmatprep.subr.mxu0 %v9630_v45  ;;  %v1013_v45 = vpop.f32.mrf.mxu1 }
 0x2f7   : > { %5415 = vmatprep.subr.mxu1 %v4693_v28  ;;  %v4700_v26 = vand.u32 4294901760, %v4699_v54  ;;  %v4587_v55 = vsub.f32 %v9911_v33, %v10856_v18  ;;  %v470_v54 = vlaneseq }
 0x2f8   : > { %5416 = vmatpush3.msra.mxu1 %v4581_v38  ;;  %v4706_v27 = vsub.f32 %v9915_v61, %v10862_v40  ;;  %v4594_v28 = vsub.f32 %v9918_v41, %v10869_v16  ;;  %v620_v38 = vpop.f32.mrf.mxu0  ;;  %v1015_v40 = vpop.f32.mrf.mxu1 }
 0x2f9   : > { %5417 = vmatprep.subr.mxu1 %v4700_v26  ;;  %v4588_v42 = vand.u32 4294901760, %v4587_v55  ;;  %v471_v20 = vshrl.u32 %v470_v54, 7  ;;  %v468_v26 = vld [vmem:[%s10162_s2] sm:$0x3] }
 0x2fa   : > { %v4707_v15 = vand.u32 4294901760, %v4706_v27  ;;  %v4595_v60 = vand.u32 4294901760, %v4594_v28  ;;  %v622_v18 = vpop.f32.mrf.mxu0  ;;  %v1357_v19 = vpop.f32.mrf.mxu1 }
 0x2fb   : > { %5418 = vmatpush3.msra.mxu1 %v4588_v42  ;;  %v472_v44 = vsub.s32 0, %v471_v20  ;;  %v476_v27 = vsub.s32 1, %v471_v20 }
 0x2fc   : > { %5419 = vmatprep.subr.mxu1 %v4707_v15  ;;  %v1216_v33 = vpop.f32.mrf.mxu0  ;;  %v1359_v15 = vpop.f32.mrf.mxu1 }
 0x2fd   : > { %5420 = vmatpush3.msra.mxu1 %v4595_v60  ;;  %v473_v60 = vrot.slane %v468_v26, %v472_v44  ;;  %v477_v16 = vrot.slane %v468_v26, %v476_v27 }
 0x2fe   : > { %5459 = vmatprep.subr.mxu1 %v9617_v14  ;;  %v1218_v61 = vpop.f32.mrf.mxu0  ;;  %v1759_v42 = vpop.f32.mrf.mxu1 }
 0x2ff   : > { %v621_v14 = vadd.f32 %v620_v38, %v473_v60  ;;  %v623_v17 = vadd.f32 %v622_v18, %v477_v16 }
 0x300   : > { %v1622_v55 = vpop.f32.mrf.mxu0  ;;  %v1761_v37 = vpop.f32.mrf.mxu1 }
 0x301   : > { %v1014_v22 = vadd.f32 %v1013_v45, %v621_v14  ;;  %v1016_v3 = vadd.f32 %v1015_v40, %v623_v17 }
 0x302   : > { %v1624_v28 = vpop.f32.mrf.mxu0  ;;  %v2297_v10 = vpop.f32.mrf.mxu1 }
 0x303   : > { %v1217_v35 = vadd.f32 %v1216_v33, %v1014_v22  ;;  %v1219_v58 = vadd.f32 %v1218_v61, %v1016_v3 }
 0x304   : > { %v1904_v41 = vpop.f32.mrf.mxu0  ;;  %v2299_v63 = vpop.f32.mrf.mxu1 }
 0x305   : > { %v1358_v12 = vadd.f32 %v1357_v19, %v1217_v35  ;;  %v1360_v59 = vadd.f32 %v1359_v15, %v1219_v58 }
 0x306   : > { %v1906_v54 = vpop.f32.mrf.mxu0  ;;  %v2641_v20 = vpop.f32.mrf.mxu1 }
 0x307   : > { %v1623_v44 = vadd.f32 %v1622_v55, %v1358_v12  ;;  %v1625_v43 = vadd.f32 %v1624_v28, %v1360_v59 }
 0x308   : > { %v2500_v51 = vpop.f32.mrf.mxu0  ;;  %v2643_v27 = vpop.f32.mrf.mxu1 }
 0x309   : > { %v1760_v26 = vadd.f32 %v1759_v42, %v1623_v44  ;;  %v1762_v38 = vadd.f32 %v1761_v37, %v1625_v43 }
 0x30a   : > { %v2502_v6 = vpop.f32.mrf.mxu0  ;;  %v3043_v16 = vpop.f32.mrf.mxu1 }
 0x30b   : > { %v1905_v60 = vadd.f32 %v1904_v41, %v1760_v26  ;;  %v1907_v62 = vadd.f32 %v1906_v54, %v1762_v38 }
 0x30c   : > { %v2906_v9 = vpop.f32.mrf.mxu0  ;;  %v3045_v33 = vpop.f32.mrf.mxu1 }
 0x30d   : > { %v2298_v14 = vadd.f32 %v2297_v10, %v1905_v60  ;;  %v2300_v17 = vadd.f32 %v2299_v63, %v1907_v62 }
 0x30e   : > { %v2908_v18 = vpop.f32.mrf.mxu0 }
 0x30f   : > { %v2501_v22 = vadd.f32 %v2500_v51, %v2298_v14  ;;  %v2503_v3 = vadd.f32 %v2502_v6, %v2300_v17 }
 0x310   : > { %v3188_v45 = vpop.f32.mrf.mxu0 }
 0x311   : > { %v2642_v19 = vadd.f32 %v2641_v20, %v2501_v22  ;;  %v3581_v61 = vpop.f32.mrf.mxu1  ;;  %v2644_v58 = vadd.f32 %v2643_v27, %v2503_v3 }
 0x312   : > { %v3190_v35 = vpop.f32.mrf.mxu0 }
 0x313   : > { %v2907_v12 = vadd.f32 %v2906_v9, %v2642_v19  ;;  %v2909_v59 = vadd.f32 %v2908_v18, %v2644_v58  ;;  %v3583_v15 = vpop.f32.mrf.mxu1 }
 0x315   : > { %v3044_v55 = vadd.f32 %v3043_v16, %v2907_v12  ;;  %v3046_v43 = vadd.f32 %v3045_v33, %v2909_v59  ;;  %v12155_v59 = vld [vmem:[#allocation20_spill] sm:$0xff] }
 0x317   : > { %v3189_v41 = vadd.f32 %v3188_v45, %v3044_v55  ;;  %v3191_v42 = vadd.f32 %v3190_v35, %v3046_v43  ;;  %v12156_v55 = vld [vmem:[#allocation15_spill] sm:$0xff]  ;;  %v12158_v43 = vld [vmem:[#allocation38_spill] sm:$0xff] }
 0x319   : > { %v3582_v10 = vadd.f32 %v3581_v61, %v3189_v41  ;;  %v3584_v63 = vadd.f32 %v3583_v15, %v3191_v42  ;;  %v12157_v15 = vld [vmem:[#allocation41_spill] sm:$0xff] }
 0x31a   : > { %v12159_v41 = vld [vmem:[#allocation101_spill] sm:$0xff] }
 0x31b   : > { %v12162_v42 = vld [vmem:[#allocation17_spill] sm:$0xff] }
 0x34a   : > { %v3784_v40 = vpop.f32.mrf.mxu0 }
 0x34b   : > { %v3785_v51 = vadd.f32 %v3784_v40, %v3582_v10  ;;  %v12163_v10 = vld [vmem:[#allocation51_spill] sm:$0xff] }
 0x34c   : > { %v3786_v37 = vpop.f32.mrf.mxu0 }
 0x34d   : > { %v3787_v6 = vadd.f32 %v3786_v37, %v3584_v63  ;;  %v12160_v37 = vld [vmem:[#allocation36_spill] sm:$0xff]  ;;  %v12165_v63 = vld [vmem:[#allocation103_spill] sm:$0xff] }
 0x353   : > { %v3925_v28 = vpop.f32.mrf.mxu1 }
 0x354   : > { %v3926_v20 = vadd.f32 %v3925_v28, %v3785_v51  ;;  %v12161_v28 = vld [vmem:[#allocation52_spill] sm:$0xff]  ;;  %v12166_v51 = vld [vmem:[#allocation14_spill] sm:$0xff] }
 0x355   : > { %v3927_v62 = vpop.f32.mrf.mxu1 }
 0x356   : > { %v3928_v26 = vadd.f32 %v3927_v62, %v3787_v6  ;;  %v12167_v62 = vld [vmem:[#allocation119_spill] sm:$0xff]  ;;  %v12168_v6 = vld [vmem:[#allocation49_spill] sm:$0xff] }
 0x38c   : > { %v4190_v54 = vpop.f32.mrf.mxu0 }
 0x38d   : > { %v4191_v27 = vadd.f32 %v4190_v54, %v3926_v20  ;;  %v12164_v54 = vld [vmem:[#allocation21_spill] sm:$0xff]  ;;  %v12169_v20 = vld [vmem:[#allocation55_spill] sm:$0xff] }
 0x38e   : > { %v4192_v44 = vpop.f32.mrf.mxu0 }
 0x38f   : > { %v4193_v38 = vadd.f32 %v4192_v44, %v3928_v26  ;;  %v12170_v44 = vld [vmem:[#allocation57_spill] sm:$0xff]  ;;  %v12171_v26 = vld [vmem:[#allocation22_spill] sm:$0xff] }
 0x394   : > { %v4327_v9 = vpop.f32.mrf.mxu1 }
 0x395   : > { %v4328_v60 = vadd.f32 %v4327_v9, %v4191_v27  ;;  %v12172_v27 = vld [vmem:[#allocation64_spill] sm:$0xff]  ;;  %v12173_v9 = vld [vmem:[#allocation35_spill] sm:$0xff] }
 0x396   : > { %v4329_v18 = vpop.f32.mrf.mxu1 }
 0x397   : > { %v4332_v16 = vmax.f32 %v4328_v60, 0.0  ;;  %v4330_v14 = vadd.f32 %v4329_v18, %v4193_v38  ;;  %v12174_v38 = vld [vmem:[#allocation44_spill] sm:$0xff]  ;;  %v12176_v18 = vld [vmem:[#allocation99_spill] sm:$0xff] }
 0x398   : > { %v12175_v60 = vld [vmem:[#allocation56_spill] sm:$0xff] }
 0x399   : > { %v9942_v45 = vand.u32 4294901760, %v4332_v16  ;;  %v4333_v17 = vmax.f32 %v4330_v14, 0.0  ;;  %v12178_v14 = vld [vmem:[#allocation106_spill] sm:$0xff] }
 0x39b   : > { %v9945_v22 = vsub.f32 %v4332_v16, %v9942_v45  ;;  %v9947_v33 = vand.u32 4294901760, %v4333_v17  ;;  %v12177_v16 = vld [vmem:[#allocation60_spill] sm:$0xff] }
 0x39d   : > { %v4477_v3 = vand.u32 4294901760, %v9945_v22  ;;  %v4470_v19 = vsub.f32 %v4333_v17, %v9947_v33  ;;  %4710 = vmatprep.mubr.f32.mxu1 %v9947_v33  ;;  %v12179_v17 = vld [vmem:[#allocation82_spill] sm:$0xff] }
 0x39e   : > { %4712 = vmatmul.mubr.f32.vlgmr.msra.gmra.mxu1 %v9942_v45 }
 0x39f   : > { %5460 = vmatpush3.msra.mxu1 %v9619_v34  ;;  %v4471_v35 = vand.u32 4294901760, %v4470_v19  ;;  %v4478_v61 = vsub.f32 %v9945_v22, %v4477_v3 }
 0x3a0   : > { %5461 = vmatprep.subr.mxu1 %v9621_v8 }
 0x3a1   : > { %5462 = vmatpush3.msra.mxu1 %v9623_v47  ;;  %4954 = vmatprep.mubr.f32.mxu1 %v4471_v35  ;;  %v4472_v58 = vsub.f32 %v4470_v19, %v4471_v35  ;;  %v4479_v40 = vand.u32 4294901760, %v4478_v61  ;;  %v12181_v35 = vld [vmem:[#allocation12_spill] sm:$0xff]  ;;  %v12182_v61 = vld [vmem:[#allocation58_spill] sm:$0xff] }
 0x3a2   : > { %5463 = vmatprep.subr.mxu1 %v9625_v13 }
 0x3a3   : > { %5464 = vmatpush3.msra.mxu1 %v9627_v1  ;;  %v4473_v12 = vand.u32 4294901760, %v4472_v58  ;;  %v12183_v58 = vld [vmem:[#allocation66_spill] sm:$0xff] }
 0x3a4   : > { %5465 = vmatprep.subr.mxu1 %v9638_v11 }
 0x3a5   : > { %5466 = vmatpush3.msra.mxu1 %v9650_v57  ;;  %4474 = vmatprep.mubr.f32.mxu0 %v4473_v12  ;;  %v12184_v12 = vld [vmem:[#allocation74_spill] sm:$0xff] }
 0x3a6   : > { %5467 = vmatprep.subr.mxu1 %v9697_v50  ;;  %4480 = vmatmul.mubr.f32.vlgmr.msra.gmra.mxu0 %v4479_v40  ;;  %v12185_v40 = vld [vmem:[#allocation47_spill] sm:$0xff] }
 0x3a7   : > { %5425 = vmatpush3.msra.mxu0 %v9633_v52  ;;  %5468 = vmatpush3.msra.mxu1 %v9699_v0 }
 0x3a8   : > { %5426 = vmatprep.subr.mxu0 %v9636_v49  ;;  %4847 = vmatprep.mubr.f32.mxu0 %v4470_v19  ;;  %v12180_v19 = vld [vmem:[#allocation61_spill] sm:$0xff] }
 0x3a9   : > { %5469 = vmatprep.subr.mxu1 %v9701_v46  ;;  %5427 = vmatpush3.msra.mxu0 %v9642_v24 }
 0x3aa   : > { %5470 = vmatpush3.msra.mxu1 %v9703_v39  ;;  %5428 = vmatprep.subr.mxu0 %v9645_v53 }
 0x3ab   : > { %5471 = vmatprep.subr.mxu1 %v9705_v25  ;;  %5429 = vmatpush3.msra.mxu0 %v9648_v48 }
 0x3ac   : > { %5472 = vmatpush3.msra.mxu1 %v9707_v56  ;;  %5430 = vmatprep.subr.mxu0 %v9657_v32 }
 0x3ad   : > { %5473 = vmatprep.subr.mxu1 %v9718_v31  ;;  %5431 = vmatpush3.msra.mxu0 %v9664_v36 }
 0x3ae   : > { %5474 = vmatpush3.msra.mxu1 %v9767_v23  ;;  %5432 = vmatprep.subr.mxu0 %v9710_v30 }
 0x3af   : > { %5475 = vmatprep.subr.mxu1 %v9769_v21  ;;  %5433 = vmatpush3.msra.mxu0 %v9713_v5 }
 0x3b0   : > { %5476 = vmatpush3.msra.mxu1 %v9774_v4  ;;  %5434 = vmatprep.subr.mxu0 %v9716_v29 }
 0x3b1   : > { %5477 = vmatprep.subr.mxu1 %v9780_v7  ;;  %5435 = vmatpush3.msra.mxu0 %v9722_v2 }
 0x3b2   : > { %5478 = vmatpush3.msra.mxu1 %v12155_v59  ;;  %5436 = vmatprep.subr.mxu0 %v12156_v55 }
 0x3b3   : > { %5479 = vmatprep.subr.mxu1 %v12157_v15  ;;  %5437 = vmatpush3.msra.mxu0 %v12158_v43 }
 0x3b4   : > { %5480 = vmatpush3.msra.mxu1 %v12159_v41  ;;  %5438 = vmatprep.subr.mxu0 %v12160_v37 }
 0x3b5   : > { %5481 = vmatprep.subr.mxu1 %v12161_v28  ;;  %5439 = vmatpush3.msra.mxu0 %v12162_v42 }
 0x3b6   : > { %5482 = vmatpush3.msra.mxu1 %v12163_v10  ;;  %5440 = vmatprep.subr.mxu0 %v12164_v54 }
 0x3b7   : > { %5483 = vmatprep.subr.mxu1 %v12165_v63  ;;  %5441 = vmatpush3.msra.mxu0 %v12166_v51 }
 0x3b8   : > { %5484 = vmatpush3.msra.mxu1 %v12167_v62  ;;  %5442 = vmatprep.subr.mxu0 %v12168_v6 }
 0x3b9   : > { %5485 = vmatprep.subr.mxu1 %v12169_v20  ;;  %5443 = vmatpush3.msra.mxu0 %v12170_v44 }
 0x3ba   : > { %5486 = vmatpush3.msra.mxu1 %v12171_v26  ;;  %5444 = vmatprep.subr.mxu0 %v12172_v27 }
 0x3bb   : > { %5487 = vmatprep.subr.mxu1 %v12173_v9  ;;  %5445 = vmatpush3.msra.mxu0 %v12174_v38 }
 0x3bc   : > { %5488 = vmatpush3.msra.mxu1 %v12175_v60  ;;  %5446 = vmatprep.subr.mxu0 %v12176_v18 }
 0x3bd   : > { %5489 = vmatprep.subr.mxu1 %v12177_v16  ;;  %5447 = vmatpush3.msra.mxu0 %v12178_v14 }
 0x3be   : > { %5490 = vmatpush3.msra.mxu1 %v12179_v17  ;;  %5448 = vmatprep.subr.mxu0 %v12180_v19 }
 0x3bf   : > { %4958 = vmatmul.mubr.f32.vlgmr.msra.gmra.mxu1 %v4477_v3  ;;  %5529 = vmatprep.subr.mxu1 %v12181_v35  ;;  %v12186_v3 = vld [vmem:[#allocation96_spill] sm:$0xff]  ;;  %v12187_v35 = vld [vmem:[#allocation86_spill] sm:$0xff] }
 0x3c0   : > { %5449 = vmatpush3.msra.mxu0 %v12182_v61  ;;  %5530 = vmatpush3.msra.mxu1 %v9619_v34  ;;  %v12188_v34 = vld [vmem:[#allocation68_spill] sm:$0xff] }
 0x3c1   : > { %5228 = vmatprep.mubr.f32.mxu1 %v9947_v33  ;;  %5450 = vmatprep.subr.mxu0 %v12183_v58 }
 0x3c2   : > { %5531 = vmatprep.subr.mxu1 %v9621_v8  ;;  %5451 = vmatpush3.msra.mxu0 %v12184_v12  ;;  %v12189_v8 = vld [vmem:[#allocation73_spill] sm:$0xff] }
 0x3c3   : > { %5532 = vmatpush3.msra.mxu1 %v9623_v47  ;;  %5452 = vmatprep.subr.mxu0 %v12185_v40  ;;  %v12190_v47 = vand.u32 4294901760, %v12189_v8 }
 0x3c4   : > { %5533 = vmatprep.subr.mxu1 %v9625_v13  ;;  %5453 = vmatpush3.msra.mxu0 %v12186_v3  ;;  %v12191_v13 = vand.u32 4294901760, %v9633_v52  ;;  %v12195_v52 = vand.u32 4294901760, %v9648_v48  ;;  %v12199_v48 = vand.u32 4294901760, %v9713_v5  ;;  %v12209_v5 = vand.u32 4294901760, %v12170_v44 }
 0x3c5   : > { %5534 = vmatpush3.msra.mxu1 %v9627_v1  ;;  %5454 = vmatprep.subr.mxu0 %v12187_v35  ;;  %v12192_v1 = vand.u32 4294901760, %v9636_v49  ;;  %v12196_v49 = vand.u32 4294901760, %v9657_v32  ;;  %v12200_v32 = vand.u32 4294901760, %v9716_v29  ;;  %v12210_v29 = vand.u32 4294901760, %v12172_v27 }
 0x3c6   : > { %5535 = vmatprep.subr.mxu1 %v9638_v11  ;;  %5455 = vmatpush3.msra.mxu0 %v12188_v34  ;;  %v12193_v11 = vand.u32 4294901760, %v9642_v24  ;;  %v12197_v24 = vand.u32 4294901760, %v9664_v36  ;;  %v12201_v36 = vand.u32 4294901760, %v9722_v2  ;;  %v12212_v2 = vand.u32 4294901760, %v12176_v18 }
 0x3c7   : > { %5536 = vmatpush3.msra.mxu1 %v9650_v57  ;;  %4850 = vmatmul.mubr.f32.vlgmr.msra.gmra.mxu0 %v9945_v22  ;;  %v12194_v57 = vand.u32 4294901760, %v9645_v53  ;;  %v12198_v53 = vand.u32 4294901760, %v9710_v30  ;;  %v12208_v30 = vand.u32 4294901760, %v12168_v6  ;;  %v12217_v22 = vand.u32 4294901760, %v12184_v12 }
 0x3c8   : > { %5494 = vmatprep.subr.mxu0 %v12190_v47  ;;  %5537 = vmatprep.subr.mxu1 %v9697_v50  ;;  %v12202_v50 = vand.u32 4294901760, %v12156_v55  ;;  %v12220_v55 = vand.u32 4294901760, %v12187_v35 }
 0x3c9   : > { %5495 = vmatpush3.msra.mxu0 %v12191_v13  ;;  %5124 = vmatprep.mubr.f32.mxu0 %v9947_v33  ;;  %v12218_v33 = vand.u32 4294901760, %v12185_v40 }
 0x3ca   : > { %5538 = vmatpush3.msra.mxu1 %v9699_v0  ;;  %5496 = vmatprep.subr.mxu0 %v12192_v1  ;;  %v12203_v0 = vand.u32 4294901760, %v12158_v43 }
 0x3cb   : > { %5539 = vmatprep.subr.mxu1 %v9701_v46  ;;  %5497 = vmatpush3.msra.mxu0 %v12193_v11  ;;  %v12204_v46 = vand.u32 4294901760, %v12160_v37 }
 0x3cc   : > { %5540 = vmatpush3.msra.mxu1 %v9703_v39  ;;  %5498 = vmatprep.subr.mxu0 %v12194_v57  ;;  %v12205_v39 = vand.u32 4294901760, %v12162_v42 }
 0x3cd   : > { %5541 = vmatprep.subr.mxu1 %v9705_v25  ;;  %5499 = vmatpush3.msra.mxu0 %v12195_v52  ;;  %v12206_v25 = vand.u32 4294901760, %v12164_v54  ;;  %v5349_v54 = vld [vmem:[%s10164_s4] ss:$0 sm:$0xff] }
 0x3ce   : > { %5542 = vmatpush3.msra.mxu1 %v9707_v56  ;;  %5500 = vmatprep.subr.mxu0 %v12196_v49  ;;  %v12207_v56 = vand.u32 4294901760, %v12166_v51 }
 0x3cf   : > { %5543 = vmatprep.subr.mxu1 %v9718_v31  ;;  %5501 = vmatpush3.msra.mxu0 %v12197_v24  ;;  %v12211_v31 = vand.u32 4294901760, %v12174_v38 }
 0x3d0   : > { %5544 = vmatpush3.msra.mxu1 %v9767_v23  ;;  %5502 = vmatprep.subr.mxu0 %v12198_v53  ;;  %v12213_v23 = vand.u32 4294901760, %v12178_v14 }
 0x3d1   : > { %5545 = vmatprep.subr.mxu1 %v9769_v21  ;;  %5503 = vmatpush3.msra.mxu0 %v12199_v48  ;;  %v12214_v21 = vand.u32 4294901760, %v12180_v19 }
 0x3d2   : > { %5546 = vmatpush3.msra.mxu1 %v9774_v4  ;;  %5504 = vmatprep.subr.mxu0 %v12200_v32  ;;  %v12215_v4 = vand.u32 4294901760, %v12182_v61 }
 0x3d3   : > { %5547 = vmatprep.subr.mxu1 %v9780_v7  ;;  %5505 = vmatpush3.msra.mxu0 %v12201_v36  ;;  %v12216_v7 = vand.u32 4294901760, %v12183_v58 }
 0x3d4   : > { %5548 = vmatpush3.msra.mxu1 %v12155_v59  ;;  %5506 = vmatprep.subr.mxu0 %v12202_v50  ;;  %v12219_v59 = vand.u32 4294901760, %v12186_v3 }
 0x3d5   : > { %5549 = vmatprep.subr.mxu1 %v12157_v15  ;;  %5507 = vmatpush3.msra.mxu0 %v12203_v0  ;;  %v12221_v15 = vand.u32 4294901760, %v12188_v34 }
 0x3d6   : > { %5550 = vmatpush3.msra.mxu1 %v12159_v41  ;;  %5508 = vmatprep.subr.mxu0 %v12204_v46 }
 0x3d7   : > { %5551 = vmatprep.subr.mxu1 %v12161_v28  ;;  %5509 = vmatpush3.msra.mxu0 %v12205_v39 }
 0x3d8   : > { %5552 = vmatpush3.msra.mxu1 %v12163_v10  ;;  %5510 = vmatprep.subr.mxu0 %v12206_v25 }
 0x3d9   : > { %5553 = vmatprep.subr.mxu1 %v12165_v63  ;;  %5511 = vmatpush3.msra.mxu0 %v12207_v56 }
 0x3da   : > { %5554 = vmatpush3.msra.mxu1 %v12167_v62  ;;  %5512 = vmatprep.subr.mxu0 %v12208_v30 }
 0x3db   : > { %5555 = vmatprep.subr.mxu1 %v12169_v20  ;;  %5513 = vmatpush3.msra.mxu0 %v12209_v5 }
 0x3dc   : > { %5556 = vmatpush3.msra.mxu1 %v12171_v26  ;;  %5514 = vmatprep.subr.mxu0 %v12210_v29 }
 0x3dd   : > { %5557 = vmatprep.subr.mxu1 %v12173_v9  ;;  %5515 = vmatpush3.msra.mxu0 %v12211_v31 }
 0x3de   : > { %5558 = vmatpush3.msra.mxu1 %v12175_v60  ;;  %5516 = vmatprep.subr.mxu0 %v12212_v2 }
 0x3df   : > { %5559 = vmatprep.subr.mxu1 %v12177_v16  ;;  %5517 = vmatpush3.msra.mxu0 %v12213_v23 }
 0x3e0   : > { %5560 = vmatpush3.msra.mxu1 %v12179_v17  ;;  %5518 = vmatprep.subr.mxu0 %v12214_v21 }
 0x3e1   : > { %5230 = vmatmul.mubr.f32.vlgmr.msra.gmra.mxu1 %v9942_v45  ;;  %5519 = vmatpush3.msra.mxu0 %v12215_v4 }
 0x3e2   : > { %5520 = vmatprep.subr.mxu0 %v12216_v7 }
 0x3e3   : > { %5521 = vmatpush3.msra.mxu0 %v12217_v22 }
 0x3e4   : > { %5522 = vmatprep.subr.mxu0 %v12218_v33 }
 0x3e5   : > { %5523 = vmatpush3.msra.mxu0 %v12219_v59 }
 0x3e6   : > { %5524 = vmatprep.subr.mxu0 %v12220_v55 }
 0x3e7   : > { %5525 = vmatpush3.msra.mxu0 %v12221_v15 }
 0x3e8   : > { %5126 = vmatmul.mubr.f32.vlgmr.msra.gmra.mxu0 %v9942_v45 }
 0x45e   : > { %v5421_v41 = vpop.f32.mrf.mxu1 }
 0x460   : > { %v5422_v10 = vpop.f32.mrf.mxu1 }
 0x461   : > { %v5423_v6 = vadd.f32 %v5422_v10, %v5421_v41 }
 0x466   : > { %v5386_v43 = vpop.f32.mrf.mxu0 }
 0x468   : > { %v5387_v37 = vpop.f32.mrf.mxu0 }
 0x469   : > { %v5388_v42 = vadd.f32 %v5387_v37, %v5386_v43 }
 0x46b   : > { %v4482_v62 = vadd.f32 %v5388_v42, %v5349_v54 }
 0x46d   : > { %v4714_v26 = vadd.f32 %v5423_v6, %v4482_v62 }
 0x47f   : > { %v5491_v63 = vpop.f32.mrf.mxu1 }
 0x481   : > { %v5492_v44 = vpop.f32.mrf.mxu1 }
 0x482   : > { %v5493_v38 = vadd.f32 %v5492_v44, %v5491_v63 }
 0x487   : > { %v5456_v28 = vpop.f32.mrf.mxu0 }
 0x489   : > { %v5457_v51 = vpop.f32.mrf.mxu0 }
 0x48a   : > { %v5458_v20 = vadd.f32 %v5457_v51, %v5456_v28 }
 0x48c   : > { %v4852_v27 = vadd.f32 %v5458_v20, %v4714_v26 }
 0x48e   : > { %v4960_v16 = vadd.f32 %v5493_v38, %v4852_v27 }
 0x4a1   : > { %v5561_v45 = vpop.f32.mrf.mxu1 }
 0x4a3   : > { %v5562_v60 = vpop.f32.mrf.mxu1 }
 0x4a4   : > { %v5563_v17 = vadd.f32 %v5562_v60, %v5561_v45 }
 0x4a8   : > { %v5526_v9 = vpop.f32.mrf.mxu0 }
 0x4aa   : > { %v5527_v18 = vpop.f32.mrf.mxu0 }
 0x4ab   : > { %v5528_v14 = vadd.f32 %v5527_v18, %v5526_v9 }
 0x4ad   : > { %v5128_v19 = vadd.f32 %v5528_v14, %v4960_v16 }
 0x4af   : > { %v5232_v61 = vadd.f32 %v5563_v17, %v5128_v19 }
 0x4b1   : > { %5235 = vst [vmem:[%s269_s9] sm:$0xff] %v5232_v61 }
 0x4b2   : > { %5731 = shalt.err (!%p5728_p9)
}
 0x4b3   : > { %s5732_s24 = scalar_lea.hbm %s5248_s10, 128  ;;  %s5736_s8 = scalar_lea.hbm %s10165_s5, 256 }
 0x4b4   : > { %p5733_p13 = scmp.ne.s32.totalorder %s5248_s10, %s5732_s24  ;;  %p5737_p0 = scmp.lt.s32.totalorder %s5248_s10, %s10165_s5 }
 0x4b5   : > { %p5738_p4 = scmp.lt.s32.totalorder %s5736_s8, %s5732_s24 }
 0x4b6   : > { %p5734_p5 = pnand %p5733_p13, %p12222_p11 }
 0x4b7   : > { %p5739_p8 = por %p5738_p4, %p5737_p0 }
 0x4b8   : > { %p5735_p10 = pneg %p5734_p5 }
 0x4ba   : > { %p5740_p7 = pnand %p5739_p8, %p5735_p10 }
 0x4bc   : > { %5743 = shalt.err (!%p5740_p7)
}
 0x4bd   : > { %5577 = dma.vmem_to_hbm [thread:$0]  (%p12222_p11), %s5251_s6, 128, %s5248_s10, %s5237_s12  }
 0x4be PF: > { %s5262_s14 = sand.u32 1, %s5774_s18   ;;  %p12223_p1 = scmp.ne.s32.totalorder %s10904_s25, 0 }
 0x4bf   : > { %p12224_p2 = scmp.ge.s32.totalorder %s5786_s21, 2  ;;  %s5263_s9 = scalar_lea.sflag [#allocation4], %s5262_s14 }
 0x4c1   : > { %p5591_p6 = pnand %p12224_p2, %p12223_p1 }
 0x4c3   : > { %p5592_p12 = pneg %p5591_p6 }
 0x4c5   : > { %5769 = dma.done.wait (%p5592_p12), %s5263_s9, 128  }
 0x4c6   : > { %5771 = vsyncadd (%p5592_p12), %s5263_s9, 4294967168  ;;  %p19_p3 = scmp.ge.s32.totalorder %s5898_s17, 4   ;;  %s12225_s18 = smov %s5778_s19 }
 0x4c7   : > { %s12226_s19 = smov %s5782_s20  ;;  %s12227_s20 = smov %s5907_s28 }
 0x4c8   : > { %s12228_s21 = smov %s5898_s17  ;;  %21 = sbr.rel (!%p19_p3) target bundleno = 6 (0x6), region = 93 }
 0x4cd   :  { %5268 = vsyncpa [#allocation3], 1 }
 0x4ce   :  { %5270 = vsyncpa [#allocation3 + $0x1], 1 }
 0x4cf   :  { %5271 = vsyncpa [#allocation6], 1 }
 0x4d0   :  { %5272 = vsyncpa [#allocation4], 1 }
 0x4d1   :  { %5274 = vsyncpa [#allocation4 + $0x1], 1 }

</bundles_post_ra>
